<compile_context>
chip_gen: v6e
topology: v6e:2x2x1
jax: 0.10.0
libtpu: 0.0.40
codegen_flags: <defaults>
</compile_context>

<pallas_src>
import jax
import jax.numpy as jnp
from jax.experimental import pallas as pl
from jax.experimental.pallas import tpu as pltpu


def _round_up(x: int, m: int) -> int:
    return ((x + m - 1) // m) * m


def _cdiv(a: int, b: int) -> int:
    return (a + b - 1) // b


# ----------------------------- Pallas kernel ------------------------------ #
def _make_dconv_kernel(K, stride, Hq, Wq, Cin_p, M2, neg_slope=0.2):
    """Direct-conv kernel body: accumulate K*K statically-offset tap matmuls."""
    # Per tap: (row offset into the phase-flattened activation block,
    #           row offset into the flattened weight).  All offsets static.
    taps = []
    for kh in range(K):
        for kw in range(K):
            ph = (kh % stride) * stride + (kw % stride)     # phase plane index
            a, b = kh // stride, kw // stride               # in-phase shift
            x_off = ph * Hq * Wq + a * Wq + b
            w_off = (kh * K + kw) * Cin_p
            taps.append((x_off, w_off))

    def kernel(x_ref, w_ref, b_ref, o_ref, acc_ref):
        # x_ref  : (F, Cin_p)          bf16  phase-flattened padded image
        # w_ref  : (K*K*Cin_p, TN)     bf16  spectrally-normalized weight tile
        # b_ref  : (1, TN)             f32   bias tile
        # o_ref  : (M2, TN)            bf16  output tile (Hout*Wq rows)
        # acc_ref: (M2, TN)            f32   VMEM accumulator
        acc_ref[...] = jnp.zeros_like(acc_ref)
        for x_off, w_off in taps:
            a_tile = x_ref[pl.ds(x_off, M2), :]             # (M2, Cin_p)
            w_tile = w_ref[pl.ds(w_off, Cin_p), :]          # (Cin_p, TN)
            acc_ref[...] += jnp.dot(a_tile, w_tile,
                                    preferred_element_type=jnp.float32)
        y = acc_ref[...] + b_ref[...]
        # LeakyReLU(0.2) == max(x, 0.2*x) for slope in (0, 1): one vmul + vmax.
        o_ref[...] = jnp.maximum(y, neg_slope * y).astype(o_ref.dtype)

    return kernel


# ------------------------------- glue (JAX) -------------------------------- #
def _l2_normalize(x, eps=1e-12):
    # F.normalize(p=2, dim=0) on a column vector
    n = jnp.sqrt(jnp.sum(x * x, axis=0, keepdims=True))
    return x / jnp.maximum(n, eps)


def spectral_normalize_weight(weight, weight_u, n_iter=1, eps=1e-12):
    """Replicates Conv2DSpectralNorm power iteration; returns weight / sigma."""
    cout = weight.shape[0]
    w_flat = weight.reshape(cout, -1)                  # (Cout, Cin*K*K)
    u = weight_u                                       # (Cout, 1)
    v = None
    for _ in range(n_iter):
        v = _l2_normalize(w_flat.T @ u, eps)           # (Cin*K*K, 1)
        u = _l2_normalize(w_flat @ v, eps)             # (Cout, 1)
    sigma = (u.T @ w_flat @ v)[0, 0]
    # TODO(synk): PyTorch updates the weight_u buffer in place every training
    # forward; for a single (inference) forward only the normalized weight
    # matters, so the updated u is not persisted here.
    return weight / sigma


def dconv_forward(x, weight, bias, weight_u, ksize=5, stride=2, padding="auto",
                  out_dtype=jnp.float32):
    """Pallas implementation of DConv.forward; x is NCHW, returns NCHW."""
    N, Cin, H, W = x.shape
    K, s = int(ksize), int(stride)
    p = (K - 1) // 2 if padding == "auto" else int(padding)

    Hout = (H + 2 * p - K) // s + 1
    Wout = (W + 2 * p - K) // s + 1
    shift_max = (K - 1) // s                       # max in-phase tap shift

    # Phase-plane geometry.  Wq is rounded to 8 so every block's sublane dim
    # stays aligned; Hq gets +1 so tap slices never run past their phase plane
    # (column overruns only pollute the discarded columns w >= Wout).
    Wq = _round_up(max(Wout + shift_max, _cdiv(W + 2 * p, s)), 8)
    Hq = max(Hout + shift_max + 1, _cdiv(H + 2 * p, s))
    Hp, Wp = s * Hq, s * Wq
    M2 = Hout * Wq                                 # output rows per image
    F = s * s * Hq * Wq                            # activation rows per image
    Cin_p = _round_up(Cin, 8)                      # aligned contraction dim

    # ---- activations: NCHW -> padded NHWC -> stride-phase planes -> 2-D bf16
    # One pass over the input (vs. the 25x HBM amplification of im2col).
    x_nhwc = jnp.transpose(x, (0, 2, 3, 1))
    x_pad = jnp.pad(x_nhwc, ((0, 0), (p, Hp - H - p), (p, Wp - W - p),
                             (0, Cin_p - Cin)))
    x_ph = x_pad.reshape(N, Hq, s, Wq, s, Cin_p)
    x_ph = jnp.transpose(x_ph, (0, 2, 4, 1, 3, 5))   # (N, s, s, Hq, Wq, Cin_p)
    x_flat = x_ph.reshape(N * F, Cin_p).astype(jnp.bfloat16)

    # ---- weight / bias: spectral norm, (Cout,Cin,K,K) -> (K*K*Cin_p, Cp) bf16
    w_sn = spectral_normalize_weight(weight, weight_u)
    Cout = w_sn.shape[0]
    Cp = _round_up(Cout, 128)                      # lane-dense output channels
    tn = 256 if (Cp % 256 == 0) else 128           # 256-wide tiles when possible
    w_t = jnp.transpose(w_sn, (2, 3, 1, 0))        # (K, K, Cin, Cout)
    w_t = jnp.pad(w_t, ((0, 0), (0, 0), (0, Cin_p - Cin), (0, Cp - Cout)))
    w_mat = w_t.reshape(K * K * Cin_p, Cp).astype(jnp.bfloat16)
    b_row = jnp.pad(bias.astype(jnp.float32), (0, Cp - Cout)).reshape(1, Cp)

    kernel = _make_dconv_kernel(K, s, Hq, Wq, Cin_p, M2)
    grid = (N, Cp // tn)

    cost = pl.CostEstimate(
        flops=2 * N * Hout * Wout * K * K * Cin * Cout,
        transcendentals=0,
        bytes_accessed=(x_flat.size * 2 + w_mat.size * 2 + b_row.size * 4
                        + N * M2 * Cp * 2),
    )

    out_flat = pl.pallas_call(
        kernel,
        out_shape=jax.ShapeDtypeStruct((N * M2, Cp), jnp.bfloat16),
        grid_spec=pltpu.PrefetchScalarGridSpec(
            num_scalar_prefetch=0,
            grid=grid,
            in_specs=[
                # Per-image activation block; index constant along the inner
                # Cout axis -> fetched once per image, pipelined across images.
                pl.BlockSpec((F, Cin_p), lambda n, j: (n, 0)),
                # Resident weight / bias: single-buffered so the pipeline does
                # not burn VMEM double-buffering constant blocks.
                pl.BlockSpec((K * K * Cin_p, tn), lambda n, j: (0, j),
                             pipeline_mode=pl.Buffered(1)),
                pl.BlockSpec((1, tn), lambda n, j: (0, j),
                             pipeline_mode=pl.Buffered(1)),
            ],
            out_specs=pl.BlockSpec((M2, tn), lambda n, j: (n, j)),
            scratch_shapes=[pltpu.VMEM((M2, tn), jnp.float32)],
        ),
        compiler_params=pltpu.CompilerParams(
            # Images and Cout tiles are independent -> megacore sharding.
            dimension_semantics=("parallel", "parallel"),
            # v5e default scoped VMEM is only 16 MiB; 48 MiB fits v5e/v6e
            # (128 MiB physical) and v7x (64 MiB physical) with headroom.
            vmem_limit_bytes=48 * 1024 * 1024,
        ),
        cost_estimate=cost,
    )(x_flat, w_mat, b_row)
    # TODO(synk): for very large images the per-image activation/output blocks
    # should be tiled over Hout as well; that needs overlapping input windows
    # (pl.Element-style offsets or manual make_async_copy), not done here.

    # (N*M2, Cp) -> NHWC; drop the Wq-Wout garbage columns and the Cout pad.
    out = out_flat.reshape(N, Hout, Wq, Cp)[:, :, :Wout, :Cout]
    # Module semantics are NCHW float32.  Layout-agnostic consumers should take
    # the NHWC bf16 slab above directly and skip this transpose + cast pass.
    return jnp.transpose(out, (0, 3, 1, 2)).astype(out_dtype)


# --------------------------------- main ------------------------------------ #
if __name__ == "__main__":
    key = jax.random.PRNGKey(0)
    k_x, k_w, k_b, k_u = jax.random.split(key, 4)

    # Shapes consistent with the module: DConv(cnum_in=4, cnum_out=8)
    N, Cin, H, W = 2, 4, 16, 16
    Cout, K, stride = 8, 5, 2

    x = jax.random.normal(k_x, (N, Cin, H, W), dtype=jnp.float32)
    weight = 0.1 * jax.random.normal(k_w, (Cout, Cin, K, K), dtype=jnp.float32)
    bias = 0.1 * jax.random.normal(k_b, (Cout,), dtype=jnp.float32)
    weight_u = jax.random.normal(k_u, (Cout, 1), dtype=jnp.float32)  # stands in for trunc_normal_

    y = dconv_forward(x, weight, bias, weight_u, ksize=K, stride=stride,
                      padding="auto")
    y = jax.block_until_ready(y)

    # Reference: plain JAX conv with the same spectrally-normalized weight and
    # the same bf16 operand / f32 accumulation precision.
    w_sn = spectral_normalize_weight(weight, weight_u)
    pad = (K - 1) // 2
    y_ref = jax.lax.conv_general_dilated(
        x.astype(jnp.bfloat16), w_sn.astype(jnp.bfloat16),
        window_strides=(stride, stride),
        padding=[(pad, pad), (pad, pad)],
        dimension_numbers=("NCHW", "OIHW", "NCHW"),
        preferred_element_type=jnp.float32)
    y_ref = y_ref + bias.reshape(1, Cout, 1, 1)
    y_ref = jnp.maximum(y_ref, 0.2 * y_ref)

    assert y.shape == (N, Cout, H // stride, W // stride), y.shape
    max_err = float(jnp.max(jnp.abs(y - y_ref)))
    assert jnp.allclose(y, y_ref, atol=3e-2, rtol=3e-2), max_err
    print("KERNEL_OK")
</pallas_src>

<mosaic_0001>
module attributes {stable_mosaic.version = 11 : i64} {
  func.func @kernel(%arg0: i32, %arg1: i32, %arg2: memref<704x8xbf16, #tpu.memory_space<vmem>>, %arg3: memref<200x128xbf16, #tpu.memory_space<vmem>>, %arg4: memref<1x128xf32, #tpu.memory_space<vmem>>, %arg5: memref<128x128xbf16, #tpu.memory_space<vmem>>, %arg6: memref<128x128xf32, #tpu.memory_space<vmem>>) attributes {dimension_semantics = [#tpu.dimension_semantics<parallel>, #tpu.dimension_semantics<parallel>], iteration_bounds = array<i64: 2, 1>, scalar_prefetch = 0 : i64, scratch_operands = 1 : i64, tpu.core_type = #tpu.core_type<tc>, window_params = [{transform_indices = @transform_0, window_bounds = array<i64: 704, 8>}, {pipeline_mode = #tpu.pipeline_mode<synchronous>, transform_indices = @transform_1, window_bounds = array<i64: 200, 128>}, {pipeline_mode = #tpu.pipeline_mode<synchronous>, transform_indices = @transform_2, window_bounds = array<i64: 1, 128>}, {transform_indices = @transform_3, window_bounds = array<i64: 128, 128>}]} {
    %cst = arith.constant 0.000000e+00 : f32
    %0 = vector.broadcast %cst : f32 to vector<128x128xf32>
    %c0 = arith.constant 0 : index
    %c0_0 = arith.constant 0 : index
    %1 = vector.load %arg6[%c0, %c0_0] : memref<128x128xf32, #tpu.memory_space<vmem>>, vector<128x128xf32>
    tpu.vector_store %arg6[%c0, %c0_0], %0 {strides = array<i32>} : memref<128x128xf32, #tpu.memory_space<vmem>>, vector<128x128xf32>,
    %c0_1 = arith.constant 0 : index
    %c0_2 = arith.constant 0 : index
    %2 = vector.load %arg2[%c0_1, %c0_2] : memref<704x8xbf16, #tpu.memory_space<vmem>>, vector<128x8xbf16>
    %c0_3 = arith.constant 0 : index
    %c0_4 = arith.constant 0 : index
    %3 = vector.load %arg3[%c0_3, %c0_4] : memref<200x128xbf16, #tpu.memory_space<vmem>>, vector<8x128xbf16>
    %c0_5 = arith.constant 0 : index
    %c0_6 = arith.constant 0 : index
    %4 = vector.load %arg6[%c0_5, %c0_6] : memref<128x128xf32, #tpu.memory_space<vmem>>, vector<128x128xf32>
    %cst_7 = arith.constant dense<0.000000e+00> : vector<128x128xf32>
    %5 = tpu.matmul %2, %3, %cst_7 {dimension_numbers = #tpu.dot_dimension_numbers<[1], [0], [0], [1], [0, 0, 1, 1], [], []>} : vector<128x8xbf16>, vector<8x128xbf16>, vector<128x128xf32> -> vector<128x128xf32>
    %6 = arith.addf %4, %5 : vector<128x128xf32>
    %c0_8 = arith.constant 0 : index
    %c0_9 = arith.constant 0 : index
    %7 = vector.load %arg6[%c0_8, %c0_9] : memref<128x128xf32, #tpu.memory_space<vmem>>, vector<128x128xf32>
    tpu.vector_store %arg6[%c0_8, %c0_9], %6 {strides = array<i32>} : memref<128x128xf32, #tpu.memory_space<vmem>>, vector<128x128xf32>,
    %c176 = arith.constant 176 : index
    %c0_10 = arith.constant 0 : index
    %8 = vector.load %arg2[%c176, %c0_10] : memref<704x8xbf16, #tpu.memory_space<vmem>>, vector<128x8xbf16>
    %c8 = arith.constant 8 : index
    %c0_11 = arith.constant 0 : index
    %9 = vector.load %arg3[%c8, %c0_11] : memref<200x128xbf16, #tpu.memory_space<vmem>>, vector<8x128xbf16>
    %c0_12 = arith.constant 0 : index
    %c0_13 = arith.constant 0 : index
    %10 = vector.load %arg6[%c0_12, %c0_13] : memref<128x128xf32, #tpu.memory_space<vmem>>, vector<128x128xf32>
    %cst_14 = arith.constant dense<0.000000e+00> : vector<128x128xf32>
    %11 = tpu.matmul %8, %9, %cst_14 {dimension_numbers = #tpu.dot_dimension_numbers<[1], [0], [0], [1], [0, 0, 1, 1], [], []>} : vector<128x8xbf16>, vector<8x128xbf16>, vector<128x128xf32> -> vector<128x128xf32>
    %12 = arith.addf %10, %11 : vector<128x128xf32>
    %c0_15 = arith.constant 0 : index
    %c0_16 = arith.constant 0 : index
    %13 = vector.load %arg6[%c0_15, %c0_16] : memref<128x128xf32, #tpu.memory_space<vmem>>, vector<128x128xf32>
    tpu.vector_store %arg6[%c0_15, %c0_16], %12 {strides = array<i32>} : memref<128x128xf32, #tpu.memory_space<vmem>>, vector<128x128xf32>,
    %c1 = arith.constant 1 : index
    %c0_17 = arith.constant 0 : index
    %14 = vector.load %arg2[%c1, %c0_17] : memref<704x8xbf16, #tpu.memory_space<vmem>>, vector<128x8xbf16>
    %c16 = arith.constant 16 : index
    %c0_18 = arith.constant 0 : index
    %15 = vector.load %arg3[%c16, %c0_18] : memref<200x128xbf16, #tpu.memory_space<vmem>>, vector<8x128xbf16>
    %c0_19 = arith.constant 0 : index
    %c0_20 = arith.constant 0 : index
    %16 = vector.load %arg6[%c0_19, %c0_20] : memref<128x128xf32, #tpu.memory_space<vmem>>, vector<128x128xf32>
    %cst_21 = arith.constant dense<0.000000e+00> : vector<128x128xf32>
    %17 = tpu.matmul %14, %15, %cst_21 {dimension_numbers = #tpu.dot_dimension_numbers<[1], [0], [0], [1], [0, 0, 1, 1], [], []>} : vector<128x8xbf16>, vector<8x128xbf16>, vector<128x128xf32> -> vector<128x128xf32>
    %18 = arith.addf %16, %17 : vector<128x128xf32>
    %c0_22 = arith.constant 0 : index
    %c0_23 = arith.constant 0 : index
    %19 = vector.load %arg6[%c0_22, %c0_23] : memref<128x128xf32, #tpu.memory_space<vmem>>, vector<128x128xf32>
    tpu.vector_store %arg6[%c0_22, %c0_23], %18 {strides = array<i32>} : memref<128x128xf32, #tpu.memory_space<vmem>>, vector<128x128xf32>,
    %c177 = arith.constant 177 : index
    %c0_24 = arith.constant 0 : index
    %20 = vector.load %arg2[%c177, %c0_24] : memref<704x8xbf16, #tpu.memory_space<vmem>>, vector<128x8xbf16>
    %c24 = arith.constant 24 : index
    %c0_25 = arith.constant 0 : index
    %21 = vector.load %arg3[%c24, %c0_25] : memref<200x128xbf16, #tpu.memory_space<vmem>>, vector<8x128xbf16>
    %c0_26 = arith.constant 0 : index
    %c0_27 = arith.constant 0 : index
    %22 = vector.load %arg6[%c0_26, %c0_27] : memref<128x128xf32, #tpu.memory_space<vmem>>, vector<128x128xf32>
    %cst_28 = arith.constant dense<0.000000e+00> : vector<128x128xf32>
    %23 = tpu.matmul %20, %21, %cst_28 {dimension_numbers = #tpu.dot_dimension_numbers<[1], [0], [0], [1], [0, 0, 1, 1], [], []>} : vector<128x8xbf16>, vector<8x128xbf16>, vector<128x128xf32> -> vector<128x128xf32>
    %24 = arith.addf %22, %23 : vector<128x128xf32>
    %c0_29 = arith.constant 0 : index
    %c0_30 = arith.constant 0 : index
    %25 = vector.load %arg6[%c0_29, %c0_30] : memref<128x128xf32, #tpu.memory_space<vmem>>, vector<128x128xf32>
    tpu.vector_store %arg6[%c0_29, %c0_30], %24 {strides = array<i32>} : memref<128x128xf32, #tpu.memory_space<vmem>>, vector<128x128xf32>,
    %c2 = arith.constant 2 : index
    %c0_31 = arith.constant 0 : index
    %26 = vector.load %arg2[%c2, %c0_31] : memref<704x8xbf16, #tpu.memory_space<vmem>>, vector<128x8xbf16>
    %c32 = arith.constant 32 : index
    %c0_32 = arith.constant 0 : index
    %27 = vector.load %arg3[%c32, %c0_32] : memref<200x128xbf16, #tpu.memory_space<vmem>>, vector<8x128xbf16>
    %c0_33 = arith.constant 0 : index
    %c0_34 = arith.constant 0 : index
    %28 = vector.load %arg6[%c0_33, %c0_34] : memref<128x128xf32, #tpu.memory_space<vmem>>, vector<128x128xf32>
    %cst_35 = arith.constant dense<0.000000e+00> : vector<128x128xf32>
    %29 = tpu.matmul %26, %27, %cst_35 {dimension_numbers = #tpu.dot_dimension_numbers<[1], [0], [0], [1], [0, 0, 1, 1], [], []>} : vector<128x8xbf16>, vector<8x128xbf16>, vector<128x128xf32> -> vector<128x128xf32>
    %30 = arith.addf %28, %29 : vector<128x128xf32>
    %c0_36 = arith.constant 0 : index
    %c0_37 = arith.constant 0 : index
    %31 = vector.load %arg6[%c0_36, %c0_37] : memref<128x128xf32, #tpu.memory_space<vmem>>, vector<128x128xf32>
    tpu.vector_store %arg6[%c0_36, %c0_37], %30 {strides = array<i32>} : memref<128x128xf32, #tpu.memory_space<vmem>>, vector<128x128xf32>,
    %c352 = arith.constant 352 : index
    %c0_38 = arith.constant 0 : index
    %32 = vector.load %arg2[%c352, %c0_38] : memref<704x8xbf16, #tpu.memory_space<vmem>>, vector<128x8xbf16>
    %c40 = arith.constant 40 : index
    %c0_39 = arith.constant 0 : index
    %33 = vector.load %arg3[%c40, %c0_39] : memref<200x128xbf16, #tpu.memory_space<vmem>>, vector<8x128xbf16>
    %c0_40 = arith.constant 0 : index
    %c0_41 = arith.constant 0 : index
    %34 = vector.load %arg6[%c0_40, %c0_41] : memref<128x128xf32, #tpu.memory_space<vmem>>, vector<128x128xf32>
    %cst_42 = arith.constant dense<0.000000e+00> : vector<128x128xf32>
    %35 = tpu.matmul %32, %33, %cst_42 {dimension_numbers = #tpu.dot_dimension_numbers<[1], [0], [0], [1], [0, 0, 1, 1], [], []>} : vector<128x8xbf16>, vector<8x128xbf16>, vector<128x128xf32> -> vector<128x128xf32>
    %36 = arith.addf %34, %35 : vector<128x128xf32>
    %c0_43 = arith.constant 0 : index
    %c0_44 = arith.constant 0 : index
    %37 = vector.load %arg6[%c0_43, %c0_44] : memref<128x128xf32, #tpu.memory_space<vmem>>, vector<128x128xf32>
    tpu.vector_store %arg6[%c0_43, %c0_44], %36 {strides = array<i32>} : memref<128x128xf32, #tpu.memory_space<vmem>>, vector<128x128xf32>,
    %c528 = arith.constant 528 : index
    %c0_45 = arith.constant 0 : index
    %38 = vector.load %arg2[%c528, %c0_45] : memref<704x8xbf16, #tpu.memory_space<vmem>>, vector<128x8xbf16>
    %c48 = arith.constant 48 : index
    %c0_46 = arith.constant 0 : index
    %39 = vector.load %arg3[%c48, %c0_46] : memref<200x128xbf16, #tpu.memory_space<vmem>>, vector<8x128xbf16>
    %c0_47 = arith.constant 0 : index
    %c0_48 = arith.constant 0 : index
    %40 = vector.load %arg6[%c0_47, %c0_48] : memref<128x128xf32, #tpu.memory_space<vmem>>, vector<128x128xf32>
    %cst_49 = arith.constant dense<0.000000e+00> : vector<128x128xf32>
    %41 = tpu.matmul %38, %39, %cst_49 {dimension_numbers = #tpu.dot_dimension_numbers<[1], [0], [0], [1], [0, 0, 1, 1], [], []>} : vector<128x8xbf16>, vector<8x128xbf16>, vector<128x128xf32> -> vector<128x128xf32>
    %42 = arith.addf %40, %41 : vector<128x128xf32>
    %c0_50 = arith.constant 0 : index
    %c0_51 = arith.constant 0 : index
    %43 = vector.load %arg6[%c0_50, %c0_51] : memref<128x128xf32, #tpu.memory_space<vmem>>, vector<128x128xf32>
    tpu.vector_store %arg6[%c0_50, %c0_51], %42 {strides = array<i32>} : memref<128x128xf32, #tpu.memory_space<vmem>>, vector<128x128xf32>,
    %c353 = arith.constant 353 : index
    %c0_52 = arith.constant 0 : index
    %44 = vector.load %arg2[%c353, %c0_52] : memref<704x8xbf16, #tpu.memory_space<vmem>>, vector<128x8xbf16>
    %c56 = arith.constant 56 : index
    %c0_53 = arith.constant 0 : index
    %45 = vector.load %arg3[%c56, %c0_53] : memref<200x128xbf16, #tpu.memory_space<vmem>>, vector<8x128xbf16>
    %c0_54 = arith.constant 0 : index
    %c0_55 = arith.constant 0 : index
    %46 = vector.load %arg6[%c0_54, %c0_55] : memref<128x128xf32, #tpu.memory_space<vmem>>, vector<128x128xf32>
    %cst_56 = arith.constant dense<0.000000e+00> : vector<128x128xf32>
    %47 = tpu.matmul %44, %45, %cst_56 {dimension_numbers = #tpu.dot_dimension_numbers<[1], [0], [0], [1], [0, 0, 1, 1], [], []>} : vector<128x8xbf16>, vector<8x128xbf16>, vector<128x128xf32> -> vector<128x128xf32>
    %48 = arith.addf %46, %47 : vector<128x128xf32>
    %c0_57 = arith.constant 0 : index
    %c0_58 = arith.constant 0 : index
    %49 = vector.load %arg6[%c0_57, %c0_58] : memref<128x128xf32, #tpu.memory_space<vmem>>, vector<128x128xf32>
    tpu.vector_store %arg6[%c0_57, %c0_58], %48 {strides = array<i32>} : memref<128x128xf32, #tpu.memory_space<vmem>>, vector<128x128xf32>,
    %c529 = arith.constant 529 : index
    %c0_59 = arith.constant 0 : index
    %50 = vector.load %arg2[%c529, %c0_59] : memref<704x8xbf16, #tpu.memory_space<vmem>>, vector<128x8xbf16>
    %c64 = arith.constant 64 : index
    %c0_60 = arith.constant 0 : index
    %51 = vector.load %arg3[%c64, %c0_60] : memref<200x128xbf16, #tpu.memory_space<vmem>>, vector<8x128xbf16>
    %c0_61 = arith.constant 0 : index
    %c0_62 = arith.constant 0 : index
    %52 = vector.load %arg6[%c0_61, %c0_62] : memref<128x128xf32, #tpu.memory_space<vmem>>, vector<128x128xf32>
    %cst_63 = arith.constant dense<0.000000e+00> : vector<128x128xf32>
    %53 = tpu.matmul %50, %51, %cst_63 {dimension_numbers = #tpu.dot_dimension_numbers<[1], [0], [0], [1], [0, 0, 1, 1], [], []>} : vector<128x8xbf16>, vector<8x128xbf16>, vector<128x128xf32> -> vector<128x128xf32>
    %54 = arith.addf %52, %53 : vector<128x128xf32>
    %c0_64 = arith.constant 0 : index
    %c0_65 = arith.constant 0 : index
    %55 = vector.load %arg6[%c0_64, %c0_65] : memref<128x128xf32, #tpu.memory_space<vmem>>, vector<128x128xf32>
    tpu.vector_store %arg6[%c0_64, %c0_65], %54 {strides = array<i32>} : memref<128x128xf32, #tpu.memory_space<vmem>>, vector<128x128xf32>,
    %c354 = arith.constant 354 : index
    %c0_66 = arith.constant 0 : index
    %56 = vector.load %arg2[%c354, %c0_66] : memref<704x8xbf16, #tpu.memory_space<vmem>>, vector<128x8xbf16>
    %c72 = arith.constant 72 : index
    %c0_67 = arith.constant 0 : index
    %57 = vector.load %arg3[%c72, %c0_67] : memref<200x128xbf16, #tpu.memory_space<vmem>>, vector<8x128xbf16>
    %c0_68 = arith.constant 0 : index
    %c0_69 = arith.constant 0 : index
    %58 = vector.load %arg6[%c0_68, %c0_69] : memref<128x128xf32, #tpu.memory_space<vmem>>, vector<128x128xf32>
    %cst_70 = arith.constant dense<0.000000e+00> : vector<128x128xf32>
    %59 = tpu.matmul %56, %57, %cst_70 {dimension_numbers = #tpu.dot_dimension_numbers<[1], [0], [0], [1], [0, 0, 1, 1], [], []>} : vector<128x8xbf16>, vector<8x128xbf16>, vector<128x128xf32> -> vector<128x128xf32>
    %60 = arith.addf %58, %59 : vector<128x128xf32>
    %c0_71 = arith.constant 0 : index
    %c0_72 = arith.constant 0 : index
    %61 = vector.load %arg6[%c0_71, %c0_72] : memref<128x128xf32, #tpu.memory_space<vmem>>, vector<128x128xf32>
    tpu.vector_store %arg6[%c0_71, %c0_72], %60 {strides = array<i32>} : memref<128x128xf32, #tpu.memory_space<vmem>>, vector<128x128xf32>,
    %c16_73 = arith.constant 16 : index
    %c0_74 = arith.constant 0 : index
    %62 = vector.load %arg2[%c16_73, %c0_74] : memref<704x8xbf16, #tpu.memory_space<vmem>>, vector<128x8xbf16>
    %c80 = arith.constant 80 : index
    %c0_75 = arith.constant 0 : index
    %63 = vector.load %arg3[%c80, %c0_75] : memref<200x128xbf16, #tpu.memory_space<vmem>>, vector<8x128xbf16>
    %c0_76 = arith.constant 0 : index
    %c0_77 = arith.constant 0 : index
    %64 = vector.load %arg6[%c0_76, %c0_77] : memref<128x128xf32, #tpu.memory_space<vmem>>, vector<128x128xf32>
    %cst_78 = arith.constant dense<0.000000e+00> : vector<128x128xf32>
    %65 = tpu.matmul %62, %63, %cst_78 {dimension_numbers = #tpu.dot_dimension_numbers<[1], [0], [0], [1], [0, 0, 1, 1], [], []>} : vector<128x8xbf16>, vector<8x128xbf16>, vector<128x128xf32> -> vector<128x128xf32>
    %66 = arith.addf %64, %65 : vector<128x128xf32>
    %c0_79 = arith.constant 0 : index
    %c0_80 = arith.constant 0 : index
    %67 = vector.load %arg6[%c0_79, %c0_80] : memref<128x128xf32, #tpu.memory_space<vmem>>, vector<128x128xf32>
    tpu.vector_store %arg6[%c0_79, %c0_80], %66 {strides = array<i32>} : memref<128x128xf32, #tpu.memory_space<vmem>>, vector<128x128xf32>,
    %c192 = arith.constant 192 : index
    %c0_81 = arith.constant 0 : index
    %68 = vector.load %arg2[%c192, %c0_81] : memref<704x8xbf16, #tpu.memory_space<vmem>>, vector<128x8xbf16>
    %c88 = arith.constant 88 : index
    %c0_82 = arith.constant 0 : index
    %69 = vector.load %arg3[%c88, %c0_82] : memref<200x128xbf16, #tpu.memory_space<vmem>>, vector<8x128xbf16>
    %c0_83 = arith.constant 0 : index
    %c0_84 = arith.constant 0 : index
    %70 = vector.load %arg6[%c0_83, %c0_84] : memref<128x128xf32, #tpu.memory_space<vmem>>, vector<128x128xf32>
    %cst_85 = arith.constant dense<0.000000e+00> : vector<128x128xf32>
    %71 = tpu.matmul %68, %69, %cst_85 {dimension_numbers = #tpu.dot_dimension_numbers<[1], [0], [0], [1], [0, 0, 1, 1], [], []>} : vector<128x8xbf16>, vector<8x128xbf16>, vector<128x128xf32> -> vector<128x128xf32>
    %72 = arith.addf %70, %71 : vector<128x128xf32>
    %c0_86 = arith.constant 0 : index
    %c0_87 = arith.constant 0 : index
    %73 = vector.load %arg6[%c0_86, %c0_87] : memref<128x128xf32, #tpu.memory_space<vmem>>, vector<128x128xf32>
    tpu.vector_store %arg6[%c0_86, %c0_87], %72 {strides = array<i32>} : memref<128x128xf32, #tpu.memory_space<vmem>>, vector<128x128xf32>,
    %c17 = arith.constant 17 : index
    %c0_88 = arith.constant 0 : index
    %74 = vector.load %arg2[%c17, %c0_88] : memref<704x8xbf16, #tpu.memory_space<vmem>>, vector<128x8xbf16>
    %c96 = arith.constant 96 : index
    %c0_89 = arith.constant 0 : index
    %75 = vector.load %arg3[%c96, %c0_89] : memref<200x128xbf16, #tpu.memory_space<vmem>>, vector<8x128xbf16>
    %c0_90 = arith.constant 0 : index
    %c0_91 = arith.constant 0 : index
    %76 = vector.load %arg6[%c0_90, %c0_91] : memref<128x128xf32, #tpu.memory_space<vmem>>, vector<128x128xf32>
    %cst_92 = arith.constant dense<0.000000e+00> : vector<128x128xf32>
    %77 = tpu.matmul %74, %75, %cst_92 {dimension_numbers = #tpu.dot_dimension_numbers<[1], [0], [0], [1], [0, 0, 1, 1], [], []>} : vector<128x8xbf16>, vector<8x128xbf16>, vector<128x128xf32> -> vector<128x128xf32>
    %78 = arith.addf %76, %77 : vector<128x128xf32>
    %c0_93 = arith.constant 0 : index
    %c0_94 = arith.constant 0 : index
    %79 = vector.load %arg6[%c0_93, %c0_94] : memref<128x128xf32, #tpu.memory_space<vmem>>, vector<128x128xf32>
    tpu.vector_store %arg6[%c0_93, %c0_94], %78 {strides = array<i32>} : memref<128x128xf32, #tpu.memory_space<vmem>>, vector<128x128xf32>,
    %c193 = arith.constant 193 : index
    %c0_95 = arith.constant 0 : index
    %80 = vector.load %arg2[%c193, %c0_95] : memref<704x8xbf16, #tpu.memory_space<vmem>>, vector<128x8xbf16>
    %c104 = arith.constant 104 : index
    %c0_96 = arith.constant 0 : index
    %81 = vector.load %arg3[%c104, %c0_96] : memref<200x128xbf16, #tpu.memory_space<vmem>>, vector<8x128xbf16>
    %c0_97 = arith.constant 0 : index
    %c0_98 = arith.constant 0 : index
    %82 = vector.load %arg6[%c0_97, %c0_98] : memref<128x128xf32, #tpu.memory_space<vmem>>, vector<128x128xf32>
    %cst_99 = arith.constant dense<0.000000e+00> : vector<128x128xf32>
    %83 = tpu.matmul %80, %81, %cst_99 {dimension_numbers = #tpu.dot_dimension_numbers<[1], [0], [0], [1], [0, 0, 1, 1], [], []>} : vector<128x8xbf16>, vector<8x128xbf16>, vector<128x128xf32> -> vector<128x128xf32>
    %84 = arith.addf %82, %83 : vector<128x128xf32>
    %c0_100 = arith.constant 0 : index
    %c0_101 = arith.constant 0 : index
    %85 = vector.load %arg6[%c0_100, %c0_101] : memref<128x128xf32, #tpu.memory_space<vmem>>, vector<128x128xf32>
    tpu.vector_store %arg6[%c0_100, %c0_101], %84 {strides = array<i32>} : memref<128x128xf32, #tpu.memory_space<vmem>>, vector<128x128xf32>,
    %c18 = arith.constant 18 : index
    %c0_102 = arith.constant 0 : index
    %86 = vector.load %arg2[%c18, %c0_102] : memref<704x8xbf16, #tpu.memory_space<vmem>>, vector<128x8xbf16>
    %c112 = arith.constant 112 : index
    %c0_103 = arith.constant 0 : index
    %87 = vector.load %arg3[%c112, %c0_103] : memref<200x128xbf16, #tpu.memory_space<vmem>>, vector<8x128xbf16>
    %c0_104 = arith.constant 0 : index
    %c0_105 = arith.constant 0 : index
    %88 = vector.load %arg6[%c0_104, %c0_105] : memref<128x128xf32, #tpu.memory_space<vmem>>, vector<128x128xf32>
    %cst_106 = arith.constant dense<0.000000e+00> : vector<128x128xf32>
    %89 = tpu.matmul %86, %87, %cst_106 {dimension_numbers = #tpu.dot_dimension_numbers<[1], [0], [0], [1], [0, 0, 1, 1], [], []>} : vector<128x8xbf16>, vector<8x128xbf16>, vector<128x128xf32> -> vector<128x128xf32>
    %90 = arith.addf %88, %89 : vector<128x128xf32>
    %c0_107 = arith.constant 0 : index
    %c0_108 = arith.constant 0 : index
    %91 = vector.load %arg6[%c0_107, %c0_108] : memref<128x128xf32, #tpu.memory_space<vmem>>, vector<128x128xf32>
    tpu.vector_store %arg6[%c0_107, %c0_108], %90 {strides = array<i32>} : memref<128x128xf32, #tpu.memory_space<vmem>>, vector<128x128xf32>,
    %c368 = arith.constant 368 : index
    %c0_109 = arith.constant 0 : index
    %92 = vector.load %arg2[%c368, %c0_109] : memref<704x8xbf16, #tpu.memory_space<vmem>>, vector<128x8xbf16>
    %c120 = arith.constant 120 : index
    %c0_110 = arith.constant 0 : index
    %93 = vector.load %arg3[%c120, %c0_110] : memref<200x128xbf16, #tpu.memory_space<vmem>>, vector<8x128xbf16>
    %c0_111 = arith.constant 0 : index
    %c0_112 = arith.constant 0 : index
    %94 = vector.load %arg6[%c0_111, %c0_112] : memref<128x128xf32, #tpu.memory_space<vmem>>, vector<128x128xf32>
    %cst_113 = arith.constant dense<0.000000e+00> : vector<128x128xf32>
    %95 = tpu.matmul %92, %93, %cst_113 {dimension_numbers = #tpu.dot_dimension_numbers<[1], [0], [0], [1], [0, 0, 1, 1], [], []>} : vector<128x8xbf16>, vector<8x128xbf16>, vector<128x128xf32> -> vector<128x128xf32>
    %96 = arith.addf %94, %95 : vector<128x128xf32>
    %c0_114 = arith.constant 0 : index
    %c0_115 = arith.constant 0 : index
    %97 = vector.load %arg6[%c0_114, %c0_115] : memref<128x128xf32, #tpu.memory_space<vmem>>, vector<128x128xf32>
    tpu.vector_store %arg6[%c0_114, %c0_115], %96 {strides = array<i32>} : memref<128x128xf32, #tpu.memory_space<vmem>>, vector<128x128xf32>,
    %c544 = arith.constant 544 : index
    %c0_116 = arith.constant 0 : index
    %98 = vector.load %arg2[%c544, %c0_116] : memref<704x8xbf16, #tpu.memory_space<vmem>>, vector<128x8xbf16>
    %c128 = arith.constant 128 : index
    %c0_117 = arith.constant 0 : index
    %99 = vector.load %arg3[%c128, %c0_117] : memref<200x128xbf16, #tpu.memory_space<vmem>>, vector<8x128xbf16>
    %c0_118 = arith.constant 0 : index
    %c0_119 = arith.constant 0 : index
    %100 = vector.load %arg6[%c0_118, %c0_119] : memref<128x128xf32, #tpu.memory_space<vmem>>, vector<128x128xf32>
    %cst_120 = arith.constant dense<0.000000e+00> : vector<128x128xf32>
    %101 = tpu.matmul %98, %99, %cst_120 {dimension_numbers = #tpu.dot_dimension_numbers<[1], [0], [0], [1], [0, 0, 1, 1], [], []>} : vector<128x8xbf16>, vector<8x128xbf16>, vector<128x128xf32> -> vector<128x128xf32>
    %102 = arith.addf %100, %101 : vector<128x128xf32>
    %c0_121 = arith.constant 0 : index
    %c0_122 = arith.constant 0 : index
    %103 = vector.load %arg6[%c0_121, %c0_122] : memref<128x128xf32, #tpu.memory_space<vmem>>, vector<128x128xf32>
    tpu.vector_store %arg6[%c0_121, %c0_122], %102 {strides = array<i32>} : memref<128x128xf32, #tpu.memory_space<vmem>>, vector<128x128xf32>,
    %c369 = arith.constant 369 : index
    %c0_123 = arith.constant 0 : index
    %104 = vector.load %arg2[%c369, %c0_123] : memref<704x8xbf16, #tpu.memory_space<vmem>>, vector<128x8xbf16>
    %c136 = arith.constant 136 : index
    %c0_124 = arith.constant 0 : index
    %105 = vector.load %arg3[%c136, %c0_124] : memref<200x128xbf16, #tpu.memory_space<vmem>>, vector<8x128xbf16>
    %c0_125 = arith.constant 0 : index
    %c0_126 = arith.constant 0 : index
    %106 = vector.load %arg6[%c0_125, %c0_126] : memref<128x128xf32, #tpu.memory_space<vmem>>, vector<128x128xf32>
    %cst_127 = arith.constant dense<0.000000e+00> : vector<128x128xf32>
    %107 = tpu.matmul %104, %105, %cst_127 {dimension_numbers = #tpu.dot_dimension_numbers<[1], [0], [0], [1], [0, 0, 1, 1], [], []>} : vector<128x8xbf16>, vector<8x128xbf16>, vector<128x128xf32> -> vector<128x128xf32>
    %108 = arith.addf %106, %107 : vector<128x128xf32>
    %c0_128 = arith.constant 0 : index
    %c0_129 = arith.constant 0 : index
    %109 = vector.load %arg6[%c0_128, %c0_129] : memref<128x128xf32, #tpu.memory_space<vmem>>, vector<128x128xf32>
    tpu.vector_store %arg6[%c0_128, %c0_129], %108 {strides = array<i32>} : memref<128x128xf32, #tpu.memory_space<vmem>>, vector<128x128xf32>,
    %c545 = arith.constant 545 : index
    %c0_130 = arith.constant 0 : index
    %110 = vector.load %arg2[%c545, %c0_130] : memref<704x8xbf16, #tpu.memory_space<vmem>>, vector<128x8xbf16>
    %c144 = arith.constant 144 : index
    %c0_131 = arith.constant 0 : index
    %111 = vector.load %arg3[%c144, %c0_131] : memref<200x128xbf16, #tpu.memory_space<vmem>>, vector<8x128xbf16>
    %c0_132 = arith.constant 0 : index
    %c0_133 = arith.constant 0 : index
    %112 = vector.load %arg6[%c0_132, %c0_133] : memref<128x128xf32, #tpu.memory_space<vmem>>, vector<128x128xf32>
    %cst_134 = arith.constant dense<0.000000e+00> : vector<128x128xf32>
    %113 = tpu.matmul %110, %111, %cst_134 {dimension_numbers = #tpu.dot_dimension_numbers<[1], [0], [0], [1], [0, 0, 1, 1], [], []>} : vector<128x8xbf16>, vector<8x128xbf16>, vector<128x128xf32> -> vector<128x128xf32>
    %114 = arith.addf %112, %113 : vector<128x128xf32>
    %c0_135 = arith.constant 0 : index
    %c0_136 = arith.constant 0 : index
    %115 = vector.load %arg6[%c0_135, %c0_136] : memref<128x128xf32, #tpu.memory_space<vmem>>, vector<128x128xf32>
    tpu.vector_store %arg6[%c0_135, %c0_136], %114 {strides = array<i32>} : memref<128x128xf32, #tpu.memory_space<vmem>>, vector<128x128xf32>,
    %c370 = arith.constant 370 : index
    %c0_137 = arith.constant 0 : index
    %116 = vector.load %arg2[%c370, %c0_137] : memref<704x8xbf16, #tpu.memory_space<vmem>>, vector<128x8xbf16>
    %c152 = arith.constant 152 : index
    %c0_138 = arith.constant 0 : index
    %117 = vector.load %arg3[%c152, %c0_138] : memref<200x128xbf16, #tpu.memory_space<vmem>>, vector<8x128xbf16>
    %c0_139 = arith.constant 0 : index
    %c0_140 = arith.constant 0 : index
    %118 = vector.load %arg6[%c0_139, %c0_140] : memref<128x128xf32, #tpu.memory_space<vmem>>, vector<128x128xf32>
    %cst_141 = arith.constant dense<0.000000e+00> : vector<128x128xf32>
    %119 = tpu.matmul %116, %117, %cst_141 {dimension_numbers = #tpu.dot_dimension_numbers<[1], [0], [0], [1], [0, 0, 1, 1], [], []>} : vector<128x8xbf16>, vector<8x128xbf16>, vector<128x128xf32> -> vector<128x128xf32>
    %120 = arith.addf %118, %119 : vector<128x128xf32>
    %c0_142 = arith.constant 0 : index
    %c0_143 = arith.constant 0 : index
    %121 = vector.load %arg6[%c0_142, %c0_143] : memref<128x128xf32, #tpu.memory_space<vmem>>, vector<128x128xf32>
    tpu.vector_store %arg6[%c0_142, %c0_143], %120 {strides = array<i32>} : memref<128x128xf32, #tpu.memory_space<vmem>>, vector<128x128xf32>,
    %c32_144 = arith.constant 32 : index
    %c0_145 = arith.constant 0 : index
    %122 = vector.load %arg2[%c32_144, %c0_145] : memref<704x8xbf16, #tpu.memory_space<vmem>>, vector<128x8xbf16>
    %c160 = arith.constant 160 : index
    %c0_146 = arith.constant 0 : index
    %123 = vector.load %arg3[%c160, %c0_146] : memref<200x128xbf16, #tpu.memory_space<vmem>>, vector<8x128xbf16>
    %c0_147 = arith.constant 0 : index
    %c0_148 = arith.constant 0 : index
    %124 = vector.load %arg6[%c0_147, %c0_148] : memref<128x128xf32, #tpu.memory_space<vmem>>, vector<128x128xf32>
    %cst_149 = arith.constant dense<0.000000e+00> : vector<128x128xf32>
    %125 = tpu.matmul %122, %123, %cst_149 {dimension_numbers = #tpu.dot_dimension_numbers<[1], [0], [0], [1], [0, 0, 1, 1], [], []>} : vector<128x8xbf16>, vector<8x128xbf16>, vector<128x128xf32> -> vector<128x128xf32>
    %126 = arith.addf %124, %125 : vector<128x128xf32>
    %c0_150 = arith.constant 0 : index
    %c0_151 = arith.constant 0 : index
    %127 = vector.load %arg6[%c0_150, %c0_151] : memref<128x128xf32, #tpu.memory_space<vmem>>, vector<128x128xf32>
    tpu.vector_store %arg6[%c0_150, %c0_151], %126 {strides = array<i32>} : memref<128x128xf32, #tpu.memory_space<vmem>>, vector<128x128xf32>,
    %c208 = arith.constant 208 : index
    %c0_152 = arith.constant 0 : index
    %128 = vector.load %arg2[%c208, %c0_152] : memref<704x8xbf16, #tpu.memory_space<vmem>>, vector<128x8xbf16>
    %c168 = arith.constant 168 : index
    %c0_153 = arith.constant 0 : index
    %129 = vector.load %arg3[%c168, %c0_153] : memref<200x128xbf16, #tpu.memory_space<vmem>>, vector<8x128xbf16>
    %c0_154 = arith.constant 0 : index
    %c0_155 = arith.constant 0 : index
    %130 = vector.load %arg6[%c0_154, %c0_155] : memref<128x128xf32, #tpu.memory_space<vmem>>, vector<128x128xf32>
    %cst_156 = arith.constant dense<0.000000e+00> : vector<128x128xf32>
    %131 = tpu.matmul %128, %129, %cst_156 {dimension_numbers = #tpu.dot_dimension_numbers<[1], [0], [0], [1], [0, 0, 1, 1], [], []>} : vector<128x8xbf16>, vector<8x128xbf16>, vector<128x128xf32> -> vector<128x128xf32>
    %132 = arith.addf %130, %131 : vector<128x128xf32>
    %c0_157 = arith.constant 0 : index
    %c0_158 = arith.constant 0 : index
    %133 = vector.load %arg6[%c0_157, %c0_158] : memref<128x128xf32, #tpu.memory_space<vmem>>, vector<128x128xf32>
    tpu.vector_store %arg6[%c0_157, %c0_158], %132 {strides = array<i32>} : memref<128x128xf32, #tpu.memory_space<vmem>>, vector<128x128xf32>,
    %c33 = arith.constant 33 : index
    %c0_159 = arith.constant 0 : index
    %134 = vector.load %arg2[%c33, %c0_159] : memref<704x8xbf16, #tpu.memory_space<vmem>>, vector<128x8xbf16>
    %c176_160 = arith.constant 176 : index
    %c0_161 = arith.constant 0 : index
    %135 = vector.load %arg3[%c176_160, %c0_161] : memref<200x128xbf16, #tpu.memory_space<vmem>>, vector<8x128xbf16>
    %c0_162 = arith.constant 0 : index
    %c0_163 = arith.constant 0 : index
    %136 = vector.load %arg6[%c0_162, %c0_163] : memref<128x128xf32, #tpu.memory_space<vmem>>, vector<128x128xf32>
    %cst_164 = arith.constant dense<0.000000e+00> : vector<128x128xf32>
    %137 = tpu.matmul %134, %135, %cst_164 {dimension_numbers = #tpu.dot_dimension_numbers<[1], [0], [0], [1], [0, 0, 1, 1], [], []>} : vector<128x8xbf16>, vector<8x128xbf16>, vector<128x128xf32> -> vector<128x128xf32>
    %138 = arith.addf %136, %137 : vector<128x128xf32>
    %c0_165 = arith.constant 0 : index
    %c0_166 = arith.constant 0 : index
    %139 = vector.load %arg6[%c0_165, %c0_166] : memref<128x128xf32, #tpu.memory_space<vmem>>, vector<128x128xf32>
    tpu.vector_store %arg6[%c0_165, %c0_166], %138 {strides = array<i32>} : memref<128x128xf32, #tpu.memory_space<vmem>>, vector<128x128xf32>,
    %c209 = arith.constant 209 : index
    %c0_167 = arith.constant 0 : index
    %140 = vector.load %arg2[%c209, %c0_167] : memref<704x8xbf16, #tpu.memory_space<vmem>>, vector<128x8xbf16>
    %c184 = arith.constant 184 : index
    %c0_168 = arith.constant 0 : index
    %141 = vector.load %arg3[%c184, %c0_168] : memref<200x128xbf16, #tpu.memory_space<vmem>>, vector<8x128xbf16>
    %c0_169 = arith.constant 0 : index
    %c0_170 = arith.constant 0 : index
    %142 = vector.load %arg6[%c0_169, %c0_170] : memref<128x128xf32, #tpu.memory_space<vmem>>, vector<128x128xf32>
    %cst_171 = arith.constant dense<0.000000e+00> : vector<128x128xf32>
    %143 = tpu.matmul %140, %141, %cst_171 {dimension_numbers = #tpu.dot_dimension_numbers<[1], [0], [0], [1], [0, 0, 1, 1], [], []>} : vector<128x8xbf16>, vector<8x128xbf16>, vector<128x128xf32> -> vector<128x128xf32>
    %144 = arith.addf %142, %143 : vector<128x128xf32>
    %c0_172 = arith.constant 0 : index
    %c0_173 = arith.constant 0 : index
    %145 = vector.load %arg6[%c0_172, %c0_173] : memref<128x128xf32, #tpu.memory_space<vmem>>, vector<128x128xf32>
    tpu.vector_store %arg6[%c0_172, %c0_173], %144 {strides = array<i32>} : memref<128x128xf32, #tpu.memory_space<vmem>>, vector<128x128xf32>,
    %c34 = arith.constant 34 : index
    %c0_174 = arith.constant 0 : index
    %146 = vector.load %arg2[%c34, %c0_174] : memref<704x8xbf16, #tpu.memory_space<vmem>>, vector<128x8xbf16>
    %c192_175 = arith.constant 192 : index
    %c0_176 = arith.constant 0 : index
    %147 = vector.load %arg3[%c192_175, %c0_176] : memref<200x128xbf16, #tpu.memory_space<vmem>>, vector<8x128xbf16>
    %c0_177 = arith.constant 0 : index
    %c0_178 = arith.constant 0 : index
    %148 = vector.load %arg6[%c0_177, %c0_178] : memref<128x128xf32, #tpu.memory_space<vmem>>, vector<128x128xf32>
    %cst_179 = arith.constant dense<0.000000e+00> : vector<128x128xf32>
    %149 = tpu.matmul %146, %147, %cst_179 {dimension_numbers = #tpu.dot_dimension_numbers<[1], [0], [0], [1], [0, 0, 1, 1], [], []>} : vector<128x8xbf16>, vector<8x128xbf16>, vector<128x128xf32> -> vector<128x128xf32>
    %150 = arith.addf %148, %149 : vector<128x128xf32>
    %c0_180 = arith.constant 0 : index
    %c0_181 = arith.constant 0 : index
    %151 = vector.load %arg6[%c0_180, %c0_181] : memref<128x128xf32, #tpu.memory_space<vmem>>, vector<128x128xf32>
    tpu.vector_store %arg6[%c0_180, %c0_181], %150 {strides = array<i32>} : memref<128x128xf32, #tpu.memory_space<vmem>>, vector<128x128xf32>,
    %c0_182 = arith.constant 0 : index
    %c0_183 = arith.constant 0 : index
    %152 = vector.load %arg6[%c0_182, %c0_183] : memref<128x128xf32, #tpu.memory_space<vmem>>, vector<128x128xf32>
    %c0_184 = arith.constant 0 : index
    %c0_185 = arith.constant 0 : index
    %153 = vector.load %arg4[%c0_184, %c0_185] : memref<1x128xf32, #tpu.memory_space<vmem>>, vector<1x128xf32>
    %154 = vector.broadcast %153 : vector<1x128xf32> to vector<128x128xf32>
    %155 = arith.addf %152, %154 : vector<128x128xf32>
    %cst_186 = arith.constant 2.000000e-01 : f32
    %156 = vector.broadcast %cst_186 : f32 to vector<128x128xf32>
    %157 = arith.mulf %156, %155 : vector<128x128xf32>
    %158 = arith.maximumf %155, %157 : vector<128x128xf32>
    %159 = arith.truncf %158 : vector<128x128xf32> to vector<128x128xbf16>
    %c0_187 = arith.constant 0 : index
    %c0_188 = arith.constant 0 : index
    %160 = vector.load %arg5[%c0_187, %c0_188] : memref<128x128xbf16, #tpu.memory_space<vmem>>, vector<128x128xbf16>
    tpu.vector_store %arg5[%c0_187, %c0_188], %159 {strides = array<i32>} : memref<128x128xbf16, #tpu.memory_space<vmem>>, vector<128x128xbf16>,
    return
  }
  func.func @transform_0(%arg0: i32, %arg1: i32) -> (i32, i32) {
    %c0_i32 = arith.constant 0 : i32
    %c0_i32_0 = arith.constant 0 : i32
    return %arg0, %c0_i32 : i32, i32
  }
  func.func @transform_1(%arg0: i32, %arg1: i32) -> (i32, i32) {
    %c0_i32 = arith.constant 0 : i32
    %c0_i32_0 = arith.constant 0 : i32
    return %c0_i32, %arg1 : i32, i32
  }
  func.func @transform_2(%arg0: i32, %arg1: i32) -> (i32, i32) {
    %c0_i32 = arith.constant 0 : i32
    %c0_i32_0 = arith.constant 0 : i32
    return %c0_i32, %arg1 : i32, i32
  }
  func.func @transform_3(%arg0: i32, %arg1: i32) -> (i32, i32) {
    %c0_i32 = arith.constant 0 : i32
    return %arg0, %arg1 : i32, i32
  }
}

</mosaic_0001>

<bundles_post_ra>
// kernel: tpu_custom_call.1
= control target key start
LH: loop header
LB: loop body
LE: loop exit
PB: predicated region body
PF: predicated region fallthrough
CT: control target
= control target key end

     0   :  { %8 = vsyncpa [#allocation4], 0  ;;  %s10135_s0 = inlined_call_operand.vmem [shape: bf16[1408,8], index: 0, kind: input, shape index: {}]   ;;  %s10136_s1 = inlined_call_operand.vmem [shape: bf16[200,128], index: 1, kind: input, shape index: {}]   ;;  %s10137_s2 = inlined_call_operand.vmem [shape: f32[1,128], index: 2, kind: input, shape index: {}]   ;;  %s10138_s3 = inlined_call_operand.hbm [shape: bf16[256,128], index: 3, kind: output, shape index: {}]  }
   0x1   :  { %10 = vsyncpa [#allocation4 + $0x1], 0  ;;  %s8639_s12 = smov 0   ;;  %s8641_s13 = smov 0  }
   0x2   :  { %s8643_s14 = smov 0   ;;  %s8645_s15 = smov 0  }
   0x3   :  { %s8647_s16 = smov 0   ;;  %s8649_s17 = smov 0  }
   0x4 LB: > { %s7053_s18 = sadd.s32 4294967295, %s8614_s17   ;;  %s7054_s19 = sadd.s32 4294967294, %s8614_s17   ;;  %s8614_s17 = sphi %s8649_s17, %s16_s17   ;;  %s8610_s16 = sphi %s8647_s16, %s10185_s16   ;;  %s8606_s15 = sphi %s8645_s15, %s10184_s15   ;;  %s8602_s14 = sphi %s8643_s14, %s10183_s14   ;;  %s8598_s13 = sphi %s8641_s13, %s10182_s13   ;;  %s8594_s12 = sphi %s8639_s12, %s10181_s12  }
   0x5   : > { %s28_s20 = sadd.s32 1, %s8610_s16  ;;  %s115_s21 = sadd.s32 1, %s8602_s14 }
   0x6   : > { %p30_p0 = scmp.ge.s32.totalorder %s28_s20, 2  ;;  %p125_p1 = scmp.ne.s32.totalorder %s8602_s14, %s8598_s13 }
   0x7   : > { %p126_p2 = scmp.eq.s32.totalorder %s7053_s18, 1  ;;  %p131_p3 = scmp.ne.s32.totalorder %s8598_s13, %s8594_s12 }
   0x8   : > { %s10187_s20 = smov (%p30_p0, %s28_s20), 0  ;;  %p132_p5 = scmp.eq.s32.totalorder %s7054_s19, 1 }
   0x9   : > { %p8679_p4 = por %p126_p2, %p125_p1  ;;  %s110_s23 = ssub.s32 %s8610_s16, %s10187_s20 }
   0xa   : > { %p7059_p6 = scmp.ge.s32.totalorder %s8614_s17, 1  ;;  %p113_p7 = scmp.eq.s32.totalorder %s110_s23, 0 }
   0xb   : > { %p8686_p8 = por %p132_p5, %p131_p3  ;;  %p172_p9 = scmp.lt.s32.totalorder %s8614_s17, 3 }
   0xc   : > { %s8692_s25 = scalar_select %p113_p7, %s8602_s14, %s115_s21  }
   0xd   : > { %p173_p10 = pnand %p7059_p6, %p172_p9 }
   0xf   : > { %176 = sbr.rel (%p173_p10) target bundleno = 647 (0x287), region = 32 }
  0x14   : > { %v250_v0 = vld [vmem:[%s10136_s1] sm:$0xf]  ;;  %vm332_vm0 = vcmask 1043456   ;;  %s203_s28 = smul.u32 88, %s8606_s15  ;;  %v481_v2 = vld [vmem:[%s10136_s1 + $0x4] sm:$0xf] }
  0x15   : > { %8241 = vmatprep.subr.msk.bf16.mxu1 %vm332_vm0, %v250_v0  ;;  %8240 = vmatprep.subr.msk.bf16.mxu0 %vm332_vm0, %v250_v0  ;;  %v334_v1 = vsel %vm332_vm0, %v250_v0, 0  ;;  %v711_v3 = vld [vmem:[%s10136_s1 + $0x8] sm:$0xf]  ;;  %vm307_vm1 = vcmask 64512   ;;  %v1013_v8 = vld [vmem:[%s10136_s1 + $0xc] sm:$0xf] }
  0x16   : > { %8239 = vmatpush3.bf16.msra.mxu1 %v334_v1  ;;  %7789 = vmatpush3.bf16.msra.mxu0 %v334_v1  ;;  %p204_p11 = scmp.lt.s32.totalorder %s203_s28, 175  ;;  %v865_v7 = vsel %vm332_vm0, %v711_v3, 0  ;;  %v563_v10 = vsel %vm332_vm0, %v481_v2, 0  ;;  %v1314_v11 = vld [vmem:[%s10136_s1 + $0x10] sm:$0xf]  ;;  %v1166_v42 = vsel %vm332_vm0, %v1013_v8, 0 }
  0x17   : > { %8242 = vmatprep.subr.msk.bf16.mxu1 %vm332_vm0, %v481_v2  ;;  %8243 = vmatprep.subr.msk.bf16.mxu0 %vm332_vm0, %v711_v3  ;;  %vm771_vm2 = vsmask.f32 7424  ;;  %v1417_v26 = vsel %vm332_vm0, %v1314_v11, 0  ;;  %v8754_v40 = vld [vmem:[%s10136_s1 + $0x14] sm:$0xf]  ;;  %vm1374_vm3 = vcmask 1046528  }
  0x18   : > { %s10189_s28 = smov (!%p204_p11, %s203_s28), 175  ;;  %v8762_v45 = vld [vmem:[%s10136_s1 + $0x18] sm:$0xf]  ;;  %s7515_s10 = sshll.u32 %s8606_s15, 10 }
  0x19   : > { %s7061_s6 = sshll.u32 %s10189_s28, 2  ;;  %s10083_s21 = scalar_lea.hbm %s10138_s3, %s7515_s10 }
  0x1a   : > { %s8712_s9 = scalar_lea.vmem %s10135_s0, %s7061_s6  ;;  %s200_s6 = sand.u32 1, %s8598_s13  }
  0x1b   : > { %v8323_v4 = vld [vmem:[%s8712_s9] sm:$0xff]   ;;  %v8325_v6 = vld [vmem:[%s8712_s9 + $0x8] sm:$0xff]   ;;  %v8327_v12 = vld [vmem:[%s8712_s9 + $0x10] sm:$0xff]   ;;  %s10031_s7 = sshll.u32 %s200_s6, 6  ;;  %s10090_s23 = scalar_lea.sflag [#allocation4], %s200_s6 }
  0x1c   : > { %v8324_v5 = vld [vmem:[%s8712_s9 + $0x20] sm:$0xff]   ;;  %7790 = vmatprep.mubr.msk.bf16.mxu0 %vm307_vm1, %v8323_v4  ;;  %v8326_v9 = vld [vmem:[%s8712_s9 + $0x28] sm:$0xff]   ;;  %v8328_v13 = vld [vmem:[%s8712_s9 + $0x30] sm:$0xff]   ;;  %s10046_s8 = scalar_lea.vmem [#allocation3], %s10031_s7  ;;  %s8616_s26 = smov [#allocation3]  }
  0x1d   : > { %7798 = vmatprep.mubr.msk.bf16.mxu1 %vm307_vm1, %v8324_v5  ;;  %7791 = vmatmul.mubr.msk.bf16.vlgmr.msra.gmra.mxu0 %vm307_vm1, %v8325_v6  ;;  %v8329_v14 = vld [vmem:[%s8712_s9 + $0x18] sm:$0xff]   ;;  %v8332_v17 = vld [vmem:[%s8712_s9] sm:$0xff]   ;;  %v8333_v18 = vld [vmem:[%s8712_s9 + $0x8] sm:$0xff]   ;;  %s6954_s11 = sshll.u32 %s10046_s8, 4  ;;  %s8542_s27 = sshll.u32 %s8616_s26, 4  ;;  %s10085_s11 = int_to_ptr.vmem [resolvable:$true] %s6954_s11  ;;  %s8543_s27 = int_to_ptr.vmem [resolvable:$false] %s8542_s27 }
  0x1e   : > { %7799 = vmatmul.mubr.msk.bf16.vlgmr.msra.gmra.mxu1 %vm307_vm1, %v8326_v9  ;;  %7825 = vmatpush3.bf16.msra.mxu0 %v865_v7  ;;  %v8330_v15 = vld [vmem:[%s8712_s9 + $0x38] sm:$0xff]   ;;  %v773_v19 = vshrl.u32 %v8332_v17, 16  ;;  %v775_v20 = vshll.u32 %v8332_v17, 16  ;;  %v780_v21 = vshll.u32 %v8333_v18, 16  ;;  %v784_v22 = vshrl.u32 %v8333_v18, 16  ;;  %v8335_v23 = vld [vmem:[%s8712_s9 + $0x10] sm:$0xff]   ;;  %p8545_p1 = scmp.lt.s32.totalorder %s10085_s11, %s8543_s27 }
  0x1f   : > { %7807 = vmatpush3.bf16.msra.mxu1 %v563_v10  ;;  %7794 = vmatprep.mubr.msk.bf16.mxu0 %vm307_vm1, %v8327_v12  ;;  %v8331_v16 = vld [vmem:[%s8712_s9 + $0x58] sm:$0xff]   ;;  %v8334_v28 = vld [vmem:[%s8712_s9 + $0x60] sm:$0xff]   ;;  %v788_v29 = vshll.u32 %v8335_v23, 16  ;;  %v792_v30 = vshrl.u32 %v8335_v23, 16  ;;  %v8336_v33 = vld [vmem:[%s8712_s9 + $0x68] sm:$0xff]   ;;  %s8538_s15 = scalar_lea.vmem %s10085_s11, 1024 }
  0x20   : > { %7802 = vmatprep.mubr.msk.bf16.mxu1 %vm307_vm1, %v8328_v13  ;;  %8244 = vmatprep.subr.msk.bf16.mxu1 %vm332_vm0, %v1013_v8  ;;  %v777_v24 = vrot.slane %v775_v20, 1  ;;  %v782_v25 = vrot.slane %v780_v21, 1  ;;  %v8337_v27 = vld [vmem:[%s8712_s9 + $0x18] sm:$0xff]   ;;  %v8339_v36 = vld [vmem:[%s8712_s9 + $0x20] sm:$0xff]   ;;  %v8341_v46 = vld [vmem:[%s8712_s9 + $0x28] sm:$0xff]   ;;  %p8539_p12 = scmp.ne.s32.totalorder %s10085_s11, %s8538_s15  ;;  %s8544_s28 = scalar_lea.vmem %s8543_s27, 2048 }
  0x21   : > { %8245 = vmatprep.subr.msk.bf16.mxu0 %vm332_vm0, %v1314_v11  ;;  %v796_v34 = vshll.u32 %v8337_v27, 16  ;;  %v790_v35 = vrot.slane %v788_v29, 1  ;;  %v800_v39 = vshrl.u32 %v8337_v27, 16  ;;  %v804_v44 = vshll.u32 %v8339_v36, 16  ;;  %v8343_v52 = vld [vmem:[%s8712_s9 + $0x30] sm:$0xff]   ;;  %v8345_v56 = vld [vmem:[%s8712_s9 + $0x38] sm:$0xff]   ;;  %p8546_p2 = scmp.lt.s32.totalorder %s8544_s28, %s8538_s15 }
  0x22   : > { %v778_v31 = vor.u32 %v777_v24, %v773_v19  ;;  %v786_v32 = vor.u32 %v784_v22, %v782_v25  ;;  %v808_v47 = vshrl.u32 %v8339_v36, 16  ;;  %v812_v51 = vshll.u32 %v8341_v46, 16  ;;  %v8338_v57 = vld [vmem:[%s8712_s9 + $0x70] sm:$0xff]   ;;  %v8340_v60 = vld [vmem:[%s8712_s9 + $0x78] sm:$0xff]   ;;  %v8342_v6 = vld [vmem:[%s8712_s9 + $0x80] sm:$0xff]   ;;  %p8540_p13 = pnand %p8539_p12, %p8679_p4 }
  0x23   : > { %v798_v38 = vrot.slane %v796_v34, 1  ;;  %v794_v43 = vor.u32 %v792_v30, %v790_v35  ;;  %v806_v50 = vrot.slane %v804_v44, 1  ;;  %v820_v55 = vshll.u32 %v8343_v52, 16  ;;  %v8347_v0 = vld [vmem:[%s8712_s9 + $0x40] ss:$0 sps:$4 sm:$0x11]   ;;  %p8547_p3 = por %p8546_p2, %p8545_p1 }
  0x24   : > { %v783_v37 = vsel %vm771_vm2, %v778_v31, %v782_v25  ;;  %v791_v41 = vsel %vm771_vm2, %v786_v32, %v790_v35  ;;  %v814_v54 = vrot.slane %v812_v51, 1  ;;  %v816_v59 = vshrl.u32 %v8341_v46, 16  ;;  %v8348_v1 = vld [vmem:[%s8712_s9 + $0x58] sm:$0xff]   ;;  %v8349_v7 = vld [vmem:[%s8712_s9 + $0x60] sm:$0xff]   ;;  %v8344_v9 = vld [vmem:[%s8712_s9 + $0x88] sm:$0xff]   ;;  %p8541_p0 = pneg %p8540_p13 }
  0x25   : > { %7795 = vmatmul.mubr.msk.bf16.gmra.mxu0 %vm307_vm1, %v8329_v14  ;;  %v799_v48 = vsel %vm771_vm2, %v794_v43, %v798_v38  ;;  %v802_v49 = vor.u32 %v800_v39, %v798_v38  ;;  %v810_v53 = vor.u32 %v808_v47, %v806_v50  ;;  %v824_v62 = vshrl.u32 %v8343_v52, 16  ;;  %v8351_v14 = vld [vmem:[%s8712_s9 + $0x8] sm:$0xff]   ;;  %v8353_v27 = vld [vmem:[%s8712_s9 + $0x10] sm:$0xff]   ;;  %v8356_v39 = vld [vmem:[%s8712_s9 + $0x78] sm:$0xff]  }
  0x26   : > { %7803 = vmatmul.mubr.msk.bf16.gmra.mxu1 %vm307_vm1, %v8330_v15  ;;  %7826 = vmatprep.mubr.msk.bf16.mxu0 %vm307_vm1, %v783_v37  ;;  %v828_v63 = vshll.u32 %v8345_v56, 16  ;;  %v822_v2 = vrot.slane %v820_v55, 1  ;;  %v818_v3 = vor.u32 %v816_v59, %v814_v54  ;;  %v1076_v8 = vshll.u32 %v8348_v1, 16  ;;  %v8352_v21 = vld [vmem:[%s8712_s9 + $0x68] sm:$0xff]   ;;  %v8355_v37 = vld [vmem:[%s8712_s9 + $0x18] sm:$0xff]   ;;  %v8358_v44 = vld [vmem:[%s8712_s9 + $0x80] sm:$0xff]   ;;  %p8548_p5 = pnand %p8547_p3, %p8541_p0 }
  0x27   : > { %7808 = vmatprep.mubr.msk.bf16.mxu1 %vm307_vm1, %v8331_v16  ;;  %v807_v58 = vsel %vm771_vm2, %v802_v49, %v806_v50  ;;  %v815_v61 = vsel %vm771_vm2, %v810_v53, %v814_v54  ;;  %v832_v10 = vshrl.u32 %v8345_v56, 16  ;;  %v836_v11 = vshll.u32 %v8347_v0, 16  ;;  %v8350_v16 = vld [vmem:[%s8712_s9] sm:$0xfe]   ;;  %v8359_v54 = vld [vmem:[%s8712_s9 + $0x28] sm:$0xff]  }
  0x28   : > { %v826_v4 = vor.u32 %v824_v62, %v822_v2  ;;  %v830_v5 = vrot.slane %v828_v63, 1  ;;  %v823_v12 = vsel %vm771_vm2, %v818_v3, %v822_v2  ;;  %v1074_v13 = vshrl.u32 %v8348_v1, 16  ;;  %v8822_v55 = vld [vmem:[%s10136_s1 + $0x1c] sm:$0xf]  ;;  %v8362_v2 = vld [vmem:[%s8712_s9 + $0x90] sm:$0xff]  }
  0x29   : > { %v1078_v17 = vrot.slane %v1076_v8, 1  ;;  %v1081_v18 = vshll.u32 %v8349_v7, 16  ;;  %v838_v20 = vrot.slane %v836_v11, 1  ;;  %v1375_v22 = vrot.slane %v8350_v16, 1 }
  0x2a   : > { %v831_v15 = vsel %vm771_vm2, %v826_v4, %v830_v5  ;;  %v834_v19 = vor.u32 %v832_v10, %v830_v5  ;;  %v1376_v23 = vrot.slane %v8351_v14, 1  ;;  %v1089_v30 = vshll.u32 %v8352_v21, 16  ;;  %v8361_v5 = vld [vmem:[%s8712_s9 + $0x30] sm:$0xff]  }
  0x2b   : > { %v1079_v24 = vor.u32 %v1078_v17, %v1074_v13  ;;  %v1083_v25 = vrot.slane %v1081_v18, 1  ;;  %v1085_v31 = vshrl.u32 %v8349_v7, 16  ;;  %v1093_v34 = vshrl.u32 %v8352_v21, 16  ;;  %v8364_v13 = vld [vmem:[%s8712_s9 + $0x98] ss:$0 sps:$4 sm:$0x11]  }
  0x2c   : > { %v839_v29 = vsel %vm771_vm2, %v834_v19, %v838_v20  ;;  %v1377_v32 = vsel %vm1374_vm3, %v1375_v22, %v1376_v23  ;;  %v1378_v36 = vrot.slane %v8353_v27, 1  ;;  %v1091_v38 = vrot.slane %v1089_v30, 1 }
  0x2d   : > { %7827 = vmatmul.mubr.msk.bf16.vlgmr.msra.gmra.mxu0 %vm307_vm1, %v791_v41  ;;  %v1087_v41 = vor.u32 %v1085_v31, %v1083_v25  ;;  %v1646_v46 = vsel %vm332_vm0, %v8754_v40, 0  ;;  %v1380_v47 = vrot.slane %v8355_v37, 1  ;;  %v1875_v50 = vsel %vm332_vm0, %v8762_v45, 0  ;;  %v8367_v31 = vld [vmem:[%s8712_s9 + $0x108] sm:$0xff]   ;;  %v8370_v37 = vld [vmem:[%s8712_s9 + $0xc0] sm:$0xff]  }
  0x2e   : > { %7809 = vmatmul.mubr.msk.bf16.vlgmr.msra.gmra.mxu1 %vm307_vm1, %v8334_v28  ;;  %7861 = vmatpush3.bf16.msra.mxu0 %v1417_v26  ;;  %v8354_v26 = vld [vmem:[%s8712_s9 + $0x70] sm:$0xff]   ;;  %v1379_v49 = vsel %vm1374_vm3, %v1376_v23, %v1378_v36  ;;  %v1105_v51 = vshll.u32 %v8356_v39, 16  ;;  %v1109_v56 = vshrl.u32 %v8356_v39, 16  ;;  %v1384_v63 = vrot.slane %v8359_v54, 1  ;;  %v8371_v39 = vld [vmem:[%s8712_s9 + $0x118] sm:$0xff]  }
  0x2f   : > { %7843 = vmatpush3.bf16.msra.mxu1 %v1166_v42  ;;  %7812 = vmatprep.mubr.msk.bf16.mxu1 %vm307_vm1, %v8336_v33  ;;  %v8346_v28 = vld [vmem:[%s8712_s9 + $0x90] sm:$0xff]   ;;  %v1084_v33 = vsel %vm771_vm2, %v1079_v24, %v1083_v25  ;;  %v1097_v35 = vshll.u32 %v8354_v26, 16  ;;  %v1095_v42 = vor.u32 %v1093_v34, %v1091_v38  ;;  %v1092_v52 = vsel %vm771_vm2, %v1087_v41, %v1091_v38  ;;  %v8365_v23 = vld [vmem:[%s8712_s9 + $0x40] ss:$0 sps:$4 sm:$0x11]  }
  0x30   : > { %7830 = vmatprep.mubr.msk.bf16.mxu0 %vm307_vm1, %v799_v48  ;;  %8246 = vmatprep.subr.msk.bf16.mxu1 %vm332_vm0, %v8754_v40  ;;  %v8357_v48 = vld [vmem:[%s8712_s9 + $0x20] sm:$0xff]   ;;  %v1101_v53 = vshrl.u32 %v8354_v26, 16  ;;  %v1117_v8 = vshrl.u32 %v8358_v44, 16  ;;  %v1133_v20 = vshrl.u32 %v8362_v2, 16  ;;  %v1137_v22 = vshll.u32 %v8364_v13, 16  ;;  %v8369_v34 = vld [vmem:[%s8712_s9 + $0x110] sm:$0xff]  }
  0x31   : > { %8247 = vmatprep.subr.msk.bf16.mxu0 %vm332_vm0, %v8762_v45  ;;  %v1099_v43 = vrot.slane %v1097_v35, 1  ;;  %v8828_v45 = vld [vmem:[%s10136_s1 + $0x20] sm:$0xf]  ;;  %v1382_v59 = vrot.slane %v8357_v48, 1  ;;  %v1390_v27 = vrot.slane %v8365_v23, 1  ;;  %v8368_v35 = vld [vmem:[%s8712_s9 + $0xb8] sm:$0xff]  }
  0x32   : > { %v2176_v38 = vsel %vm332_vm0, %v8822_v55, 0  ;;  %v8881_v41 = vld [vmem:[%s10136_s1 + $0x24] sm:$0xf]  ;;  %v8384_v48 = vld [vmem:[%s8712_s9 + $0x108] sm:$0xff]   ;;  %v8377_v54 = vld [vmem:[%s8712_s9 + $0x130] sm:$0xff]  }
  0x33   : > { %v1100_v40 = vsel %vm771_vm2, %v1095_v42, %v1099_v43  ;;  %v1103_v62 = vor.u32 %v1101_v53, %v1099_v43  ;;  %v1383_v3 = vsel %vm1374_vm3, %v1380_v47, %v1382_v59  ;;  %v1385_v7 = vsel %vm1374_vm3, %v1382_v59, %v1384_v63  ;;  %v8887_v42 = vld [vmem:[%s10136_s1 + $0x28] sm:$0xf]  ;;  %v8376_v53 = vld [vmem:[%s8712_s9 + $0xd8] sm:$0xff]  }
  0x34   : > { %v8372_v43 = vld [vmem:[%s8712_s9 + $0xc8] sm:$0xff]  }
  0x35   : > { %7831 = vmatmul.mubr.msk.bf16.gmra.mxu0 %vm307_vm1, %v807_v58  ;;  %v1381_v58 = vsel %vm1374_vm3, %v1378_v36, %v1380_v47  ;;  %v2477_v36 = vsel %vm332_vm0, %v8828_v45, 0  ;;  %v8374_v47 = vld [vmem:[%s8712_s9 + $0xd0] sm:$0xff]  }
  0x36   : > { %7813 = vmatmul.mubr.msk.bf16.gmra.mxu1 %vm307_vm1, %v8338_v57  ;;  %7834 = vmatprep.mubr.msk.bf16.mxu0 %vm307_vm1, %v815_v61  ;;  %v1113_v57 = vshll.u32 %v8358_v44, 16  ;;  %v8360_v61 = vld [vmem:[%s8712_s9 + $0x88] sm:$0xff]   ;;  %v8373_v44 = vld [vmem:[%s8712_s9 + $0x120] sm:$0xff]  }
  0x37   : > { %7816 = vmatprep.mubr.msk.bf16.mxu1 %vm307_vm1, %v8340_v60  ;;  %v1107_v60 = vrot.slane %v1105_v51, 1  ;;  %v1121_v4 = vshll.u32 %v8360_v61, 16  ;;  %v1125_v11 = vshrl.u32 %v8360_v61, 16  ;;  %v8385_v51 = vld [vmem:[%s8712_s9 + $0x110] sm:$0xff]  }
  0x38   : > { %v1115_v1 = vrot.slane %v1113_v57, 1 }
  0x39   : > { %v1111_v0 = vor.u32 %v1109_v56, %v1107_v60  ;;  %v1123_v14 = vrot.slane %v1121_v4, 1  ;;  %v8379_v56 = vld [vmem:[%s8712_s9 + $0x138] sm:$0xff]  }
  0x3a   : > { %v1119_v16 = vor.u32 %v1117_v8, %v1115_v1  ;;  %v2396_v8 = vshrl.u32 %v8385_v51, 16 }
  0x3b   : > { %v1116_v10 = vsel %vm771_vm2, %v1111_v0, %v1115_v1  ;;  %v1127_v18 = vor.u32 %v1125_v11, %v1123_v14  ;;  %v8917_v0 = vld [vmem:[%s8712_s9 + $0xc8] sm:$0xff]   ;;  %v8381_v1 = vld [vmem:[%s8712_s9 + $0x140] sm:$0xff]  }
  0x3c   : > { %v1124_v24 = vsel %vm771_vm2, %v1119_v16, %v1123_v14  ;;  %v2107_v13 = vshll.u32 %v8917_v0, 16  ;;  %v8390_v14 = vld [vmem:[%s8712_s9 + $0xd0] sm:$0xff]  }
  0x3d   : > { %7835 = vmatmul.mubr.msk.bf16.gmra.mxu0 %vm307_vm1, %v823_v12  ;;  %v1129_v12 = vshll.u32 %v8362_v2, 16 }
  0x3e   : > { %7817 = vmatmul.mubr.msk.bf16.gmra.mxu1 %vm307_vm1, %v8342_v6  ;;  %7838 = vmatprep.mubr.msk.bf16.mxu0 %vm307_vm1, %v831_v15  ;;  %v1108_v6 = vsel %vm771_vm2, %v1103_v62, %v1107_v60  ;;  %v1386_v15 = vrot.slane %v8361_v5, 1  ;;  %v2392_v60 = vshll.u32 %v8385_v51, 16  ;;  %v8386_v62 = vld [vmem:[%s8712_s9 + $0xc0] sm:$0xff]   ;;  %v8380_v5 = vld [vmem:[%s8712_s9 + $0xe8] sm:$0xff]  }
  0x3f   : > { %7820 = vmatprep.mubr.msk.bf16.mxu1 %vm307_vm1, %v8344_v9  ;;  %v8363_v9 = vld [vmem:[%s8712_s9 + $0x38] sm:$0xff]   ;;  %v1131_v19 = vrot.slane %v1129_v12, 1  ;;  %v2103_v11 = vshrl.u32 %v8386_v62, 16  ;;  %v8389_v12 = vld [vmem:[%s8712_s9 + $0x120] sm:$0xff]   ;;  %v8953_v51 = vld [vmem:[%s10136_s1 + $0x2c] sm:$0xf] }
  0x40   : > { %v1388_v17 = vrot.slane %v8363_v9, 1  ;;  %v1387_v21 = vsel %vm1374_vm3, %v1384_v63, %v1386_v15  ;;  %v8387_v63 = vld [vmem:[%s8712_s9 + $0x118] sm:$0xff]   ;;  %v2394_v4 = vrot.slane %v2392_v60, 1  ;;  %v2099_v9 = vshll.u32 %v8386_v62, 16 }
  0x41   : > { %v1132_v26 = vsel %vm771_vm2, %v1127_v18, %v1131_v19  ;;  %v2404_v16 = vshrl.u32 %v8387_v63, 16 }
  0x42   : > { %v1389_v25 = vsel %vm1374_vm3, %v1386_v15, %v1388_v17  ;;  %v1391_v30 = vsel %vm1374_vm3, %v1388_v17, %v1390_v27  ;;  %v8391_v17 = vld [vmem:[%s8712_s9 + $0x128] sm:$0xff]   ;;  %v2956_v27 = vsel %vm332_vm0, %v8887_v42, 0 }
  0x45   : > { %7839 = vmatmul.mubr.msk.bf16.gmra.mxu0 %vm307_vm1, %v839_v29  ;;  %v1139_v29 = vrot.slane %v1137_v22, 1  ;;  %v2398_v22 = vor.u32 %v2396_v8, %v2394_v4 }
  0x46   : > { %7821 = vmatmul.mubr.msk.bf16.gmra.mxu1 %vm307_vm1, %v8346_v28  ;;  %7862 = vmatprep.mubr.msk.bf16.mxu0 %vm307_vm1, %v1377_v32  ;;  %v1135_v28 = vor.u32 %v1133_v20, %v1131_v19  ;;  %v2101_v19 = vrot.slane %v2099_v9, 1  ;;  %v2408_v20 = vshll.u32 %v8389_v12, 16 }
  0x47   : > { %7844 = vmatprep.mubr.msk.bf16.mxu1 %vm307_vm1, %v1084_v33  ;;  %v8366_v33 = vld [vmem:[%s8712_s9 + $0xb0] sm:$0xff]  }
  0x48   : > { %v1140_v32 = vsel %vm771_vm2, %v1135_v28, %v1139_v29  ;;  %v2111_v28 = vshrl.u32 %v8917_v0, 16  ;;  %v8393_v29 = vld [vmem:[%s8712_s9 + $0x130] sm:$0xff]  }
  0x4d   : > { %7863 = vmatmul.mubr.msk.bf16.vlgmr.msra.gmra.mxu0 %vm307_vm1, %v1379_v49  ;;  %v8382_v49 = vld [vmem:[%s8712_s9 + $0xb0] sm:$0xff]  }
  0x4e   : > { %7845 = vmatmul.mubr.msk.bf16.vlgmr.msra.gmra.mxu1 %vm307_vm1, %v1092_v52  ;;  %7897 = vmatpush3.bf16.msra.mxu0 %v1875_v50  ;;  %v8383_v50 = vld [vmem:[%s8712_s9 + $0xb8] sm:$0xff]   ;;  %v2387_v52 = vshll.u32 %v8384_v48, 16  ;;  %v2084_v57 = vshrl.u32 %v8382_v49, 16 }
  0x4f   : > { %7879 = vmatpush3.bf16.msra.mxu1 %v1646_v46  ;;  %7848 = vmatprep.mubr.msk.bf16.mxu1 %vm307_vm1, %v1100_v40  ;;  %v8375_v46 = vld [vmem:[%s8712_s9 + $0x128] sm:$0xff]   ;;  %v8378_v40 = vld [vmem:[%s8712_s9 + $0xe0] sm:$0xff]   ;;  %v2095_v2 = vshrl.u32 %v8383_v50, 16 }
  0x50   : > { %7866 = vmatprep.mubr.msk.bf16.mxu0 %vm307_vm1, %v1381_v58  ;;  %8248 = vmatprep.subr.msk.bf16.mxu1 %vm332_vm0, %v8822_v55  ;;  %v2086_v55 = vshll.u32 %v8382_v49, 16  ;;  %v2385_v58 = vshrl.u32 %v8384_v48, 16  ;;  %v2389_v59 = vrot.slane %v2387_v52, 1  ;;  %v8397_v49 = vld [vmem:[%s8712_s9 + $0x140] sm:$0xff]  }
  0x51   : > { %8249 = vmatprep.subr.msk.bf16.mxu0 %vm332_vm0, %v8828_v45  ;;  %v2091_v45 = vshll.u32 %v8383_v50, 16  ;;  %v2440_v62 = vshll.u32 %v8397_v49, 16 }
  0x52   : > { %v2088_v61 = vrot.slane %v2086_v55, 1 }
  0x55   : > { %7867 = vmatmul.mubr.msk.bf16.gmra.mxu0 %vm307_vm1, %v1383_v3  ;;  %v2390_v3 = vor.u32 %v2389_v59, %v2385_v58  ;;  %v8396_v58 = vld [vmem:[%s8712_s9 + $0xe8] sm:$0xff]  }
  0x56   : > { %7849 = vmatmul.mubr.msk.bf16.gmra.mxu1 %vm307_vm1, %v1108_v6  ;;  %7870 = vmatprep.mubr.msk.bf16.mxu0 %vm307_vm1, %v1385_v7  ;;  %v2089_v6 = vor.u32 %v2088_v61, %v2084_v57  ;;  %v2093_v7 = vrot.slane %v2091_v45, 1  ;;  %v2428_v61 = vshrl.u32 %v8393_v29, 16 }
  0x57   : > { %7852 = vmatprep.mubr.msk.bf16.mxu1 %vm307_vm1, %v1116_v10  ;;  %v2400_v10 = vshll.u32 %v8387_v63, 16  ;;  %v2395_v15 = vsel %vm771_vm2, %v2390_v3, %v2394_v4 }
  0x58   : > { %v2094_v18 = vsel %vm771_vm2, %v2089_v6, %v2093_v7  ;;  %v2139_v6 = vshll.u32 %v8396_v58, 16 }
  0x59   : > { %v2402_v23 = vrot.slane %v2400_v10, 1  ;;  %v2442_v10 = vrot.slane %v2440_v62, 1 }
  0x5d   : > { %7871 = vmatmul.mubr.msk.bf16.gmra.mxu0 %vm307_vm1, %v1387_v21  ;;  %v8930_v21 = vld [vmem:[%s8712_s9 + $0xd8] sm:$0xff]  }
  0x5e   : > { %7853 = vmatmul.mubr.msk.bf16.gmra.mxu1 %vm307_vm1, %v1124_v24  ;;  %7874 = vmatprep.mubr.msk.bf16.mxu0 %vm307_vm1, %v1389_v25  ;;  %v2115_v24 = vshll.u32 %v8390_v14, 16  ;;  %v2097_v25 = vor.u32 %v2095_v2, %v2093_v7  ;;  %v8398_v7 = vld [vmem:[%s8712_s9 + $0xf0] ss:$0 sps:$4 sm:$0x11]  }
  0x5f   : > { %7856 = vmatprep.mubr.msk.bf16.mxu1 %vm307_vm1, %v1132_v26  ;;  %v2727_v26 = vsel %vm332_vm0, %v8881_v41, 0 }
  0x65   : > { %7875 = vmatmul.mubr.msk.bf16.gmra.mxu0 %vm307_vm1, %v1391_v30  ;;  %v2105_v30 = vor.u32 %v2103_v11, %v2101_v19  ;;  %v8399_v11 = vld [vmem:[%s8712_s9 + $0x148] ss:$0 sps:$4 sm:$0x11]  }
  0x66   : > { %7857 = vmatmul.mubr.msk.bf16.gmra.mxu1 %vm307_vm1, %v1140_v32  ;;  %7898 = vmatprep.mubr.msk.bf16.mxu0 %vm307_vm1, %v8367_v31  ;;  %v2109_v31 = vrot.slane %v2107_v13, 1  ;;  %v2406_v32 = vor.u32 %v2404_v16, %v2402_v23 }
  0x67   : > { %7880 = vmatprep.mubr.msk.bf16.mxu1 %vm307_vm1, %v8366_v33  ;;  %v2416_v33 = vshll.u32 %v8391_v17, 16 }
  0x69   : > { %v2418_v48 = vrot.slane %v2416_v33, 1  ;;  %v8402_v33 = vld [vmem:[%s8712_s9 + $0x8] sm:$0xff]  }
  0x6d   : > { %7899 = vmatmul.mubr.msk.bf16.vlgmr.msra.gmra.mxu0 %vm307_vm1, %v8369_v34  ;;  %v2410_v34 = vrot.slane %v2408_v20, 1 }
  0x6e   : > { %7881 = vmatmul.mubr.msk.bf16.vlgmr.msra.gmra.mxu1 %vm307_vm1, %v8368_v35  ;;  %7933 = vmatpush3.bf16.msra.mxu0 %v2477_v36  ;;  %v2412_v35 = vshrl.u32 %v8389_v12, 16  ;;  %v2119_v36 = vshrl.u32 %v8390_v14, 16 }
  0x6f   : > { %7915 = vmatpush3.bf16.msra.mxu1 %v2176_v38  ;;  %7884 = vmatprep.mubr.msk.bf16.mxu1 %vm307_vm1, %v8370_v37  ;;  %v2123_v37 = vshll.u32 %v8930_v21, 16  ;;  %v2403_v38 = vsel %vm771_vm2, %v2398_v22, %v2402_v23  ;;  %v2411_v50 = vsel %vm771_vm2, %v2406_v32, %v2410_v34  ;;  %v2147_v22 = vshll.u32 %v8398_v7, 16  ;;  %v8401_v23 = vld [vmem:[%s8712_s9 + $0xb8] sm:$0xff]  }
  0x70   : > { %7902 = vmatprep.mubr.msk.bf16.mxu0 %vm307_vm1, %v8371_v39  ;;  %8250 = vmatprep.subr.msk.bf16.mxu1 %vm332_vm0, %v8881_v41  ;;  %v2117_v39 = vrot.slane %v2115_v24, 1  ;;  %v2420_v41 = vshrl.u32 %v8391_v17, 16  ;;  %v2414_v52 = vor.u32 %v2412_v35, %v2410_v34  ;;  %v2444_v17 = vshrl.u32 %v8397_v49, 16  ;;  %v8403_v35 = vld [vmem:[%s8712_s9 + $0xc0] sm:$0xff]   ;;  %v8409_v49 = vld [vmem:[%s8712_s9 + $0xd8] sm:$0xff]  }
  0x71   : > { %8251 = vmatprep.subr.msk.bf16.mxu0 %vm332_vm0, %v8887_v42  ;;  %v2102_v42 = vsel %vm771_vm2, %v2097_v25, %v2101_v19  ;;  %v2125_v55 = vrot.slane %v2123_v37, 1  ;;  %v8400_v25 = vld [vmem:[%s8712_s9 + $0xb0] sm:$0xfe]   ;;  %v8405_v37 = vld [vmem:[%s8712_s9 + $0xc8] sm:$0xff]   ;;  %v8421_v7 = vld [vmem:[%s8712_s9 + $0x18] sm:$0xff]  }
  0x72   : > { %v2121_v57 = vor.u32 %v2119_v36, %v2117_v39  ;;  %v2419_v60 = vsel %vm771_vm2, %v2414_v52, %v2418_v48 }
  0x74   : > { %v2126_v3 = vsel %vm771_vm2, %v2121_v57, %v2125_v55  ;;  %v8418_v57 = vld [vmem:[%s8712_s9 + $0x8] sm:$0xff]  }
  0x75   : > { %7903 = vmatmul.mubr.msk.bf16.gmra.mxu0 %vm307_vm1, %v8373_v44  ;;  %v8394_v44 = vld [vmem:[%s8712_s9 + $0xe0] sm:$0xff]  }
  0x76   : > { %7885 = vmatmul.mubr.msk.bf16.gmra.mxu1 %vm307_vm1, %v8372_v43  ;;  %7906 = vmatprep.mubr.msk.bf16.mxu0 %vm307_vm1, %v8375_v46  ;;  %v2424_v43 = vshll.u32 %v8393_v29, 16  ;;  %v8395_v46 = vld [vmem:[%s8712_s9 + $0x138] sm:$0xff]   ;;  %v2131_v59 = vshll.u32 %v8394_v44, 16  ;;  %v2149_v29 = vrot.slane %v2147_v22, 1 }
  0x77   : > { %7888 = vmatprep.mubr.msk.bf16.mxu1 %vm307_vm1, %v8374_v47  ;;  %v2110_v47 = vsel %vm771_vm2, %v2105_v30, %v2109_v31  ;;  %v2432_v45 = vshll.u32 %v8395_v46, 16  ;;  %v2436_v2 = vshrl.u32 %v8395_v46, 16  ;;  %v2685_v30 = vrot.slane %v8400_v25, 1 }
  0x78   : > { %v2133_v8 = vrot.slane %v2131_v59, 1  ;;  %v3185_v46 = vsel %vm332_vm0, %v8953_v51, 0 }
  0x79   : > { %v2434_v4 = vrot.slane %v2432_v45, 1 }
  0x7b   : > { %v2438_v13 = vor.u32 %v2436_v2, %v2434_v4  ;;  %v3394_v2 = vshrl.u32 %v8418_v57, 16 }
  0x7d   : > { %7907 = vmatmul.mubr.msk.bf16.gmra.mxu0 %vm307_vm1, %v8377_v54  ;;  %v2113_v54 = vor.u32 %v2111_v28, %v2109_v31  ;;  %v2443_v20 = vsel %vm771_vm2, %v2438_v13, %v2442_v10  ;;  %v2686_v31 = vrot.slane %v8401_v23, 1  ;;  %v8427_v23 = vld [vmem:[%s8712_s9 + $0x30] sm:$0xff]  }
  0x7e   : > { %7889 = vmatmul.mubr.msk.bf16.gmra.mxu1 %vm307_vm1, %v8376_v53  ;;  %7910 = vmatprep.mubr.msk.bf16.mxu0 %vm307_vm1, %v8379_v56  ;;  %v8959_v53 = vld [vmem:[%s10136_s1 + $0x30] sm:$0xf]  ;;  %v2426_v56 = vrot.slane %v2424_v43, 1 }
  0x7f   : > { %7892 = vmatprep.mubr.msk.bf16.mxu1 %vm307_vm1, %v8378_v40  ;;  %v2422_v40 = vor.u32 %v2420_v41, %v2418_v48  ;;  %v2118_v63 = vsel %vm771_vm2, %v2113_v54, %v2117_v39  ;;  %v2687_v36 = vsel %vm1374_vm3, %v2685_v30, %v2686_v31  ;;  %v2690_v39 = vrot.slane %v8405_v37, 1  ;;  %v8404_v41 = vld [vmem:[%s8712_s9 + $0x10] sm:$0xff]   ;;  %v8406_v48 = vld [vmem:[%s8712_s9 + $0x18] sm:$0xff]  }
  0x80   : > { %v2430_v9 = vor.u32 %v2428_v61, %v2426_v56  ;;  %v3486_v43 = vsel %vm332_vm0, %v8959_v53, 0  ;;  %v2694_v54 = vrot.slane %v8409_v49, 1  ;;  %v3396_v61 = vshll.u32 %v8418_v57, 16  ;;  %v8422_v30 = vld [vmem:[%s8712_s9 + $0x70] sm:$0xff]   ;;  %v8429_v37 = vld [vmem:[%s8712_s9 + $0x38] sm:$0xff]   ;;  %v8426_v49 = vld [vmem:[%s8712_s9 + $0x80] sm:$0xff]  }
  0x81   : > { %v2427_v0 = vsel %vm771_vm2, %v2422_v40, %v2426_v56  ;;  %v8411_v40 = vld [vmem:[%s8712_s9 + $0xe0] sm:$0xff]  }
  0x82   : > { %v2435_v16 = vsel %vm771_vm2, %v2430_v9, %v2434_v4  ;;  %v2696_v59 = vrot.slane %v8411_v40, 1  ;;  %v3398_v4 = vrot.slane %v3396_v61, 1  ;;  %v8433_v40 = vld [vmem:[%s8712_s9 + $0x48] ss:$0 sps:$4 sm:$0x11]  }
  0x84   : > { %v3399_v9 = vor.u32 %v3398_v4, %v3394_v2  ;;  %v8437_v4 = vld [vmem:[%s8712_s9 + $0x10] sm:$0xff]  }
  0x85   : > { %7911 = vmatmul.mubr.msk.bf16.gmra.mxu0 %vm307_vm1, %v8381_v1  ;;  %v2127_v1 = vshrl.u32 %v8930_v21, 16  ;;  %v2143_v21 = vshrl.u32 %v8396_v58, 16  ;;  %v8413_v58 = vld [vmem:[%s8712_s9 + $0xe8] sm:$0xff]  }
  0x86   : > { %7893 = vmatmul.mubr.msk.bf16.gmra.mxu1 %vm307_vm1, %v8380_v5  ;;  %7934 = vmatprep.mubr.msk.bf16.mxu0 %vm307_vm1, %v2395_v15  ;;  %v2135_v5 = vshrl.u32 %v8394_v44, 16  ;;  %v2141_v15 = vrot.slane %v2139_v6, 1  ;;  %v8407_v44 = vld [vmem:[%s8712_s9 + $0xd0] sm:$0xff]   ;;  %v2698_v62 = vrot.slane %v8413_v58, 1  ;;  %v8435_v58 = vld [vmem:[%s8712_s9 + $0x68] sm:$0xff]  }
  0x87   : > { %7916 = vmatprep.mubr.msk.bf16.mxu1 %vm307_vm1, %v2094_v18  ;;  %v2129_v12 = vor.u32 %v2127_v1, %v2125_v55  ;;  %v2448_v18 = vshll.u32 %v8399_v11, 16  ;;  %v2692_v52 = vrot.slane %v8407_v44, 1  ;;  %v8410_v55 = vld [vmem:[%s8712_s9 + $0x28] sm:$0xff]   ;;  %v8414_v1 = vld [vmem:[%s8712_s9 + $0x38] sm:$0xff]   ;;  %v8416_v11 = vld [vmem:[%s8712_s9 + $0x40] sm:$0xff]  }
  0x88   : > { %v2137_v14 = vor.u32 %v2135_v5, %v2133_v8  ;;  %v2145_v28 = vor.u32 %v2143_v21, %v2141_v15  ;;  %v2699_v6 = vsel %vm1374_vm3, %v2696_v59, %v2698_v62  ;;  %v8431_v44 = vld [vmem:[%s8712_s9 + $0x40] sm:$0xff]  }
  0x89   : > { %v2134_v19 = vsel %vm771_vm2, %v2129_v12, %v2133_v8  ;;  %v2693_v56 = vsel %vm1374_vm3, %v2690_v39, %v2692_v52  ;;  %v2695_v45 = vsel %vm1374_vm3, %v2692_v52, %v2694_v54  ;;  %v8423_v12 = vld [vmem:[%s8712_s9 + $0x20] sm:$0xff]   ;;  %v3445_v52 = vshrl.u32 %v8429_v37, 16 }
  0x8a   : > { %v2142_v24 = vsel %vm771_vm2, %v2137_v14, %v2141_v15  ;;  %v2150_v34 = vsel %vm771_vm2, %v2145_v28, %v2149_v29  ;;  %v3409_v14 = vshll.u32 %v8421_v7, 16  ;;  %v3453_v61 = vshrl.u32 %v8431_v44, 16 }
  0x8c   : > { %v3411_v22 = vrot.slane %v3409_v14, 1  ;;  %v3996_v14 = vrot.slane %v8437_v4, 1 }
  0x8d   : > { %7935 = vmatmul.mubr.msk.bf16.vlgmr.msra.gmra.mxu0 %vm307_vm1, %v2403_v38  ;;  %v2688_v38 = vrot.slane %v8403_v35, 1 }
  0x8e   : > { %7917 = vmatmul.mubr.msk.bf16.vlgmr.msra.gmra.mxu1 %vm307_vm1, %v2102_v42  ;;  %7969 = vmatpush3.bf16.msra.mxu0 %v2956_v27  ;;  %v2450_v27 = vrot.slane %v2448_v18, 1  ;;  %v3413_v18 = vshrl.u32 %v8421_v7, 16 }
  0x8f   : > { %7951 = vmatpush3.bf16.msra.mxu1 %v2727_v26  ;;  %7920 = vmatprep.mubr.msk.bf16.mxu1 %vm307_vm1, %v2110_v47  ;;  %v2446_v26 = vor.u32 %v2444_v17, %v2442_v10  ;;  %v2689_v42 = vsel %vm1374_vm3, %v2686_v31, %v2688_v38  ;;  %v2691_v47 = vsel %vm1374_vm3, %v2688_v38, %v2690_v39  ;;  %v3421_v31 = vshrl.u32 %v8423_v12, 16  ;;  %v9069_v38 = vld [vmem:[%s10136_s1 + $0x3c] sm:$0xf] }
  0x90   : > { %7938 = vmatprep.mubr.msk.bf16.mxu0 %vm307_vm1, %v2411_v50  ;;  %8252 = vmatprep.subr.msk.bf16.mxu1 %vm332_vm0, %v8953_v51  ;;  %v9013_v50 = vld [vmem:[%s10136_s1 + $0x34] sm:$0xf]  ;;  %v3935_v51 = vld [vmem:[%s10136_s1 + $0x38] sm:$0xf] }
  0x91   : > { %8253 = vmatprep.subr.msk.bf16.mxu0 %vm332_vm0, %v8959_v53  ;;  %v2451_v32 = vsel %vm771_vm2, %v2446_v26, %v2450_v27  ;;  %v8408_v53 = vld [vmem:[%s8712_s9 + $0x20] sm:$0xff]   ;;  %v8420_v27 = vld [vmem:[%s8712_s9 + $0x68] sm:$0xff]   ;;  %v4037_v29 = vsel %vm332_vm0, %v3935_v51, 0 }
  0x95   : > { %7939 = vmatmul.mubr.msk.bf16.gmra.mxu0 %vm307_vm1, %v2419_v60  ;;  %v8419_v60 = vld [vmem:[%s8712_s9 + $0x10] sm:$0xff]  }
  0x96   : > { %7921 = vmatmul.mubr.msk.bf16.gmra.mxu1 %vm307_vm1, %v2118_v63  ;;  %7942 = vmatprep.mubr.msk.bf16.mxu0 %vm307_vm1, %v2427_v0  ;;  %v8412_v63 = vld [vmem:[%s8712_s9 + $0x30] sm:$0xff]   ;;  %v3401_v5 = vshll.u32 %v8419_v60, 16  ;;  %v3405_v13 = vshrl.u32 %v8419_v60, 16  ;;  %v8428_v60 = vld [vmem:[%s8712_s9 + $0x88] sm:$0xff]  }
  0x97   : > { %7924 = vmatprep.mubr.msk.bf16.mxu1 %vm307_vm1, %v2126_v3  ;;  %v8415_v0 = vld [vmem:[%s8712_s9 + $0xf0] ss:$0 sps:$4 sm:$0x11]   ;;  %v2697_v3 = vsel %vm1374_vm3, %v2694_v54, %v2696_v59  ;;  %v8434_v54 = vld [vmem:[%s8712_s9 + $0x60] sm:$0xff]  }
  0x98   : > { %v2700_v8 = vrot.slane %v8415_v0, 1  ;;  %v3403_v10 = vrot.slane %v3401_v5, 1  ;;  %v3697_v59 = vshll.u32 %v8434_v54, 16  ;;  %v8436_v0 = vld [vmem:[%s8712_s9 + $0x8] sm:$0xfe]  }
  0x9a   : > { %v2701_v15 = vsel %vm1374_vm3, %v2698_v62, %v2700_v8  ;;  %v3404_v17 = vsel %vm771_vm2, %v3399_v9, %v3403_v10  ;;  %v3407_v21 = vor.u32 %v3405_v13, %v3403_v10  ;;  %v3457_v62 = vshll.u32 %v8433_v40, 16 }
  0x9b   : > { %v3699_v5 = vrot.slane %v3697_v59, 1 }
  0x9c   : > { %v3412_v28 = vsel %vm771_vm2, %v3407_v21, %v3411_v22  ;;  %v3459_v8 = vrot.slane %v3457_v62, 1  ;;  %v8439_v21 = vld [vmem:[%s8712_s9 + $0x18] sm:$0xff]  }
  0x9d   : > { %7943 = vmatmul.mubr.msk.bf16.gmra.mxu0 %vm307_vm1, %v2435_v16  ;;  %v8417_v16 = vld [vmem:[%s8712_s9 + $0x60] sm:$0xff]  }
  0x9e   : > { %7925 = vmatmul.mubr.msk.bf16.gmra.mxu1 %vm307_vm1, %v2134_v19  ;;  %7946 = vmatprep.mubr.msk.bf16.mxu0 %vm307_vm1, %v2443_v20  ;;  %v3417_v19 = vshll.u32 %v8423_v12, 16  ;;  %v8425_v20 = vld [vmem:[%s8712_s9 + $0x28] sm:$0xff]   ;;  %v8438_v12 = vld [vmem:[%s8712_s9 + $0x70] sm:$0xff]  }
  0x9f   : > { %7928 = vmatprep.mubr.msk.bf16.mxu1 %vm307_vm1, %v2142_v24  ;;  %v3415_v24 = vor.u32 %v3413_v18, %v3411_v22  ;;  %v3425_v26 = vshll.u32 %v8425_v20, 16 }
  0xa0   : > { %v3419_v25 = vrot.slane %v3417_v19, 1 }
  0xa2   : > { %v3420_v35 = vsel %vm771_vm2, %v3415_v24, %v3419_v25  ;;  %v3423_v39 = vor.u32 %v3421_v31, %v3419_v25  ;;  %v3710_v24 = vshll.u32 %v8438_v12, 16  ;;  %v9125_v25 = vld [vmem:[%s8712_s9 + $0x20] sm:$0xff]  }
  0xa5   : > { %7947 = vmatmul.mubr.msk.bf16.gmra.mxu0 %vm307_vm1, %v2451_v32  ;;  %v3429_v32 = vshrl.u32 %v8425_v20, 16 }
  0xa6   : > { %7929 = vmatmul.mubr.msk.bf16.gmra.mxu1 %vm307_vm1, %v2150_v34  ;;  %7970 = vmatprep.mubr.msk.bf16.mxu0 %vm307_vm1, %v8402_v33  ;;  %v3433_v33 = vshll.u32 %v8427_v23, 16  ;;  %v3787_v34 = vsel %vm332_vm0, %v9013_v50, 0 }
  0xa7   : > { %7952 = vmatprep.mubr.msk.bf16.mxu1 %vm307_vm1, %v2687_v36  ;;  %v3427_v36 = vrot.slane %v3425_v26, 1 }
  0xad   : > { %7971 = vmatmul.mubr.msk.bf16.vlgmr.msra.gmra.mxu0 %vm307_vm1, %v8404_v41  ;;  %v9075_v41 = vld [vmem:[%s10136_s1 + $0x40] sm:$0xf] }
  0xae   : > { %7953 = vmatmul.mubr.msk.bf16.vlgmr.msra.gmra.mxu1 %vm307_vm1, %v2689_v42  ;;  %8005 = vmatpush3.bf16.msra.mxu0 %v3486_v43  ;;  %v3431_v42 = vor.u32 %v3429_v32, %v3427_v36  ;;  %v3435_v43 = vrot.slane %v3433_v33, 1  ;;  %v3714_v32 = vshrl.u32 %v8438_v12, 16  ;;  %v8442_v33 = vld [vmem:[%s8712_s9 + $0x80] sm:$0xff]  }
  0xaf   : > { %7987 = vmatpush3.bf16.msra.mxu1 %v3185_v46  ;;  %7956 = vmatprep.mubr.msk.bf16.mxu1 %vm307_vm1, %v2691_v47  ;;  %v3441_v46 = vshll.u32 %v8429_v37, 16  ;;  %v8424_v47 = vld [vmem:[%s8712_s9 + $0x78] sm:$0xff]   ;;  %v3998_v37 = vrot.slane %v8439_v21, 1 }
  0xb0   : > { %7974 = vmatprep.mubr.msk.bf16.mxu0 %vm307_vm1, %v8406_v48  ;;  %8254 = vmatprep.subr.msk.bf16.mxu1 %vm332_vm0, %v9013_v50  ;;  %v3428_v48 = vsel %vm771_vm2, %v3423_v39, %v3427_v36  ;;  %v3437_v50 = vshrl.u32 %v8427_v23, 16  ;;  %v3712_v36 = vrot.slane %v3710_v24, 1  ;;  %v4000_v39 = vrot.slane %v9125_v25, 1 }
  0xb1   : > { %8255 = vmatprep.subr.msk.bf16.mxu0 %vm332_vm0, %v3935_v51  ;;  %v3436_v51 = vsel %vm771_vm2, %v3431_v42, %v3435_v43 }
  0xb5   : > { %7975 = vmatmul.mubr.msk.bf16.gmra.mxu0 %vm307_vm1, %v8408_v53  ;;  %v3449_v53 = vshll.u32 %v8431_v44, 16 }
  0xb6   : > { %7957 = vmatmul.mubr.msk.bf16.gmra.mxu1 %vm307_vm1, %v2693_v56  ;;  %7978 = vmatprep.mubr.msk.bf16.mxu0 %vm307_vm1, %v8410_v55  ;;  %v3443_v55 = vrot.slane %v3441_v46, 1  ;;  %v3439_v56 = vor.u32 %v3437_v50, %v3435_v43  ;;  %v8443_v46 = vld [vmem:[%s8712_s9 + $0x28] sm:$0xff]  }
  0xb7   : > { %7960 = vmatprep.mubr.msk.bf16.mxu1 %vm307_vm1, %v2695_v45  ;;  %v3451_v45 = vrot.slane %v3449_v53, 1  ;;  %v9150_v50 = vld [vmem:[%s8712_s9 + $0x88] sm:$0xff]   ;;  %v3999_v53 = vsel %vm1374_vm3, %v3996_v14, %v3998_v37  ;;  %v4002_v62 = vrot.slane %v8443_v46, 1 }
  0xb8   : > { %v3447_v57 = vor.u32 %v3445_v52, %v3443_v55  ;;  %v3738_v24 = vshrl.u32 %v9150_v50, 16 }
  0xb9   : > { %v3455_v10 = vor.u32 %v3453_v61, %v3451_v45 }
  0xba   : > { %v3452_v2 = vsel %vm771_vm2, %v3447_v57, %v3451_v45  ;;  %v3730_v45 = vshrl.u32 %v8442_v33, 16 }
  0xbb   : > { %v3460_v23 = vsel %vm771_vm2, %v3455_v10, %v3459_v8 }
  0xbd   : > { %7979 = vmatmul.mubr.msk.bf16.gmra.mxu0 %vm307_vm1, %v8412_v63  ;;  %v3444_v63 = vsel %vm771_vm2, %v3439_v56, %v3443_v55  ;;  %v4495_v55 = vsel %vm332_vm0, %v9075_v41, 0 }
  0xbe   : > { %7961 = vmatmul.mubr.msk.bf16.gmra.mxu1 %vm307_vm1, %v2697_v3  ;;  %7982 = vmatprep.mubr.msk.bf16.mxu0 %vm307_vm1, %v8414_v1  ;;  %v8430_v1 = vld [vmem:[%s8712_s9 + $0x90] sm:$0xff]   ;;  %v3695_v3 = vshrl.u32 %v8434_v54, 16  ;;  %v4266_v54 = vsel %vm332_vm0, %v9069_v38, 0 }
  0xbf   : > { %7964 = vmatprep.mubr.msk.bf16.mxu1 %vm307_vm1, %v2699_v6  ;;  %v3702_v6 = vshll.u32 %v8435_v58, 16 }
  0xc0   : > { %v3700_v18 = vor.u32 %v3699_v5, %v3695_v3  ;;  %v9184_v3 = vld [vmem:[%s10136_s1 + $0x48] sm:$0xf] }
  0xc1   : > { %v3704_v19 = vrot.slane %v3702_v6, 1 }
  0xc3   : > { %v3705_v31 = vsel %vm771_vm2, %v3700_v18, %v3704_v19 }
  0xc5   : > { %7983 = vmatmul.mubr.msk.bf16.gmra.mxu0 %vm307_vm1, %v8416_v11  ;;  %v3995_v11 = vrot.slane %v8436_v0, 1 }
  0xc6   : > { %7965 = vmatmul.mubr.msk.bf16.gmra.mxu1 %vm307_vm1, %v2701_v15  ;;  %8006 = vmatprep.mubr.msk.bf16.mxu0 %vm307_vm1, %v3404_v17  ;;  %v9113_v15 = vld [vmem:[%s8712_s9 + $0x78] sm:$0xff]  }
  0xc7   : > { %7988 = vmatprep.mubr.msk.bf16.mxu1 %vm307_vm1, %v8417_v16  ;;  %v8432_v17 = vld [vmem:[%s8712_s9 + $0x98] sm:$0xff]   ;;  %v3722_v40 = vshrl.u32 %v9113_v15, 16 }
  0xcd   : > { %8007 = vmatmul.mubr.msk.bf16.vlgmr.msra.gmra.mxu0 %vm307_vm1, %v3412_v28  ;;  %v3997_v28 = vsel %vm1374_vm3, %v3995_v11, %v3996_v14  ;;  %v9191_v14 = vld [vmem:[%s8712_s9 + $0x98] sm:$0xff]  }
  0xce   : > { %7989 = vmatmul.mubr.msk.bf16.vlgmr.msra.gmra.mxu1 %vm307_vm1, %v8420_v27  ;;  %8041 = vmatpush3.bf16.msra.mxu0 %v4037_v29  ;;  %v3706_v27 = vshrl.u32 %v8435_v58, 16  ;;  %v3718_v29 = vshll.u32 %v9113_v15, 16  ;;  %v9166_v58 = vld [vmem:[%s8712_s9 + $0x30] sm:$0xff]  }
  0xcf   : > { %8023 = vmatpush3.bf16.msra.mxu1 %v3787_v34  ;;  %7992 = vmatprep.mubr.msk.bf16.mxu1 %vm307_vm1, %v8422_v30  ;;  %v4004_v8 = vrot.slane %v9166_v58, 1 }
  0xd0   : > { %8010 = vmatprep.mubr.msk.bf16.mxu0 %vm307_vm1, %v3420_v35  ;;  %8256 = vmatprep.subr.msk.bf16.mxu1 %vm332_vm0, %v9069_v38  ;;  %v3708_v43 = vor.u32 %v3706_v27, %v3704_v19  ;;  %v3720_v44 = vrot.slane %v3718_v29, 1  ;;  %v3734_v38 = vshll.u32 %v9150_v50, 16  ;;  %v8447_v19 = vld [vmem:[%s8712_s9 + $0x38] sm:$0xff]  }
  0xd1   : > { %8257 = vmatprep.subr.msk.bf16.mxu0 %vm332_vm0, %v9075_v41  ;;  %v4001_v41 = vsel %vm1374_vm3, %v3998_v37, %v4000_v39  ;;  %v3750_v37 = vshll.u32 %v9191_v14, 16  ;;  %v4006_v46 = vrot.slane %v8447_v19, 1 }
  0xd2   : > { %v3713_v57 = vsel %vm771_vm2, %v3708_v43, %v3712_v36  ;;  %v3724_v6 = vor.u32 %v3722_v40, %v3720_v44  ;;  %v3736_v12 = vrot.slane %v3734_v38, 1  ;;  %v8451_v40 = vld [vmem:[%s8712_s9 + $0x48] ss:$0 sps:$4 sm:$0x11]  }
  0xd3   : > { %v3752_v58 = vrot.slane %v3750_v37, 1 }
  0xd4   : > { %v3740_v50 = vor.u32 %v3738_v24, %v3736_v12 }
  0xd5   : > { %8011 = vmatmul.mubr.msk.bf16.gmra.mxu0 %vm307_vm1, %v3428_v48  ;;  %v3716_v48 = vor.u32 %v3714_v32, %v3712_v36 }
  0xd6   : > { %7993 = vmatmul.mubr.msk.bf16.gmra.mxu1 %vm307_vm1, %v8424_v47  ;;  %8014 = vmatprep.mubr.msk.bf16.mxu0 %vm307_vm1, %v3436_v51 }
  0xd7   : > { %7996 = vmatprep.mubr.msk.bf16.mxu1 %vm307_vm1, %v8426_v49  ;;  %v3726_v49 = vshll.u32 %v8442_v33, 16 }
  0xd9   : > { %v3728_v61 = vrot.slane %v3726_v49, 1 }
  0xdb   : > { %v3732_v11 = vor.u32 %v3730_v45, %v3728_v61  ;;  %v3729_v29 = vsel %vm771_vm2, %v3724_v6, %v3728_v61 }
  0xdd   : > { %v9101_v7 = vpop.f32.mrf.mxu0  ;;  %8015 = vmatmul.mubr.msk.bf16.gmra.mxu0 %vm307_vm1, %v3444_v63  ;;  %v8446_v63 = vld [vmem:[%s8712_s9 + $0x90] sm:$0xff]   ;;  %v3737_v33 = vsel %vm771_vm2, %v3732_v11, %v3736_v12 }
  0xde   : > { %v9104_v9 = vpop.f32.mrf.mxu1  ;;  %7997 = vmatmul.mubr.msk.bf16.gmra.mxu1 %vm307_vm1, %v8428_v60  ;;  %8018 = vmatprep.mubr.msk.bf16.mxu0 %vm307_vm1, %v3452_v2  ;;  %v3721_v60 = vsel %vm771_vm2, %v3716_v48, %v3720_v44  ;;  %v3742_v18 = vshll.u32 %v8446_v63, 16  ;;  %v3746_v36 = vshrl.u32 %v8446_v63, 16  ;;  %v8450_v48 = vld [vmem:[%s8712_s9 + $0xa0] ss:$0 sps:$4 sm:$0x11]  }
  0xdf   : > { %v9109_v13 = vpop.f32.mrf.mxu0  ;;  %8000 = vmatprep.mubr.msk.bf16.mxu1 %vm307_vm1, %v8430_v1  ;;  %v9178_v1 = vld [vmem:[%s10136_s1 + $0x44] sm:$0xf]  ;;  %v3758_v6 = vshll.u32 %v8450_v48, 16 }
  0xe0   : > { %v9115_v16 = vpop.f32.mrf.mxu1 }
  0xe1   : > { %v9118_v20 = vpop.f32.mrf.mxu0 }
  0xe2   : > { %v9121_v22 = vpop.f32.mrf.mxu1 }
  0xe3   : > { %v9127_v26 = vpop.f32.mrf.mxu0 }
  0xe4   : > { %v9131_v30 = vpop.f32.mrf.mxu1 }
  0xe5   : > { %v9135_v34 = vpop.f32.mrf.mxu0  ;;  %8019 = vmatmul.mubr.msk.bf16.gmra.mxu0 %vm307_vm1, %v3460_v23  ;;  %v4003_v23 = vsel %vm1374_vm3, %v4000_v39, %v4002_v62 }
  0xe6   : > { %v9138_v35 = vpop.f32.mrf.mxu1  ;;  %8001 = vmatmul.mubr.msk.bf16.gmra.mxu1 %vm307_vm1, %v8432_v17  ;;  %8042 = vmatprep.mubr.msk.bf16.mxu0 %vm307_vm1, %v3997_v28 }
  0xe7   : > { %v9143_v42 = vpop.f32.mrf.mxu0  ;;  %8024 = vmatprep.mubr.msk.bf16.mxu1 %vm307_vm1, %v3705_v31  ;;  %v8449_v31 = vld [vmem:[%s8712_s9 + $0x40] sm:$0xff]  }
  0xe8   : > { %v9147_v47 = vpop.f32.mrf.mxu1 }
  0xe9   : > { %v9152_v51 = vpop.f32.mrf.mxu0 }
  0xea   : > { %v9154_v52 = vpop.f32.mrf.mxu1 }
  0xeb   : > { %v9162_v56 = vpop.f32.mrf.mxu0 }
  0xec   : > { %v9168_v59 = vpop.f32.mrf.mxu1 }
  0xed   : > { %v7828_v0 = vpop.f32.mrf.mxu0  ;;  %8043 = vmatmul.mubr.msk.bf16.vlgmr.msra.gmra.mxu0 %vm307_vm1, %v3999_v53 }
  0xee   : > { %v7810_v2 = vpop.f32.mrf.mxu1  ;;  %8025 = vmatmul.mubr.msk.bf16.vlgmr.msra.gmra.mxu1 %vm307_vm1, %v3713_v57  ;;  %8077 = vmatpush3.bf16.msra.mxu0 %v4495_v55 }
  0xef   : > { %v664_v4 = vadd.f32 %v7810_v2, %v9101_v7  ;;  %8059 = vmatpush3.bf16.msra.mxu1 %v4266_v54  ;;  %v901_v5 = vpop.f32.mrf.mxu0  ;;  %8028 = vmatprep.mubr.msk.bf16.mxu1 %vm307_vm1, %v3721_v60 }
  0xf0   : > { %v599_v10 = vpop.f32.mrf.mxu1  ;;  %8046 = vmatprep.mubr.msk.bf16.mxu0 %vm307_vm1, %v4001_v41  ;;  %8258 = vmatprep.subr.msk.bf16.mxu1 %vm332_vm0, %v9178_v1 }
  0xf1   : > { %v9195_v7 = vadd.f32 %v7828_v0, %v664_v4  ;;  %v662_v15 = vadd.f32 %v599_v10, %v9109_v13  ;;  %v7829_v17 = vpop.f32.mrf.mxu0  ;;  %8259 = vmatprep.subr.msk.bf16.mxu0 %vm332_vm0, %v9184_v3  ;;  %v4005_v13 = vsel %vm1374_vm3, %v4002_v62, %v4004_v8  ;;  %v4007_v0 = vsel %vm1374_vm3, %v4004_v8, %v4006_v46 }
  0xf2   : > { %v7811_v21 = vpop.f32.mrf.mxu1  ;;  %v4010_v8 = vrot.slane %v8451_v40, 1  ;;  %v8454_v40 = vld [vmem:[%s8712_s9 + $0xc0] sm:$0xff]  }
  0xf3   : > { %v9203_v25 = vadd.f32 %v901_v5, %v662_v15  ;;  %v665_v27 = vadd.f32 %v7811_v21, %v9118_v20  ;;  %v904_v28 = vpop.f32.mrf.mxu0  ;;  %v3744_v20 = vrot.slane %v3742_v18, 1 }
  0xf4   : > { %v602_v32 = vpop.f32.mrf.mxu1 }
  0xf5   : > { %v9211_v39 = vadd.f32 %v7829_v17, %v665_v27  ;;  %v663_v43 = vadd.f32 %v602_v32, %v9127_v26  ;;  %v7832_v44 = vpop.f32.mrf.mxu0  ;;  %8047 = vmatmul.mubr.msk.bf16.gmra.mxu0 %vm307_vm1, %v4003_v23  ;;  %v4008_v26 = vrot.slane %v8449_v31, 1  ;;  %v3748_v45 = vor.u32 %v3746_v36, %v3744_v20  ;;  %v8452_v36 = vld [vmem:[%s8712_s9 + $0xb8] sm:$0xff]  }
  0xf6   : > { %v7814_v49 = vpop.f32.mrf.mxu1  ;;  %8029 = vmatmul.mubr.msk.bf16.gmra.mxu1 %vm307_vm1, %v3729_v29  ;;  %8050 = vmatprep.mubr.msk.bf16.mxu0 %vm307_vm1, %v4005_v13  ;;  %v3745_v63 = vsel %vm771_vm2, %v3740_v50, %v3744_v20  ;;  %v8453_v13 = vld [vmem:[%s8712_s9 + $0x110] sm:$0xff]  }
  0xf7   : > { %v9218_v53 = vadd.f32 %v904_v28, %v663_v43  ;;  %v668_v54 = vadd.f32 %v7814_v49, %v9135_v34  ;;  %v917_v55 = vpop.f32.mrf.mxu0  ;;  %8032 = vmatprep.mubr.msk.bf16.mxu1 %vm307_vm1, %v3737_v33  ;;  %v3754_v34 = vshrl.u32 %v9191_v14, 16  ;;  %v4009_v5 = vsel %vm1374_vm3, %v4006_v46, %v4008_v26 }
  0xf8   : > { %v615_v57 = vpop.f32.mrf.mxu1  ;;  %v3753_v11 = vsel %vm771_vm2, %v3748_v45, %v3752_v58  ;;  %v4011_v29 = vsel %vm1374_vm3, %v4008_v26, %v4010_v8  ;;  %v8461_v8 = vld [vmem:[%s8712_s9 + $0x130] sm:$0xff]  }
  0xf9   : > { %v9223_v60 = vadd.f32 %v7832_v44, %v668_v54  ;;  %v666_v61 = vadd.f32 %v615_v57, %v9143_v42  ;;  %v7833_v62 = vpop.f32.mrf.mxu0  ;;  %v3756_v19 = vor.u32 %v3754_v34, %v3752_v58 }
  0xfa   : > { %v7815_v38 = vpop.f32.mrf.mxu1 }
  0xfb   : > { %v9229_v41 = vadd.f32 %v917_v55, %v666_v61  ;;  %v669_v2 = vadd.f32 %v7815_v38, %v9152_v51  ;;  %v920_v4 = vpop.f32.mrf.mxu0  ;;  %v8455_v55 = vld [vmem:[%s8712_s9 + $0x118] sm:$0xff]   ;;  %v8456_v61 = vld [vmem:[%s8712_s9 + $0xc8] sm:$0xff]   ;;  %v4796_v38 = vsel %vm332_vm0, %v9178_v1, 0  ;;  %v9291_v1 = vld [vmem:[%s10136_s1 + $0x50] sm:$0xf] }
  0xfc   : > { %v618_v10 = vpop.f32.mrf.mxu1 }
  0xfd   : > { %v9234_v42 = vadd.f32 %v7833_v62, %v669_v2  ;;  %v667_v12 = vadd.f32 %v618_v10, %v9162_v56  ;;  %v7836_v15 = vpop.f32.mrf.mxu0  ;;  %8051 = vmatmul.mubr.msk.bf16.gmra.mxu0 %vm307_vm1, %v4007_v0  ;;  %v3760_v56 = vrot.slane %v3758_v6, 1 }
  0xfe   : > { %v7818_v14 = vpop.f32.mrf.mxu1  ;;  %8033 = vmatmul.mubr.msk.bf16.gmra.mxu1 %vm307_vm1, %v3745_v63  ;;  %8054 = vmatprep.mubr.msk.bf16.mxu0 %vm307_vm1, %v4009_v5  ;;  %v8457_v63 = vld [vmem:[%s8712_s9 + $0x120] sm:$0xff]  }
  0xff   : > { %v9240_v51 = vadd.f32 %v920_v4, %v667_v12  ;;  %v672_v17 = vadd.f32 %v7818_v14, %v9104_v9  ;;  %v933_v18 = vpop.f32.mrf.mxu0  ;;  %8036 = vmatprep.mubr.msk.bf16.mxu1 %vm307_vm1, %v3753_v11  ;;  %v3761_v33 = vsel %vm771_vm2, %v3756_v19, %v3760_v56  ;;  %v8459_v12 = vld [vmem:[%s8712_s9 + $0x128] sm:$0xff]   ;;  %v8460_v19 = vld [vmem:[%s8712_s9 + $0xd8] sm:$0xff]   ;;  %v8470_v56 = vld [vmem:[%s8712_s9 + $0x110] sm:$0xff]  }
 0x100   : > { %v631_v21 = vpop.f32.mrf.mxu1 }
 0x101   : > { %v9244_v23 = vadd.f32 %v7836_v15, %v672_v17  ;;  %v670_v24 = vadd.f32 %v631_v21, %v9115_v16  ;;  %v7837_v27 = vpop.f32.mrf.mxu0  ;;  %v8458_v15 = vld [vmem:[%s8712_s9 + $0xd0] sm:$0xff]  }
 0x102   : > { %v7819_v28 = vpop.f32.mrf.mxu1 }
 0x103   : > { %v9249_v31 = vadd.f32 %v933_v18, %v670_v24  ;;  %v673_v9 = vadd.f32 %v7819_v28, %v9121_v22  ;;  %v936_v32 = vpop.f32.mrf.mxu0  ;;  %v8468_v24 = vld [vmem:[%s8712_s9 + $0xb8] sm:$0xff]  }
 0x104   : > { %v634_v37 = vpop.f32.mrf.mxu1 }
 0x105   : > { %v9254_v43 = vadd.f32 %v7837_v27, %v673_v9  ;;  %v671_v44 = vadd.f32 %v634_v37, %v9131_v30  ;;  %v7840_v16 = vpop.f32.mrf.mxu0  ;;  %8055 = vmatmul.mubr.msk.bf16.gmra.mxu0 %vm307_vm1, %v4011_v29  ;;  %v4706_v37 = vshll.u32 %v8468_v24, 16 }
 0x106   : > { %v7822_v20 = vpop.f32.mrf.mxu1  ;;  %8037 = vmatmul.mubr.msk.bf16.gmra.mxu1 %vm307_vm1, %v3761_v33  ;;  %8078 = vmatprep.mubr.msk.bf16.mxu0 %vm307_vm1, %v8453_v13 }
 0x107   : > { %v9260_v22 = vadd.f32 %v936_v32, %v671_v44  ;;  %v676_v46 = vadd.f32 %v7822_v20, %v9138_v35  ;;  %v949_v48 = vpop.f32.mrf.mxu0  ;;  %8060 = vmatprep.mubr.msk.bf16.mxu1 %vm307_vm1, %v8452_v36  ;;  %v5097_v35 = vsel %vm332_vm0, %v9184_v3, 0  ;;  %v9325_v32 = vld [vmem:[%s8712_s9 + $0x118] sm:$0xff]   ;;  %v8469_v36 = vld [vmem:[%s8712_s9 + $0xc0] sm:$0xff]  }
 0x108   : > { %v647_v49 = vpop.f32.mrf.mxu1 }
 0x109   : > { %v9264_v30 = vadd.f32 %v7840_v16, %v676_v46  ;;  %v674_v50 = vadd.f32 %v647_v49, %v9147_v47  ;;  %v7841_v54 = vpop.f32.mrf.mxu0  ;;  %v8463_v46 = vld [vmem:[%s8712_s9 + $0x138] sm:$0xff]   ;;  %v8462_v49 = vld [vmem:[%s8712_s9 + $0xe0] sm:$0xff]  }
 0x10a   : > { %v7823_v26 = vpop.f32.mrf.mxu1 }
 0x10b   : > { %v9269_v57 = vadd.f32 %v949_v48, %v674_v50  ;;  %v677_v45 = vadd.f32 %v7823_v26, %v9154_v52  ;;  %v952_v58 = vpop.f32.mrf.mxu0  ;;  %v9285_v52 = vld [vmem:[%s10136_s1 + $0x4c] sm:$0xf]  ;;  %v5005_v50 = vshrl.u32 %v8470_v56, 16 }
 0x10c   : > { %v650_v62 = vpop.f32.mrf.mxu1 }
 0x10d   : > { %v9278_v0 = vadd.f32 %v7841_v54, %v677_v45  ;;  %v675_v47 = vadd.f32 %v650_v62, %v9168_v59  ;;  %v7864_v34 = vpop.f32.mrf.mxu0  ;;  %8079 = vmatmul.mubr.msk.bf16.vlgmr.msra.gmra.mxu0 %vm307_vm1, %v8455_v55  ;;  %v4711_v62 = vshll.u32 %v8469_v36, 16 }
 0x10e   : > { %v7846_v3 = vpop.f32.mrf.mxu1  ;;  %8061 = vmatmul.mubr.msk.bf16.vlgmr.msra.gmra.mxu1 %vm307_vm1, %v8454_v40  ;;  %8113 = vmatpush3.bf16.msra.mxu0 %v5097_v35  ;;  %v8464_v40 = vld [vmem:[%s8712_s9 + $0xe8] sm:$0xff]  }
 0x10f   : > { %v9293_v59 = vadd.f32 %v952_v58, %v675_v47  ;;  %v1267_v2 = vadd.f32 %v7846_v3, %v9195_v7  ;;  %8095 = vmatpush3.bf16.msra.mxu1 %v4796_v38  ;;  %v1453_v4 = vpop.f32.mrf.mxu0  ;;  %8064 = vmatprep.mubr.msk.bf16.mxu1 %vm307_vm1, %v8456_v61  ;;  %v5012_v58 = vshll.u32 %v9325_v32, 16  ;;  %v4704_v61 = vshrl.u32 %v8468_v24, 16  ;;  %v8472_v38 = vld [vmem:[%s8712_s9 + $0xc8] sm:$0xff]   ;;  %v9347_v3 = vld [vmem:[%s8712_s9 + $0x120] sm:$0xff]  }
 0x110   : > { %v1202_v5 = vpop.f32.mrf.mxu1  ;;  %8082 = vmatprep.mubr.msk.bf16.mxu0 %vm307_vm1, %v8457_v63  ;;  %8260 = vmatprep.subr.msk.bf16.mxu1 %vm332_vm0, %v9285_v52 }
 0x111   : > { %v9300_v6 = vadd.f32 %v7864_v34, %v1267_v2  ;;  %v1265_v10 = vadd.f32 %v1202_v5, %v9203_v25  ;;  %v7865_v11 = vpop.f32.mrf.mxu0  ;;  %8261 = vmatprep.subr.msk.bf16.mxu0 %vm332_vm0, %v9291_v1 }
 0x112   : > { %v7847_v7 = vpop.f32.mrf.mxu1 }
 0x113   : > { %v9308_v14 = vadd.f32 %v1453_v4, %v1265_v10  ;;  %v1268_v17 = vadd.f32 %v7847_v7, %v9211_v39  ;;  %v1456_v18 = vpop.f32.mrf.mxu0  ;;  %v5014_v10 = vrot.slane %v5012_v58, 1  ;;  %v5347_v58 = vsel %vm332_vm0, %v9285_v52, 0 }
 0x114   : > { %v1205_v21 = vpop.f32.mrf.mxu1 }
 0x115   : > { %v9314_v25 = vadd.f32 %v7865_v11, %v1268_v17  ;;  %v1266_v27 = vadd.f32 %v1205_v21, %v9218_v53  ;;  %v7868_v28 = vpop.f32.mrf.mxu0  ;;  %8083 = vmatmul.mubr.msk.bf16.gmra.mxu0 %vm307_vm1, %v8459_v12  ;;  %v5007_v53 = vshll.u32 %v8470_v56, 16  ;;  %v9354_v11 = vld [vmem:[%s8712_s9 + $0xd0] sm:$0xff]   ;;  %v4719_v17 = vshll.u32 %v8472_v38, 16  ;;  %v8467_v21 = vld [vmem:[%s8712_s9 + $0x148] sm:$0xff]  }
 0x116   : > { %v7850_v29 = vpop.f32.mrf.mxu1  ;;  %8065 = vmatmul.mubr.msk.bf16.gmra.mxu1 %vm307_vm1, %v8458_v15  ;;  %8086 = vmatprep.mubr.msk.bf16.mxu0 %vm307_vm1, %v8461_v8  ;;  %v4713_v15 = vrot.slane %v4711_v62, 1  ;;  %v4715_v8 = vshrl.u32 %v8469_v36, 16  ;;  %v4727_v36 = vshll.u32 %v9354_v11, 16 }
 0x117   : > { %v9320_v39 = vadd.f32 %v1456_v18, %v1266_v27  ;;  %v1271_v13 = vadd.f32 %v7850_v29, %v9223_v60  ;;  %v1469_v9 = vpop.f32.mrf.mxu0  ;;  %8068 = vmatprep.mubr.msk.bf16.mxu1 %vm307_vm1, %v8460_v19  ;;  %v8465_v60 = vld [vmem:[%s8712_s9 + $0x140] sm:$0xff]   ;;  %v5009_v45 = vrot.slane %v5007_v53, 1  ;;  %v8466_v27 = vld [vmem:[%s8712_s9 + $0xf0] sm:$0xff]   ;;  %v5020_v29 = vshll.u32 %v9347_v3, 16 }
 0x118   : > { %v1218_v33 = vpop.f32.mrf.mxu1 }
 0x119   : > { %v9328_v44 = vadd.f32 %v7868_v28, %v1271_v13  ;;  %v1269_v16 = vadd.f32 %v1218_v33, %v9229_v41  ;;  %v7869_v20 = vpop.f32.mrf.mxu0  ;;  %v4708_v41 = vrot.slane %v4706_v37, 1  ;;  %v5016_v28 = vshrl.u32 %v9325_v32, 16  ;;  %v8477_v32 = vld [vmem:[%s8712_s9 + $0x130] sm:$0xff]  }
 0x11a   : > { %v7851_v48 = vpop.f32.mrf.mxu1  ;;  %v4723_v13 = vshrl.u32 %v8472_v38, 16 }
 0x11b   : > { %v9334_v54 = vadd.f32 %v1469_v9, %v1269_v16  ;;  %v1272_v55 = vadd.f32 %v7851_v48, %v9234_v42  ;;  %v1472_v26 = vpop.f32.mrf.mxu0  ;;  %v4709_v7 = vor.u32 %v4708_v41, %v4704_v61  ;;  %v9373_v48 = vld [vmem:[%s8712_s9 + $0xd8] sm:$0xff]  }
 0x11c   : > { %v1221_v35 = vpop.f32.mrf.mxu1  ;;  %v4735_v52 = vshll.u32 %v9373_v48, 16 }
 0x11d   : > { %v9340_v63 = vadd.f32 %v7869_v20, %v1272_v55  ;;  %v1270_v47 = vadd.f32 %v1221_v35, %v9240_v51  ;;  %v7872_v34 = vpop.f32.mrf.mxu0  ;;  %8087 = vmatmul.mubr.msk.bf16.gmra.mxu0 %vm307_vm1, %v8463_v46  ;;  %v5010_v51 = vor.u32 %v5009_v45, %v5005_v50  ;;  %v4714_v16 = vsel %vm771_vm2, %v4709_v7, %v4713_v15  ;;  %v9388_v35 = vld [vmem:[%s8712_s9 + $0x138] sm:$0xff]  }
 0x11e   : > { %v7854_v42 = vpop.f32.mrf.mxu1  ;;  %8069 = vmatmul.mubr.msk.bf16.gmra.mxu1 %vm307_vm1, %v8462_v49  ;;  %8090 = vmatprep.mubr.msk.bf16.mxu0 %vm307_vm1, %v8465_v60  ;;  %v4717_v20 = vor.u32 %v4715_v8, %v4713_v15  ;;  %v4721_v46 = vrot.slane %v4719_v17, 1  ;;  %v5022_v45 = vrot.slane %v5020_v29, 1  ;;  %v5040_v17 = vshrl.u32 %v8477_v32, 16 }
 0x11f   : > { %v9349_v2 = vadd.f32 %v1472_v26, %v1270_v47  ;;  %v1275_v4 = vadd.f32 %v7854_v42, %v9244_v23  ;;  %v1485_v5 = vpop.f32.mrf.mxu0  ;;  %8072 = vmatprep.mubr.msk.bf16.mxu1 %vm307_vm1, %v8464_v40  ;;  %v9361_v23 = vld [vmem:[%s8712_s9 + $0x128] sm:$0xff]   ;;  %v5018_v40 = vor.u32 %v5016_v28, %v5014_v10  ;;  %v4729_v47 = vrot.slane %v4727_v36, 1  ;;  %v8481_v36 = vld [vmem:[%s8712_s9 + $0x140] sm:$0xff]  }
 0x120   : > { %v1234_v12 = vpop.f32.mrf.mxu1  ;;  %v5028_v55 = vshll.u32 %v9361_v23, 16  ;;  %v4725_v38 = vor.u32 %v4723_v13, %v4721_v46  ;;  %v4722_v42 = vsel %vm771_vm2, %v4717_v20, %v4721_v46  ;;  %v5032_v8 = vshrl.u32 %v9361_v23, 16 }
 0x121   : > { %v9356_v18 = vadd.f32 %v7872_v34, %v1275_v4  ;;  %v1273_v19 = vadd.f32 %v1234_v12, %v9249_v31  ;;  %v7873_v56 = vpop.f32.mrf.mxu0  ;;  %v5015_v31 = vsel %vm771_vm2, %v5010_v51, %v5014_v10  ;;  %v5036_v4 = vshll.u32 %v8477_v32, 16  ;;  %v9429_v32 = vld [vmem:[%s10136_s1 + $0x58] sm:$0xf] }
 0x122   : > { %v7855_v24 = vpop.f32.mrf.mxu1  ;;  %v5030_v12 = vrot.slane %v5028_v55, 1  ;;  %v5023_v15 = vsel %vm771_vm2, %v5018_v40, %v5022_v45  ;;  %v4737_v28 = vrot.slane %v4735_v52, 1  ;;  %v4739_v13 = vshrl.u32 %v9373_v48, 16  ;;  %v8480_v48 = vld [vmem:[%s8712_s9 + $0xe8] sm:$0xff]  }
 0x123   : > { %v9366_v9 = vadd.f32 %v1485_v5, %v1273_v19  ;;  %v1276_v53 = vadd.f32 %v7855_v24, %v9254_v43  ;;  %v1488_v33 = vpop.f32.mrf.mxu0  ;;  %v5024_v43 = vshrl.u32 %v9347_v3, 16  ;;  %v5576_v3 = vsel %vm332_vm0, %v9291_v1, 0  ;;  %v9399_v5 = vld [vmem:[%s8712_s9 + $0xe0] sm:$0xff]   ;;  %v9436_v55 = vld [vmem:[%s8712_s9 + $0x148] sm:$0xff]  }
 0x124   : > { %v1237_v37 = vpop.f32.mrf.mxu1  ;;  %v5044_v1 = vshll.u32 %v9388_v35, 16  ;;  %v4730_v24 = vsel %vm771_vm2, %v4725_v38, %v4729_v47  ;;  %v5038_v29 = vrot.slane %v5036_v4, 1  ;;  %v4743_v23 = vshll.u32 %v9399_v5, 16 }
 0x125   : > { %v9376_v49 = vadd.f32 %v7873_v56, %v1276_v53  ;;  %v1274_v60 = vadd.f32 %v1237_v37, %v9260_v22  ;;  %v7876_v50 = vpop.f32.mrf.mxu0  ;;  %8091 = vmatmul.mubr.msk.bf16.gmra.mxu0 %vm307_vm1, %v8467_v21  ;;  %v4731_v22 = vshrl.u32 %v9354_v11, 16  ;;  %v5026_v11 = vor.u32 %v5024_v43, %v5022_v45  ;;  %v9422_v37 = vld [vmem:[%s10136_s1 + $0x54] sm:$0xf] }
 0x126   : > { %v7858_v26 = vpop.f32.mrf.mxu1  ;;  %8073 = vmatmul.mubr.msk.bf16.gmra.mxu1 %vm307_vm1, %v8466_v27  ;;  %8114 = vmatprep.mubr.msk.bf16.mxu0 %vm307_vm1, %v5015_v31  ;;  %v5034_v20 = vor.u32 %v5032_v8, %v5030_v12  ;;  %v5042_v46 = vor.u32 %v5040_v17, %v5038_v29  ;;  %v4741_v45 = vor.u32 %v4739_v13, %v4737_v28  ;;  %v4747_v38 = vshrl.u32 %v9399_v5, 16 }
 0x127   : > { %v9390_v61 = vadd.f32 %v1488_v33, %v1274_v60  ;;  %v1279_v41 = vadd.f32 %v7858_v26, %v9264_v30  ;;  %v1501_v62 = vpop.f32.mrf.mxu0  ;;  %8096 = vmatprep.mubr.msk.bf16.mxu1 %vm307_vm1, %v4714_v16  ;;  %v5048_v52 = vshrl.u32 %v9388_v35, 16  ;;  %v4751_v4 = vshll.u32 %v8480_v48, 16 }
 0x128   : > { %v1250_v34 = vpop.f32.mrf.mxu1  ;;  %v5060_v5 = vshll.u32 %v9436_v55, 16 }
 0x129   : > { %v9401_v51 = vadd.f32 %v7876_v50, %v1279_v41  ;;  %v1277_v30 = vadd.f32 %v1250_v34, %v9269_v57  ;;  %v7877_v10 = vpop.f32.mrf.mxu0  ;;  %v4733_v57 = vor.u32 %v4731_v22, %v4729_v47  ;;  %v4745_v22 = vrot.slane %v4743_v23, 1  ;;  %v9441_v41 = vld [vmem:[%s8712_s9 + $0xf0] sm:$0xff]  }
 0x12a   : > { %v7859_v7 = vpop.f32.mrf.mxu1  ;;  %v5052_v47 = vshll.u32 %v8481_v36, 16  ;;  %v4759_v8 = vshll.u32 %v9441_v41, 16  ;;  %v5062_v23 = vrot.slane %v5060_v5, 1 }
 0x12b   : > { %v9407_v19 = vadd.f32 %v1501_v62, %v1277_v30  ;;  %v1280_v56 = vadd.f32 %v7859_v7, %v9278_v0  ;;  %v1504_v21 = vpop.f32.mrf.mxu0  ;;  %v5031_v0 = vsel %vm771_vm2, %v5026_v11, %v5030_v12  ;;  %v4738_v40 = vsel %vm771_vm2, %v4733_v57, %v4737_v28 }
 0x12c   : > { %v1253_v27 = vpop.f32.mrf.mxu1  ;;  %v5056_v11 = vshrl.u32 %v8481_v36, 16  ;;  %v4746_v7 = vsel %vm771_vm2, %v4741_v45, %v4745_v22  ;;  %v4753_v57 = vrot.slane %v4751_v4, 1  ;;  %v4761_v36 = vrot.slane %v4759_v8, 1 }
 0x12d   : > { %v9413_v53 = vadd.f32 %v7877_v10, %v1280_v56  ;;  %v1278_v33 = vadd.f32 %v1253_v27, %v9293_v59  ;;  %v7900_v31 = vpop.f32.mrf.mxu0  ;;  %8115 = vmatmul.mubr.msk.bf16.vlgmr.msra.gmra.mxu0 %vm307_vm1, %v5023_v15  ;;  %v5046_v59 = vrot.slane %v5044_v1, 1  ;;  %v4755_v15 = vshrl.u32 %v8480_v48, 16  ;;  %v8485_v27 = vld [vmem:[%s8712_s9 + $0x150] ss:$0 sps:$4 sm:$0x11]  }
 0x12e   : > { %v7882_v16 = vpop.f32.mrf.mxu1  ;;  %8097 = vmatmul.mubr.msk.bf16.vlgmr.msra.gmra.mxu1 %vm307_vm1, %v4722_v42  ;;  %8149 = vmatpush3.bf16.msra.mxu0 %v5576_v3  ;;  %v5039_v42 = vsel %vm771_vm2, %v5034_v20, %v5038_v29 }
 0x12f   : > { %v9431_v60 = vadd.f32 %v1504_v21, %v1278_v33  ;;  %v1747_v50 = vadd.f32 %v7882_v16, %v9300_v6  ;;  %8131 = vmatpush3.bf16.msra.mxu1 %v5347_v58  ;;  %v1911_v43 = vpop.f32.mrf.mxu0  ;;  %8100 = vmatprep.mubr.msk.bf16.mxu1 %vm307_vm1, %v4730_v24  ;;  %v5047_v3 = vsel %vm771_vm2, %v5042_v46, %v5046_v59  ;;  %v8484_v33 = vld [vmem:[%s8712_s9 + $0xf8] ss:$0 sps:$4 sm:$0x11]  }
 0x130   : > { %v1682_v26 = vpop.f32.mrf.mxu1  ;;  %8118 = vmatprep.mubr.msk.bf16.mxu0 %vm307_vm1, %v5031_v0  ;;  %8262 = vmatprep.subr.msk.bf16.mxu1 %vm332_vm0, %v9422_v37  ;;  %v4749_v21 = vor.u32 %v4747_v38, %v4745_v22  ;;  %v5050_v24 = vor.u32 %v5048_v52, %v5046_v59  ;;  %v4757_v0 = vor.u32 %v4755_v15, %v4753_v57  ;;  %v4763_v59 = vshrl.u32 %v9441_v41, 16  ;;  %v8486_v41 = vld [vmem:[%s8712_s9 + $0xb8] sm:$0xfe]  }
 0x131   : > { %v9445_v62 = vadd.f32 %v7900_v31, %v1747_v50  ;;  %v1745_v6 = vadd.f32 %v1682_v26, %v9308_v14  ;;  %v7901_v58 = vpop.f32.mrf.mxu0  ;;  %8263 = vmatprep.subr.msk.bf16.mxu0 %vm332_vm0, %v9429_v32  ;;  %v5068_v26 = vshll.u32 %v8485_v27, 16  ;;  %v8489_v27 = vld [vmem:[%s8712_s9 + $0xc8] sm:$0xff]  }
 0x132   : > { %v7883_v34 = vpop.f32.mrf.mxu1  ;;  %v4762_v38 = vsel %vm771_vm2, %v4757_v0, %v4761_v36 }
 0x133   : > { %v9454_v30 = vadd.f32 %v1911_v43, %v1745_v6  ;;  %v1748_v10 = vadd.f32 %v7883_v34, %v9314_v25  ;;  %v1914_v14 = vpop.f32.mrf.mxu0  ;;  %v5054_v25 = vrot.slane %v5052_v47, 1  ;;  %v5064_v43 = vshrl.u32 %v9436_v55, 16  ;;  %v8487_v47 = vld [vmem:[%s8712_s9 + $0xc0] sm:$0xff]  }
 0x134   : > { %v1685_v12 = vpop.f32.mrf.mxu1  ;;  %v5070_v52 = vrot.slane %v5068_v26, 1 }
 0x135   : > { %v9460_v17 = vadd.f32 %v7901_v58, %v1748_v10  ;;  %v1746_v35 = vadd.f32 %v1685_v12, %v9320_v39  ;;  %v7904_v1 = vpop.f32.mrf.mxu0  ;;  %8119 = vmatmul.mubr.msk.bf16.gmra.mxu0 %vm307_vm1, %v5039_v42  ;;  %v5058_v39 = vor.u32 %v5056_v11, %v5054_v25  ;;  %v5055_v50 = vsel %vm771_vm2, %v5050_v24, %v5054_v25 }
 0x136   : > { %v7886_v56 = vpop.f32.mrf.mxu1  ;;  %8101 = vmatmul.mubr.msk.bf16.gmra.mxu1 %vm307_vm1, %v4738_v40  ;;  %8122 = vmatprep.mubr.msk.bf16.mxu0 %vm307_vm1, %v5047_v3  ;;  %v4765_v11 = vor.u32 %v4763_v59, %v4761_v36  ;;  %v5305_v12 = vrot.slane %v8486_v41, 1  ;;  %v8492_v41 = vld [vmem:[%s8712_s9 + $0x20] sm:$0xff]  }
 0x137   : > { %v9467_v28 = vadd.f32 %v1914_v14, %v1746_v35  ;;  %v1751_v29 = vadd.f32 %v7886_v56, %v9328_v44  ;;  %v1927_v13 = vpop.f32.mrf.mxu0  ;;  %8104 = vmatprep.mubr.msk.bf16.mxu1 %vm307_vm1, %v4746_v7  ;;  %v4754_v44 = vsel %vm771_vm2, %v4749_v21, %v4753_v57  ;;  %v5063_v6 = vsel %vm771_vm2, %v5058_v39, %v5062_v23  ;;  %v8488_v56 = vld [vmem:[%s8712_s9 + $0x10] sm:$0xff]  }
 0x138   : > { %v1698_v31 = vpop.f32.mrf.mxu1  ;;  %v5306_v7 = vrot.slane %v8487_v47, 1  ;;  %v9508_v39 = vld [vmem:[%s8712_s9 + $0xd0] sm:$0xff]   ;;  %v8495_v47 = vld [vmem:[%s8712_s9 + $0xe0] sm:$0xff]  }
 0x139   : > { %v9472_v16 = vadd.f32 %v7904_v1, %v1751_v29  ;;  %v1749_v20 = vadd.f32 %v1698_v31, %v9334_v54  ;;  %v7905_v46 = vpop.f32.mrf.mxu0  ;;  %v4767_v54 = vshll.u32 %v8484_v33, 16 }
 0x13a   : > { %v7887_v48 = vpop.f32.mrf.mxu1 }
 0x13b   : > { %v9479_v40 = vadd.f32 %v1927_v13, %v1749_v20  ;;  %v1752_v45 = vadd.f32 %v7887_v48, %v9340_v63  ;;  %v1930_v22 = vpop.f32.mrf.mxu0  ;;  %v5066_v63 = vor.u32 %v5064_v43, %v5062_v23  ;;  %v5307_v13 = vsel %vm1374_vm3, %v5305_v12, %v5306_v7  ;;  %v8494_v12 = vld [vmem:[%s8712_s9 + $0x28] sm:$0xff]  }
 0x13c   : > { %v1701_v58 = vpop.f32.mrf.mxu1  ;;  %v5308_v20 = vrot.slane %v8489_v27, 1  ;;  %v8499_v27 = vld [vmem:[%s8712_s9 + $0xf0] sm:$0xff]  }
 0x13d   : > { %v9486_v34 = vadd.f32 %v7905_v46, %v1752_v45  ;;  %v1750_v42 = vadd.f32 %v1701_v58, %v9349_v2  ;;  %v7908_v3 = vpop.f32.mrf.mxu0  ;;  %8123 = vmatmul.mubr.msk.bf16.gmra.mxu0 %vm307_vm1, %v5055_v50  ;;  %v4769_v2 = vrot.slane %v4767_v54, 1  ;;  %v5071_v25 = vsel %vm771_vm2, %v5066_v63, %v5070_v52  ;;  %v8490_v50 = vld [vmem:[%s8712_s9 + $0x18] sm:$0xff]  }
 0x13e   : > { %v7890_v55 = vpop.f32.mrf.mxu1  ;;  %8105 = vmatmul.mubr.msk.bf16.gmra.mxu1 %vm307_vm1, %v4754_v44  ;;  %8126 = vmatprep.mubr.msk.bf16.mxu0 %vm307_vm1, %v5063_v6  ;;  %v6106_v6 = vsel %vm332_vm0, %v9429_v32, 0  ;;  %v8493_v54 = vld [vmem:[%s8712_s9 + $0xd8] sm:$0xff]  }
 0x13f   : > { %v9492_v4 = vadd.f32 %v1930_v22, %v1750_v42  ;;  %v1755_v10 = vadd.f32 %v7890_v55, %v9356_v18  ;;  %v1943_v14 = vpop.f32.mrf.mxu0  ;;  %8108 = vmatprep.mubr.msk.bf16.mxu1 %vm307_vm1, %v4762_v38  ;;  %v4770_v57 = vsel %vm771_vm2, %v4765_v11, %v4769_v2  ;;  %v5309_v22 = vsel %vm1374_vm3, %v5306_v7, %v5308_v20  ;;  %v9544_v32 = vld [vmem:[%s10136_s1 + $0x5c] sm:$0xf] }
 0x140   : > { %v1714_v5 = vpop.f32.mrf.mxu1  ;;  %v5805_v38 = vsel %vm332_vm0, %v9422_v37, 0  ;;  %v9550_v37 = vld [vmem:[%s10136_s1 + $0x60] sm:$0xf]  ;;  %v5314_v11 = vrot.slane %v8495_v47, 1 }
 0x141   : > { %v9496_v15 = vadd.f32 %v7908_v3, %v1755_v10  ;;  %v1753_v8 = vadd.f32 %v1714_v5, %v9366_v9  ;;  %v7909_v35 = vpop.f32.mrf.mxu0  ;;  %v5312_v10 = vrot.slane %v8493_v54, 1 }
 0x142   : > { %v7891_v1 = vpop.f32.mrf.mxu1 }
 0x143   : > { %v9501_v18 = vadd.f32 %v1943_v14, %v1753_v8  ;;  %v1756_v21 = vadd.f32 %v7891_v1, %v9376_v49  ;;  %v1946_v24 = vpop.f32.mrf.mxu0  ;;  %v8496_v8 = vld [vmem:[%s8712_s9 + $0x30] sm:$0xff]  }
 0x144   : > { %v1717_v29 = vpop.f32.mrf.mxu1 }
 0x145   : > { %v9510_v23 = vadd.f32 %v7909_v35, %v1756_v21  ;;  %v1754_v9 = vadd.f32 %v1717_v29, %v9390_v61  ;;  %v7912_v33 = vpop.f32.mrf.mxu0  ;;  %8127 = vmatmul.mubr.msk.bf16.gmra.mxu0 %vm307_vm1, %v5071_v25  ;;  %v5310_v61 = vrot.slane %v9508_v39, 1  ;;  %v8497_v35 = vld [vmem:[%s8712_s9 + $0xe8] sm:$0xff]  }
 0x146   : > { %v7894_v31 = vpop.f32.mrf.mxu1  ;;  %8109 = vmatmul.mubr.msk.bf16.gmra.mxu1 %vm307_vm1, %v4770_v57  ;;  %8150 = vmatprep.mubr.msk.bf16.mxu0 %vm307_vm1, %v8488_v56 }
 0x147   : > { %v9516_v49 = vadd.f32 %v1946_v24, %v1754_v9  ;;  %v1759_v0 = vadd.f32 %v7894_v31, %v9401_v51  ;;  %v1959_v36 = vpop.f32.mrf.mxu0  ;;  %8132 = vmatprep.mubr.msk.bf16.mxu1 %vm307_vm1, %v5307_v13  ;;  %v5313_v21 = vsel %vm1374_vm3, %v5310_v61, %v5312_v10  ;;  %v8504_v24 = vld [vmem:[%s8712_s9 + $0x10] sm:$0xff]  }
 0x148   : > { %v1730_v46 = vpop.f32.mrf.mxu1 }
 0x149   : > { %v9521_v59 = vadd.f32 %v7912_v33, %v1759_v0  ;;  %v1757_v48 = vadd.f32 %v1730_v46, %v9407_v19  ;;  %v7913_v44 = vpop.f32.mrf.mxu0  ;;  %v5311_v19 = vsel %vm1374_vm3, %v5308_v20, %v5310_v61  ;;  %v5318_v46 = vrot.slane %v8499_v27, 1  ;;  %v8503_v27 = vld [vmem:[%s8712_s9 + $0x68] sm:$0xff]  }
 0x14a   : > { %v7895_v43 = vpop.f32.mrf.mxu1 }
 0x14b   : > { %v9525_v26 = vadd.f32 %v1959_v36, %v1757_v48  ;;  %v1760_v51 = vadd.f32 %v7895_v43, %v9413_v53  ;;  %v1962_v45 = vpop.f32.mrf.mxu0  ;;  %v6016_v36 = vshll.u32 %v8504_v24, 16 }
 0x14c   : > { %v1733_v58 = vpop.f32.mrf.mxu1 }
 0x14d   : > { %v9537_v42 = vadd.f32 %v7913_v44, %v1760_v51  ;;  %v1758_v3 = vadd.f32 %v1733_v58, %v9431_v60  ;;  %v7936_v53 = vpop.f32.mrf.mxu0  ;;  %8151 = vmatmul.mubr.msk.bf16.vlgmr.msra.gmra.mxu0 %vm307_vm1, %v8490_v50  ;;  %v8498_v50 = vld [vmem:[%s8712_s9 + $0x38] sm:$0xff]  }
 0x14e   : > { %v7918_v55 = vpop.f32.mrf.mxu1  ;;  %8133 = vmatmul.mubr.msk.bf16.vlgmr.msra.gmra.mxu1 %vm307_vm1, %v5309_v22  ;;  %8185 = vmatpush3.bf16.msra.mxu0 %v6106_v6  ;;  %v8501_v22 = vld [vmem:[%s8712_s9 + $0xf8] ss:$0 sps:$4 sm:$0x11]   ;;  %v6014_v6 = vshrl.u32 %v8504_v24, 16 }
 0x14f   : > { %v9552_v63 = vadd.f32 %v1962_v45, %v1758_v3  ;;  %v2277_v60 = vadd.f32 %v7918_v55, %v9445_v62  ;;  %8167 = vmatpush3.bf16.msra.mxu1 %v5805_v38  ;;  %v2513_v52 = vpop.f32.mrf.mxu0  ;;  %8136 = vmatprep.mubr.msk.bf16.mxu1 %vm307_vm1, %v5311_v19  ;;  %v8500_v45 = vld [vmem:[%s8712_s9 + $0x40] sm:$0xff]   ;;  %v6018_v38 = vrot.slane %v6016_v36, 1 }
 0x150   : > { %v2212_v14 = vpop.f32.mrf.mxu1  ;;  %8154 = vmatprep.mubr.msk.bf16.mxu0 %vm307_vm1, %v8492_v41  ;;  %8264 = vmatprep.subr.msk.bf16.mxu1 %vm332_vm0, %v9544_v32 }
 0x151   : > { %v9559_v2 = vadd.f32 %v7936_v53, %v2277_v60  ;;  %v2275_v5 = vadd.f32 %v2212_v14, %v9454_v30  ;;  %v7937_v62 = vpop.f32.mrf.mxu0  ;;  %8265 = vmatprep.subr.msk.bf16.mxu0 %vm332_vm0, %v9550_v37  ;;  %v5315_v30 = vsel %vm1374_vm3, %v5312_v10, %v5314_v11  ;;  %v8507_v60 = vld [vmem:[%s8712_s9 + $0x20] sm:$0xff]  }
 0x152   : > { %v7919_v7 = vpop.f32.mrf.mxu1 }
 0x153   : > { %v9567_v1 = vadd.f32 %v2513_v52, %v2275_v5  ;;  %v2278_v25 = vadd.f32 %v7919_v7, %v9460_v17  ;;  %v2516_v56 = vpop.f32.mrf.mxu0  ;;  %v5316_v17 = vrot.slane %v8497_v35, 1  ;;  %v8509_v35 = vld [vmem:[%s8712_s9 + $0x28] sm:$0xff]  }
 0x154   : > { %v2215_v57 = vpop.f32.mrf.mxu1 }
 0x155   : > { %v9574_v29 = vadd.f32 %v7937_v62, %v2278_v25  ;;  %v2276_v13 = vadd.f32 %v2215_v57, %v9467_v28  ;;  %v7940_v39 = vpop.f32.mrf.mxu0  ;;  %8155 = vmatmul.mubr.msk.bf16.gmra.mxu0 %vm307_vm1, %v8494_v12  ;;  %v8505_v28 = vld [vmem:[%s8712_s9 + $0x18] sm:$0xff]   ;;  %v5317_v51 = vsel %vm1374_vm3, %v5314_v11, %v5316_v17  ;;  %v5319_v47 = vsel %vm1374_vm3, %v5316_v17, %v5318_v46 }
 0x156   : > { %v7922_v9 = vpop.f32.mrf.mxu1  ;;  %8137 = vmatmul.mubr.msk.bf16.gmra.mxu1 %vm307_vm1, %v5313_v21  ;;  %8158 = vmatprep.mubr.msk.bf16.mxu0 %vm307_vm1, %v8496_v8  ;;  %v6021_v19 = vshll.u32 %v8505_v28, 16  ;;  %v8502_v8 = vld [vmem:[%s8712_s9 + $0x48] sm:$0xff]   ;;  %v6029_v21 = vshll.u32 %v8507_v60, 16 }
 0x157   : > { %v9580_v33 = vadd.f32 %v2516_v56, %v2276_v13  ;;  %v2281_v31 = vadd.f32 %v7922_v9, %v9472_v16  ;;  %v2529_v0 = vpop.f32.mrf.mxu0  ;;  %8140 = vmatprep.mubr.msk.bf16.mxu1 %vm307_vm1, %v5315_v30  ;;  %v6025_v56 = vshrl.u32 %v8505_v28, 16  ;;  %v8511_v9 = vld [vmem:[%s8712_s9 + $0x30] sm:$0xff]   ;;  %v6037_v28 = vshll.u32 %v8509_v35, 16 }
 0x158   : > { %v2228_v20 = vpop.f32.mrf.mxu1  ;;  %v6023_v11 = vrot.slane %v6021_v19, 1 }
 0x159   : > { %v9585_v61 = vadd.f32 %v7940_v39, %v2281_v31  ;;  %v2279_v48 = vadd.f32 %v2228_v20, %v9479_v40  ;;  %v7941_v44 = vpop.f32.mrf.mxu0  ;;  %v6031_v20 = vrot.slane %v6029_v21, 1 }
 0x15a   : > { %v7923_v43 = vpop.f32.mrf.mxu1 }
 0x15b   : > { %v9592_v16 = vadd.f32 %v2529_v0, %v2279_v48  ;;  %v2282_v54 = vadd.f32 %v7923_v43, %v9486_v34  ;;  %v2532_v58 = vpop.f32.mrf.mxu0  ;;  %v5320_v34 = vrot.slane %v8501_v22, 1  ;;  %v6033_v0 = vshrl.u32 %v8507_v60, 16 }
 0x15c   : > { %v2231_v41 = vpop.f32.mrf.mxu1  ;;  %v6045_v43 = vshll.u32 %v8511_v9, 16 }
 0x15d   : > { %v9596_v40 = vadd.f32 %v7941_v44, %v2282_v54  ;;  %v2280_v3 = vadd.f32 %v2231_v41, %v9492_v4  ;;  %v7944_v53 = vpop.f32.mrf.mxu0  ;;  %8159 = vmatmul.mubr.msk.bf16.gmra.mxu0 %vm307_vm1, %v8498_v50  ;;  %v6019_v4 = vor.u32 %v6018_v38, %v6014_v6  ;;  %v5321_v30 = vsel %vm1374_vm3, %v5318_v46, %v5320_v34  ;;  %v9626_v46 = vld [vmem:[%s8712_s9 + $0x38] sm:$0xff]   ;;  %v8506_v38 = vld [vmem:[%s8712_s9 + $0x70] sm:$0xff]  }
 0x15e   : > { %v7926_v55 = vpop.f32.mrf.mxu1  ;;  %8141 = vmatmul.mubr.msk.bf16.gmra.mxu1 %vm307_vm1, %v5317_v51  ;;  %8162 = vmatprep.mubr.msk.bf16.mxu0 %vm307_vm1, %v8500_v45  ;;  %v6035_v6 = vor.u32 %v6033_v0, %v6031_v20  ;;  %v6039_v54 = vrot.slane %v6037_v28, 1  ;;  %v6041_v41 = vshrl.u32 %v8509_v35, 16  ;;  %v8508_v34 = vld [vmem:[%s8712_s9 + $0x78] sm:$0xff]  }
 0x15f   : > { %v9603_v52 = vadd.f32 %v2532_v58, %v2280_v3  ;;  %v2285_v10 = vadd.f32 %v7926_v55, %v9496_v15  ;;  %v2545_v14 = vpop.f32.mrf.mxu0  ;;  %8144 = vmatprep.mubr.msk.bf16.mxu1 %vm307_vm1, %v5319_v47  ;;  %v6024_v13 = vsel %vm771_vm2, %v6019_v4, %v6023_v11  ;;  %v6053_v47 = vshll.u32 %v9626_v46, 16 }
 0x160   : > { %v2244_v5 = vpop.f32.mrf.mxu1 }
 0x161   : > { %v9607_v62 = vadd.f32 %v7944_v53, %v2285_v10  ;;  %v2283_v12 = vadd.f32 %v2244_v5, %v9501_v18  ;;  %v7945_v7 = vpop.f32.mrf.mxu0  ;;  %v6407_v10 = vsel %vm332_vm0, %v9544_v32, 0  ;;  %v6055_v32 = vrot.slane %v6053_v47, 1 }
 0x162   : > { %v7927_v25 = vpop.f32.mrf.mxu1 }
 0x163   : > { %v9612_v24 = vadd.f32 %v2545_v14, %v2283_v12  ;;  %v2286_v15 = vadd.f32 %v7927_v25, %v9510_v23  ;;  %v2548_v57 = vpop.f32.mrf.mxu0  ;;  %v6027_v23 = vor.u32 %v6025_v56, %v6023_v11  ;;  %v6047_v14 = vrot.slane %v6045_v43, 1  ;;  %v8515_v12 = vld [vmem:[%s8712_s9 + $0x40] sm:$0xff]   ;;  %v9658_v56 = vld [vmem:[%s8712_s9 + $0x48] sm:$0xff]  }
 0x164   : > { %v2247_v39 = vpop.f32.mrf.mxu1 }
 0x165   : > { %v9619_v18 = vadd.f32 %v7945_v7, %v2286_v15  ;;  %v2284_v17 = vadd.f32 %v2247_v39, %v9516_v49  ;;  %v7948_v31 = vpop.f32.mrf.mxu0  ;;  %8163 = vmatmul.mubr.msk.bf16.gmra.mxu0 %vm307_vm1, %v8502_v8  ;;  %v6032_v19 = vsel %vm771_vm2, %v6027_v23, %v6031_v20  ;;  %v8510_v39 = vld [vmem:[%s8712_s9 + $0x80] sm:$0xff]   ;;  %v6065_v23 = vshrl.u32 %v8515_v12, 16 }
 0x166   : > { %v7930_v36 = vpop.f32.mrf.mxu1  ;;  %8145 = vmatmul.mubr.msk.bf16.gmra.mxu1 %vm307_vm1, %v5321_v30  ;;  %8186 = vmatprep.mubr.msk.bf16.mxu0 %vm307_vm1, %v6024_v13 }
 0x167   : > { %v9628_v48 = vadd.f32 %v2548_v57, %v2284_v17  ;;  %v2289_v44 = vadd.f32 %v7930_v36, %v9521_v59  ;;  %v2561_v49 = vpop.f32.mrf.mxu0  ;;  %8168 = vmatprep.mubr.msk.bf16.mxu1 %vm307_vm1, %v8503_v27  ;;  %v6049_v59 = vshrl.u32 %v8511_v9, 16  ;;  %v6061_v27 = vshll.u32 %v8515_v12, 16  ;;  %v8512_v36 = vld [vmem:[%s8712_s9 + $0x88] sm:$0xff]  }
 0x168   : > { %v2260_v50 = vpop.f32.mrf.mxu1  ;;  %v6057_v17 = vshrl.u32 %v9626_v46, 16 }
 0x169   : > { %v9632_v51 = vadd.f32 %v7948_v31, %v2289_v44  ;;  %v2287_v45 = vadd.f32 %v2260_v50, %v9525_v26  ;;  %v7949_v22 = vpop.f32.mrf.mxu0  ;;  %v6657_v26 = vsel %vm332_vm0, %v9550_v37, 0  ;;  %v6043_v37 = vor.u32 %v6041_v41, %v6039_v54  ;;  %v8520_v44 = vld [vmem:[%s8712_s9 + $0x68] sm:$0xff]   ;;  %v9686_v41 = vld [vmem:[%s8712_s9 + $0x70] sm:$0xff]  }
 0x16a   : > { %v7931_v58 = vpop.f32.mrf.mxu1  ;;  %v6051_v8 = vor.u32 %v6049_v59, %v6047_v14  ;;  %v6063_v46 = vrot.slane %v6061_v27, 1  ;;  %v6317_v59 = vshll.u32 %v8520_v44, 16  ;;  %v8524_v27 = vld [vmem:[%s8712_s9 + $0x78] sm:$0xff]  }
 0x16b   : > { %v9638_v3 = vadd.f32 %v2561_v49, %v2287_v45  ;;  %v2290_v53 = vadd.f32 %v7931_v58, %v9537_v42  ;;  %v2564_v55 = vpop.f32.mrf.mxu0  ;;  %v6040_v42 = vsel %vm771_vm2, %v6035_v6, %v6039_v54 }
 0x16c   : > { %v2263_v60 = vpop.f32.mrf.mxu1  ;;  %v6056_v9 = vsel %vm771_vm2, %v6051_v8, %v6055_v32  ;;  %v6315_v8 = vshrl.u32 %v8520_v44, 16 }
 0x16d   : > { %v9646_v4 = vadd.f32 %v7949_v22, %v2290_v53  ;;  %v2288_v11 = vadd.f32 %v2263_v60, %v9552_v63  ;;  %v7972_v5 = vpop.f32.mrf.mxu0  ;;  %8187 = vmatmul.mubr.msk.bf16.vlgmr.msra.gmra.mxu0 %vm307_vm1, %v6032_v19  ;;  %v8519_v22 = vld [vmem:[%s8712_s9 + $0x50] ss:$0 sps:$4 sm:$0x11]   ;;  %v6073_v60 = vshrl.u32 %v9658_v56, 16 }
 0x16e   : > { %v7954_v7 = vpop.f32.mrf.mxu1  ;;  %8169 = vmatmul.mubr.msk.bf16.vlgmr.msra.gmra.mxu1 %vm307_vm1, %v8506_v38  ;;  %8221 = vmatpush3.bf16.msra.mxu0 %v6657_v26 }
 0x16f   : > { %v9653_v35 = vadd.f32 %v2564_v55, %v2288_v11  ;;  %v2828_v25 = vadd.f32 %v7954_v7, %v9559_v2  ;;  %8203 = vmatpush3.bf16.msra.mxu1 %v6407_v10  ;;  %v2992_v63 = vpop.f32.mrf.mxu0  ;;  %8172 = vmatprep.mubr.msk.bf16.mxu1 %vm307_vm1, %v8508_v34  ;;  %v6048_v2 = vsel %vm771_vm2, %v6043_v37, %v6047_v14  ;;  %v8514_v34 = vld [vmem:[%s8712_s9 + $0x90] sm:$0xff]   ;;  %v6077_v10 = vshll.u32 %v8519_v22, 16  ;;  %v9701_v37 = vld [vmem:[%s8712_s9 + $0x18] sm:$0xff]  }
 0x170   : > { %v2763_v21 = vpop.f32.mrf.mxu1  ;;  %8190 = vmatprep.mubr.msk.bf16.mxu0 %vm307_vm1, %v6040_v42  ;;  %v8516_v42 = vld [vmem:[%s8712_s9 + $0x98] sm:$0xff]   ;;  %v8522_v7 = vld [vmem:[%s8712_s9 + $0x10] sm:$0xfe]  }
 0x171   : > { %v9661_v15 = vadd.f32 %v7972_v5, %v2828_v25  ;;  %v2826_v57 = vadd.f32 %v2763_v21, %v9567_v1  ;;  %v7973_v30 = vpop.f32.mrf.mxu0  ;;  %v6069_v1 = vshll.u32 %v9658_v56, 16  ;;  %v6322_v25 = vshll.u32 %v9686_v41, 16 }
 0x172   : > { %v7955_v13 = vpop.f32.mrf.mxu1 }
 0x173   : > { %v9668_v31 = vadd.f32 %v2992_v63, %v2826_v57  ;;  %v2829_v0 = vadd.f32 %v7955_v13, %v9574_v29  ;;  %v2995_v28 = vpop.f32.mrf.mxu0  ;;  %v6059_v29 = vor.u32 %v6057_v17, %v6055_v32  ;;  %v6071_v38 = vrot.slane %v6069_v1, 1 }
 0x174   : > { %v2766_v20 = vpop.f32.mrf.mxu1  ;;  %v6319_v32 = vrot.slane %v6317_v59, 1 }
 0x175   : > { %v9674_v49 = vadd.f32 %v7973_v30, %v2829_v0  ;;  %v2827_v50 = vadd.f32 %v2766_v20, %v9580_v33  ;;  %v7976_v43 = vpop.f32.mrf.mxu0  ;;  %8191 = vmatmul.mubr.msk.bf16.gmra.mxu0 %vm307_vm1, %v6048_v2  ;;  %v6067_v33 = vor.u32 %v6065_v23, %v6063_v46  ;;  %v6075_v57 = vor.u32 %v6073_v60, %v6071_v38  ;;  %v8528_v60 = vld [vmem:[%s8712_s9 + $0x88] sm:$0xff]  }
 0x176   : > { %v7958_v45 = vpop.f32.mrf.mxu1  ;;  %8173 = vmatmul.mubr.msk.bf16.gmra.mxu1 %vm307_vm1, %v8510_v39  ;;  %8194 = vmatprep.mubr.msk.bf16.mxu0 %vm307_vm1, %v6056_v9  ;;  %v6079_v30 = vrot.slane %v6077_v10, 1  ;;  %v6616_v9 = vrot.slane %v9701_v37, 1  ;;  %v6320_v0 = vor.u32 %v6319_v32, %v6315_v8  ;;  %v9748_v37 = vld [vmem:[%s8712_s9 + $0x90] sm:$0xff]  }
 0x177   : > { %v9681_v6 = vadd.f32 %v2995_v28, %v2827_v50  ;;  %v2832_v54 = vadd.f32 %v7958_v45, %v9585_v61  ;;  %v3008_v58 = vpop.f32.mrf.mxu0  ;;  %8176 = vmatprep.mubr.msk.bf16.mxu1 %vm307_vm1, %v8512_v36  ;;  %v6064_v61 = vsel %vm771_vm2, %v6059_v29, %v6063_v46  ;;  %v6072_v12 = vsel %vm771_vm2, %v6067_v33, %v6071_v38  ;;  %v9717_v36 = vld [vmem:[%s8712_s9 + $0x80] sm:$0xff]   ;;  %v9731_v33 = vld [vmem:[%s8712_s9 + $0x28] sm:$0xff]  }
 0x178   : > { %v2779_v19 = vpop.f32.mrf.mxu1  ;;  %v6324_v28 = vrot.slane %v6322_v25, 1  ;;  %v6080_v50 = vsel %vm771_vm2, %v6075_v57, %v6079_v30  ;;  %v6330_v46 = vshll.u32 %v8524_v27, 16  ;;  %v8525_v45 = vld [vmem:[%s8712_s9 + $0x20] sm:$0xff]   ;;  %v6338_v59 = vshll.u32 %v9717_v36, 16 }
 0x179   : > { %v9688_v47 = vadd.f32 %v7976_v43, %v2832_v54  ;;  %v2830_v53 = vadd.f32 %v2779_v19, %v9592_v16  ;;  %v7977_v55 = vpop.f32.mrf.mxu0  ;;  %v6326_v43 = vshrl.u32 %v9686_v41, 16  ;;  %v6334_v19 = vshrl.u32 %v8524_v27, 16 }
 0x17a   : > { %v7959_v26 = vpop.f32.mrf.mxu1  ;;  %v6325_v38 = vsel %vm771_vm2, %v6320_v0, %v6324_v28  ;;  %v6350_v0 = vshrl.u32 %v8528_v60, 16 }
 0x17b   : > { %v9694_v14 = vadd.f32 %v3008_v58, %v2830_v53  ;;  %v2833_v11 = vadd.f32 %v7959_v26, %v9596_v40  ;;  %v3011_v5 = vpop.f32.mrf.mxu0  ;;  %v6328_v26 = vor.u32 %v6326_v43, %v6324_v28 }
 0x17c   : > { %v2782_v16 = vpop.f32.mrf.mxu1 }
 0x17d   : > { %v9704_v63 = vadd.f32 %v7977_v55, %v2833_v11  ;;  %v2831_v56 = vadd.f32 %v2782_v16, %v9603_v52  ;;  %v7980_v21 = vpop.f32.mrf.mxu0  ;;  %8195 = vmatmul.mubr.msk.bf16.gmra.mxu0 %vm307_vm1, %v6064_v61  ;;  %v6615_v52 = vrot.slane %v8522_v7, 1  ;;  %v6618_v61 = vrot.slane %v8525_v45, 1 }
 0x17e   : > { %v7962_v40 = vpop.f32.mrf.mxu1  ;;  %8177 = vmatmul.mubr.msk.bf16.gmra.mxu1 %vm307_vm1, %v8514_v34  ;;  %8198 = vmatprep.mubr.msk.bf16.mxu0 %vm307_vm1, %v6072_v12  ;;  %v6332_v34 = vrot.slane %v6330_v46, 1  ;;  %v6340_v7 = vrot.slane %v6338_v59, 1 }
 0x17f   : > { %v9711_v13 = vadd.f32 %v3011_v5, %v2831_v56  ;;  %v2836_v39 = vadd.f32 %v7962_v40, %v9607_v62  ;;  %v3024_v2 = vpop.f32.mrf.mxu0  ;;  %8180 = vmatprep.mubr.msk.bf16.mxu1 %vm307_vm1, %v8516_v42  ;;  %v8518_v62 = vld [vmem:[%s8712_s9 + $0xa0] sm:$0xff]   ;;  %v6617_v58 = vsel %vm1374_vm3, %v6615_v52, %v6616_v9  ;;  %v8529_v40 = vld [vmem:[%s8712_s9 + $0x30] sm:$0xff]   ;;  %v9762_v52 = vld [vmem:[%s8712_s9 + $0x38] sm:$0xff]  }
 0x180   : > { %v2795_v17 = vpop.f32.mrf.mxu1  ;;  %v6336_v12 = vor.u32 %v6334_v19, %v6332_v34  ;;  %v6333_v56 = vsel %vm771_vm2, %v6328_v26, %v6332_v34 }
 0x181   : > { %v9719_v23 = vadd.f32 %v7980_v21, %v2836_v39  ;;  %v2834_v1 = vadd.f32 %v2795_v17, %v9612_v24  ;;  %v7981_v20 = vpop.f32.mrf.mxu0  ;;  %v6346_v21 = vshll.u32 %v8528_v60, 16  ;;  %v6342_v39 = vshrl.u32 %v9717_v36, 16 }
 0x182   : > { %v7963_v44 = vpop.f32.mrf.mxu1  ;;  %v6341_v17 = vsel %vm771_vm2, %v6336_v12, %v6340_v7 }
 0x183   : > { %v9726_v29 = vadd.f32 %v3024_v2, %v2834_v1  ;;  %v2837_v22 = vadd.f32 %v7963_v44, %v9619_v18  ;;  %v3027_v54 = vpop.f32.mrf.mxu0  ;;  %v6348_v36 = vrot.slane %v6346_v21, 1  ;;  %v6622_v44 = vrot.slane %v8529_v40, 1 }
 0x184   : > { %v2798_v24 = vpop.f32.mrf.mxu1  ;;  %v6344_v45 = vor.u32 %v6342_v39, %v6340_v7 }
 0x185   : > { %v9735_v53 = vadd.f32 %v7981_v20, %v2837_v22  ;;  %v2835_v41 = vadd.f32 %v2798_v24, %v9628_v48  ;;  %v7984_v55 = vpop.f32.mrf.mxu0  ;;  %8199 = vmatmul.mubr.msk.bf16.gmra.mxu0 %vm307_vm1, %v6080_v50  ;;  %v6620_v48 = vrot.slane %v9731_v33, 1  ;;  %v9779_v33 = vld [vmem:[%s8712_s9 + $0xa0] sm:$0xff]  }
 0x186   : > { %v7966_v18 = vpop.f32.mrf.mxu1  ;;  %8181 = vmatmul.mubr.msk.bf16.gmra.mxu1 %vm307_vm1, %v8518_v62  ;;  %8222 = vmatprep.mubr.msk.bf16.mxu0 %vm307_vm1, %v6617_v58  ;;  %v8532_v62 = vld [vmem:[%s8712_s9 + $0x98] sm:$0xff]   ;;  %v6349_v60 = vsel %vm771_vm2, %v6344_v45, %v6348_v36 }
 0x187   : > { %v9742_v10 = vadd.f32 %v3027_v54, %v2835_v41  ;;  %v2840_v11 = vadd.f32 %v7966_v18, %v9632_v51  ;;  %v3040_v5 = vpop.f32.mrf.mxu0  ;;  %8204 = vmatprep.mubr.msk.bf16.mxu1 %vm307_vm1, %v6325_v38  ;;  %v6619_v51 = vsel %vm1374_vm3, %v6616_v9, %v6618_v61  ;;  %v6621_v2 = vsel %vm1374_vm3, %v6618_v61, %v6620_v48  ;;  %v8533_v18 = vld [vmem:[%s8712_s9 + $0x40] sm:$0xff]  }
 0x188   : > { %v2811_v42 = vpop.f32.mrf.mxu1  ;;  %v6354_v9 = vshll.u32 %v9748_v37, 16  ;;  %v6352_v54 = vor.u32 %v6350_v0, %v6348_v36  ;;  %v6358_v41 = vshrl.u32 %v9748_v37, 16  ;;  %v6366_v12 = vshrl.u32 %v8532_v62, 16 }
 0x189   : > { %v9750_v16 = vadd.f32 %v7984_v55, %v2840_v11  ;;  %v2838_v8 = vadd.f32 %v2811_v42, %v9638_v3  ;;  %v7985_v32 = vpop.f32.mrf.mxu0  ;;  %v6362_v55 = vshll.u32 %v8532_v62, 16 }
 0x18a   : > { %v7967_v25 = vpop.f32.mrf.mxu1  ;;  %v6356_v58 = vrot.slane %v6354_v9, 1 }
 0x18b   : > { %v9756_v57 = vadd.f32 %v3040_v5, %v2838_v8  ;;  %v2841_v30 = vadd.f32 %v7967_v25, %v9646_v4  ;;  %v3043_v27 = vpop.f32.mrf.mxu0  ;;  %v8535_v5 = vld [vmem:[%s8712_s9 + $0x48] sm:$0xff]   ;;  %v6364_v25 = vrot.slane %v6362_v55, 1 }
 0x18c   : > { %v2814_v3 = vpop.f32.mrf.mxu1 }
 0x18d   : > { %v9766_v28 = vadd.f32 %v7985_v32, %v2841_v30  ;;  %v2839_v1 = vadd.f32 %v2814_v3, %v9653_v35  ;;  %v8008_v20 = vpop.f32.mrf.mxu0  ;;  %8223 = vmatmul.mubr.msk.bf16.vlgmr.msra.gmra.mxu0 %vm307_vm1, %v6619_v51  ;;  %v6624_v35 = vrot.slane %v9762_v52, 1  ;;  %v6360_v32 = vor.u32 %v6358_v41, %v6356_v58  ;;  %v8536_v30 = vld [vmem:[%s8712_s9 + $0xa8] ss:$0 sps:$4 sm:$0x11]  }
 0x18e   : > { %v7990_v4 = vpop.f32.mrf.mxu1  ;;  %8205 = vmatmul.mubr.msk.bf16.vlgmr.msra.gmra.mxu1 %vm307_vm1, %v6333_v56  ;;  %8226 = vmatprep.mubr.msk.bf16.mxu0 %vm307_vm1, %v6621_v2  ;;  %v6626_v56 = vrot.slane %v8533_v18, 1  ;;  %v6368_v39 = vor.u32 %v6366_v12, %v6364_v25 }
 0x18f   : > { %v9773_v50 = vadd.f32 %v3043_v27, %v2839_v1  ;;  %v3286_v43 = vadd.f32 %v7990_v4, %v9661_v15  ;;  %v3522_v46 = vpop.f32.mrf.mxu0  ;;  %8208 = vmatprep.mubr.msk.bf16.mxu1 %vm307_vm1, %v6341_v17  ;;  %v6623_v15 = vsel %vm1374_vm3, %v6620_v48, %v6622_v44  ;;  %v6625_v11 = vsel %vm1374_vm3, %v6622_v44, %v6624_v35 }
 0x190   : > { %v3221_v22 = vpop.f32.mrf.mxu1  ;;  %v6370_v48 = vshll.u32 %v9779_v33, 16  ;;  %v6365_v9 = vsel %vm771_vm2, %v6360_v32, %v6364_v25  ;;  %v6627_v1 = vsel %vm1374_vm3, %v6624_v35, %v6626_v56 }
 0x191   : > { %v9781_v24 = vadd.f32 %v8008_v20, %v3286_v43  ;;  %v3284_v38 = vadd.f32 %v3221_v22, %v9668_v31  ;;  %v8009_v19 = vpop.f32.mrf.mxu0  ;;  %v6357_v31 = vsel %vm771_vm2, %v6352_v54, %v6356_v58  ;;  %v8537_v20 = vld [vmem:[%s8712_s9 + $0x50] ss:$0 sps:$4 sm:$0x11]   ;;  %v6378_v43 = vshll.u32 %v8536_v30, 16 }
 0x192   : > { %v7991_v59 = vpop.f32.mrf.mxu1  ;;  %v6372_v2 = vrot.slane %v6370_v48, 1 }
 0x193   : > { %v9787_v26 = vadd.f32 %v3522_v46, %v3284_v38  ;;  %v3287_v34 = vadd.f32 %v7991_v59, %v9674_v49  ;;  %v3525_v61 = vpop.f32.mrf.mxu0  ;;  %v6380_v59 = vrot.slane %v6378_v43, 1 }
 0x194   : > { %v3224_v42 = vpop.f32.mrf.mxu1 }
 0x195   : > { %v9795_v7 = vadd.f32 %v8009_v19, %v3287_v34  ;;  %v3285_v37 = vadd.f32 %v3224_v42, %v9681_v6  ;;  %v8012_v8 = vpop.f32.mrf.mxu0  ;;  %8227 = vmatmul.mubr.msk.bf16.gmra.mxu0 %vm307_vm1, %v6623_v15  ;;  %v6628_v6 = vrot.slane %v8535_v5, 1 }
 0x196   : > { %v7994_v49 = vpop.f32.mrf.mxu1  ;;  %8209 = vmatmul.mubr.msk.bf16.gmra.mxu1 %vm307_vm1, %v6349_v60  ;;  %8230 = vmatprep.mubr.msk.bf16.mxu0 %vm307_vm1, %v6625_v11 }
 0x197   : > { %v9801_v51 = vadd.f32 %v3525_v61, %v3285_v37  ;;  %v3290_v21 = vadd.f32 %v7994_v49, %v9688_v47  ;;  %v3538_v40 = vpop.f32.mrf.mxu0  ;;  %8212 = vmatprep.mubr.msk.bf16.mxu1 %vm307_vm1, %v6357_v31  ;;  %v6374_v47 = vshrl.u32 %v9779_v33, 16  ;;  %v6629_v62 = vsel %vm1374_vm3, %v6626_v56, %v6628_v6 }
 0x198   : > { %v3237_v27 = vpop.f32.mrf.mxu1 }
 0x199   : > { %v9806_v52 = vadd.f32 %v8012_v8, %v3290_v21  ;;  %v3288_v3 = vadd.f32 %v3237_v27, %v9694_v14  ;;  %v8013_v17 = vpop.f32.mrf.mxu0  ;;  %v6373_v14 = vsel %vm771_vm2, %v6368_v39, %v6372_v2  ;;  %v6376_v19 = vor.u32 %v6374_v47, %v6372_v2 }
 0x19a   : > { %v7995_v0 = vpop.f32.mrf.mxu1 }
 0x19b   : > { %v9813_v4 = vadd.f32 %v3538_v40, %v3288_v3  ;;  %v3291_v36 = vadd.f32 %v7995_v0, %v9704_v63  ;;  %v3541_v44 = vpop.f32.mrf.mxu0  ;;  %v6630_v63 = vrot.slane %v8537_v20, 1 }
 0x19c   : > { %v3240_v46 = vpop.f32.mrf.mxu1 }
 0x19d   : > { %v9818_v45 = vadd.f32 %v8013_v17, %v3291_v36  ;;  %v3289_v22 = vadd.f32 %v3240_v46, %v9711_v13  ;;  %v8016_v54 = vpop.f32.mrf.mxu0  ;;  %8231 = vmatmul.mubr.msk.bf16.gmra.mxu0 %vm307_vm1, %v6627_v1  ;;  %v6631_v34 = vsel %vm1374_vm3, %v6628_v6, %v6630_v63 }
 0x19e   : > { %v7998_v35 = vpop.f32.mrf.mxu1  ;;  %8213 = vmatmul.mubr.msk.bf16.gmra.mxu1 %vm307_vm1, %v6365_v9  ;;  %8234 = vmatprep.mubr.msk.bf16.mxu0 %vm307_vm1, %v6629_v62 }
 0x19f   : > { %v9824_v58 = vadd.f32 %v3541_v44, %v3289_v22  ;;  %v3294_v33 = vadd.f32 %v7998_v35, %v9719_v23  ;;  %v3554_v38 = vpop.f32.mrf.mxu0  ;;  %8216 = vmatprep.mubr.msk.bf16.mxu1 %vm307_vm1, %v6373_v14  ;;  %v6381_v23 = vsel %vm771_vm2, %v6376_v19, %v6380_v59 }
 0x1a0   : > { %v3253_v15 = vpop.f32.mrf.mxu1 }
 0x1a1   : > { %v9828_v13 = vadd.f32 %v8016_v54, %v3294_v33  ;;  %v3292_v41 = vadd.f32 %v3253_v15, %v9726_v29  ;;  %v8017_v55 = vpop.f32.mrf.mxu0 }
 0x1a2   : > { %v7999_v18 = vpop.f32.mrf.mxu1 }
 0x1a3   : > { %v9832_v61 = vadd.f32 %v3554_v38, %v3292_v41  ;;  %v3295_v60 = vadd.f32 %v7999_v18, %v9735_v53  ;;  %v3557_v11 = vpop.f32.mrf.mxu0 }
 0x1a4   : > { %v3256_v5 = vpop.f32.mrf.mxu1 }
 0x1a5   : > { %v9836_v42 = vadd.f32 %v8017_v55, %v3295_v60  ;;  %v3293_v31 = vadd.f32 %v3256_v5, %v9742_v10  ;;  %v8020_v12 = vpop.f32.mrf.mxu0  ;;  %8235 = vmatmul.mubr.msk.bf16.gmra.mxu0 %vm307_vm1, %v6631_v34 }
 0x1a6   : > { %v8002_v29 = vpop.f32.mrf.mxu1  ;;  %8217 = vmatmul.mubr.msk.bf16.gmra.mxu1 %vm307_vm1, %v6381_v23 }
 0x1a7   : > { %v3594_v48 = vadd.f32 %v3557_v11, %v3293_v31  ;;  %v3298_v37 = vadd.f32 %v8002_v29, %v9750_v16  ;;  %v3570_v8 = vpop.f32.mrf.mxu0 }
 0x1a8   : > { %v3269_v49 = vpop.f32.mrf.mxu1 }
 0x1a9   : > { %v3599_v53 = vadd.f32 %v8020_v12, %v3298_v37  ;;  %v3296_v32 = vadd.f32 %v3269_v49, %v9756_v57  ;;  %v8021_v25 = vpop.f32.mrf.mxu0 }
 0x1aa   : > { %v8003_v56 = vpop.f32.mrf.mxu1 }
 0x1ab   : > { %v3597_v21 = vadd.f32 %v3570_v8, %v3296_v32  ;;  %v3299_v40 = vadd.f32 %v8003_v56, %v9766_v28  ;;  %v3573_v10 = vpop.f32.mrf.mxu0 }
 0x1ac   : > { %v3272_v6 = vpop.f32.mrf.mxu1 }
 0x1ad   : > { %v3600_v30 = vadd.f32 %v8021_v25, %v3299_v40  ;;  %v3297_v27 = vadd.f32 %v3272_v6, %v9773_v50  ;;  %v8044_v39 = vpop.f32.mrf.mxu0 }
 0x1ae   : > { %v8026_v2 = vpop.f32.mrf.mxu1 }
 0x1af   : > { %v3598_v3 = vadd.f32 %v3573_v10, %v3297_v27  ;;  %v3888_v16 = vadd.f32 %v8026_v2, %v9781_v24  ;;  %v4073_v17 = vpop.f32.mrf.mxu0 }
 0x1b0   : > { %v3823_v0 = vpop.f32.mrf.mxu1 }
 0x1b1   : > { %v4138_v9 = vadd.f32 %v8044_v39, %v3888_v16  ;;  %v3886_v57 = vadd.f32 %v3823_v0, %v9787_v26  ;;  %v8045_v1 = vpop.f32.mrf.mxu0 }
 0x1b2   : > { %v8027_v47 = vpop.f32.mrf.mxu1 }
 0x1b3   : > { %v4136_v20 = vadd.f32 %v4073_v17, %v3886_v57  ;;  %v3889_v28 = vadd.f32 %v8027_v47, %v9795_v7  ;;  %v4076_v36 = vpop.f32.mrf.mxu0 }
 0x1b4   : > { %v3826_v44 = vpop.f32.mrf.mxu1 }
 0x1b5   : > { %v4139_v62 = vadd.f32 %v8045_v1, %v3889_v28  ;;  %v3887_v50 = vadd.f32 %v3826_v44, %v9801_v51  ;;  %v8048_v43 = vpop.f32.mrf.mxu0 }
 0x1b6   : > { %v8030_v46 = vpop.f32.mrf.mxu1 }
 0x1b7   : > { %v4137_v14 = vadd.f32 %v4076_v36, %v3887_v50  ;;  %v3892_v24 = vadd.f32 %v8030_v46, %v9806_v52  ;;  %v4089_v22 = vpop.f32.mrf.mxu0 }
 0x1b8   : > { %v3839_v54 = vpop.f32.mrf.mxu1 }
 0x1b9   : > { %v4142_v35 = vadd.f32 %v8048_v43, %v3892_v24  ;;  %v3890_v26 = vadd.f32 %v3839_v54, %v9813_v4  ;;  %v8049_v63 = vpop.f32.mrf.mxu0 }
 0x1ba   : > { %v8031_v33 = vpop.f32.mrf.mxu1 }
 0x1bb   : > { %v4140_v38 = vadd.f32 %v4089_v22, %v3890_v26  ;;  %v3893_v7 = vadd.f32 %v8031_v33, %v9818_v45  ;;  %v4092_v19 = vpop.f32.mrf.mxu0 }
 0x1bc   : > { %v3842_v59 = vpop.f32.mrf.mxu1 }
 0x1bd   : > { %v4143_v15 = vadd.f32 %v8049_v63, %v3893_v7  ;;  %v3891_v51 = vadd.f32 %v3842_v59, %v9824_v58  ;;  %v8052_v41 = vpop.f32.mrf.mxu0 }
 0x1be   : > { %v8034_v55 = vpop.f32.mrf.mxu1 }
 0x1bf   : > { %v4141_v18 = vadd.f32 %v4092_v19, %v3891_v51  ;;  %v3896_v52 = vadd.f32 %v8034_v55, %v9828_v13  ;;  %v4105_v34 = vpop.f32.mrf.mxu0 }
 0x1c0   : > { %v3855_v60 = vpop.f32.mrf.mxu1 }
 0x1c1   : > { %v4146_v11 = vadd.f32 %v8052_v41, %v3896_v52  ;;  %v3894_v4 = vadd.f32 %v3855_v60, %v9832_v61  ;;  %v8053_v23 = vpop.f32.mrf.mxu0 }
 0x1c2   : > { %v8035_v5 = vpop.f32.mrf.mxu1 }
 0x1c3   : > { %v4144_v31 = vadd.f32 %v4105_v34, %v3894_v4  ;;  %v3897_v45 = vadd.f32 %v8035_v5, %v9836_v42  ;;  %v4108_v12 = vpop.f32.mrf.mxu0 }
 0x1c4   : > { %v3858_v29 = vpop.f32.mrf.mxu1 }
 0x1c5   : > { %v4147_v37 = vadd.f32 %v8053_v23, %v3897_v45  ;;  %v3895_v8 = vadd.f32 %v3858_v29, %v3594_v48  ;;  %v8056_v58 = vpop.f32.mrf.mxu0 }
 0x1c6   : > { %v8038_v49 = vpop.f32.mrf.mxu1 }
 0x1c7   : > { %v4145_v32 = vadd.f32 %v4108_v12, %v3895_v8  ;;  %v3900_v25 = vadd.f32 %v8038_v49, %v3599_v53  ;;  %v4121_v56 = vpop.f32.mrf.mxu0 }
 0x1c8   : > { %v3871_v13 = vpop.f32.mrf.mxu1 }
 0x1c9   : > { %v4150_v40 = vadd.f32 %v8056_v58, %v3900_v25  ;;  %v3898_v10 = vadd.f32 %v3871_v13, %v3597_v21  ;;  %v8057_v6 = vpop.f32.mrf.mxu0 }
 0x1ca   : > { %v8039_v27 = vpop.f32.mrf.mxu1 }
 0x1cb   : > { %v4148_v61 = vadd.f32 %v4121_v56, %v3898_v10  ;;  %v3901_v39 = vadd.f32 %v8039_v27, %v3600_v30  ;;  %v4124_v2 = vpop.f32.mrf.mxu0 }
 0x1cc   : > { %v3874_v16 = vpop.f32.mrf.mxu1 }
 0x1cd   : > { %v4151_v17 = vadd.f32 %v8057_v6, %v3901_v39  ;;  %v3899_v42 = vadd.f32 %v3874_v16, %v3598_v3  ;;  %v8080_v0 = vpop.f32.mrf.mxu0 }
 0x1ce   : > { %v8062_v57 = vpop.f32.mrf.mxu1 }
 0x1cf   : > { %v4149_v1 = vadd.f32 %v4124_v2, %v3899_v42  ;;  %v4367_v48 = vadd.f32 %v8062_v57, %v4138_v9  ;;  %v4531_v47 = vpop.f32.mrf.mxu0 }
 0x1d0   : > { %v4302_v28 = vpop.f32.mrf.mxu1 }
 0x1d1   : > { %v4596_v36 = vadd.f32 %v8080_v0, %v4367_v48  ;;  %v4365_v53 = vadd.f32 %v4302_v28, %v4136_v20  ;;  %v8081_v44 = vpop.f32.mrf.mxu0 }
 0x1d2   : > { %v8063_v50 = vpop.f32.mrf.mxu1 }
 0x1d3   : > { %v4594_v43 = vadd.f32 %v4531_v47, %v4365_v53  ;;  %v4368_v21 = vadd.f32 %v8063_v50, %v4139_v62  ;;  %v4534_v46 = vpop.f32.mrf.mxu0 }
 0x1d4   : > { %v4305_v24 = vpop.f32.mrf.mxu1 }
 0x1d5   : > { %v4597_v22 = vadd.f32 %v8081_v44, %v4368_v21  ;;  %v4366_v30 = vadd.f32 %v4305_v24, %v4137_v14  ;;  %v8084_v54 = vpop.f32.mrf.mxu0 }
 0x1d6   : > { %v8066_v26 = vpop.f32.mrf.mxu1 }
 0x1d7   : > { %v4595_v63 = vadd.f32 %v4534_v46, %v4366_v30  ;;  %v4371_v3 = vadd.f32 %v8066_v26, %v4142_v35  ;;  %v4547_v33 = vpop.f32.mrf.mxu0 }
 0x1d8   : > { %v4318_v7 = vpop.f32.mrf.mxu1 }
 0x1d9   : > { %v4600_v19 = vadd.f32 %v8084_v54, %v4371_v3  ;;  %v4369_v9 = vadd.f32 %v4318_v7, %v4140_v38  ;;  %v8085_v59 = vpop.f32.mrf.mxu0 }
 0x1da   : > { %v8067_v51 = vpop.f32.mrf.mxu1 }
 0x1db   : > { %v4598_v41 = vadd.f32 %v4547_v33, %v4369_v9  ;;  %v4372_v20 = vadd.f32 %v8067_v51, %v4143_v15  ;;  %v4550_v55 = vpop.f32.mrf.mxu0 }
 0x1dc   : > { %v4321_v52 = vpop.f32.mrf.mxu1 }
 0x1dd   : > { %v4601_v34 = vadd.f32 %v8085_v59, %v4372_v20  ;;  %v4370_v62 = vadd.f32 %v4321_v52, %v4141_v18  ;;  %v8088_v60 = vpop.f32.mrf.mxu0 }
 0x1de   : > { %v8070_v4 = vpop.f32.mrf.mxu1 }
 0x1df   : > { %v4599_v23 = vadd.f32 %v4550_v55, %v4370_v62  ;;  %v4375_v14 = vadd.f32 %v8070_v4, %v4146_v11  ;;  %v4563_v5 = vpop.f32.mrf.mxu0 }
 0x1e0   : > { %v4334_v45 = vpop.f32.mrf.mxu1 }
 0x1e1   : > { %v4604_v12 = vadd.f32 %v8088_v60, %v4375_v14  ;;  %v4373_v35 = vadd.f32 %v4334_v45, %v4144_v31  ;;  %v8089_v29 = vpop.f32.mrf.mxu0 }
 0x1e2   : > { %v8071_v8 = vpop.f32.mrf.mxu1 }
 0x1e3   : > { %v4602_v58 = vadd.f32 %v4563_v5, %v4373_v35  ;;  %v4376_v38 = vadd.f32 %v8071_v8, %v4147_v37  ;;  %v4566_v49 = vpop.f32.mrf.mxu0 }
 0x1e4   : > { %v4337_v25 = vpop.f32.mrf.mxu1 }
 0x1e5   : > { %v4605_v56 = vadd.f32 %v8089_v29, %v4376_v38  ;;  %v4374_v15 = vadd.f32 %v4337_v25, %v4145_v32  ;;  %v8092_v13 = vpop.f32.mrf.mxu0 }
 0x1e6   : > { %v8074_v10 = vpop.f32.mrf.mxu1 }
 0x1e7   : > { %v4603_v6 = vadd.f32 %v4566_v49, %v4374_v15  ;;  %v4379_v18 = vadd.f32 %v8074_v10, %v4150_v40  ;;  %v4579_v27 = vpop.f32.mrf.mxu0 }
 0x1e8   : > { %v4350_v39 = vpop.f32.mrf.mxu1 }
 0x1e9   : > { %v4608_v2 = vadd.f32 %v8092_v13, %v4379_v18  ;;  %v4377_v11 = vadd.f32 %v4350_v39, %v4148_v61  ;;  %v8093_v16 = vpop.f32.mrf.mxu0 }
 0x1ea   : > { %v8075_v42 = vpop.f32.mrf.mxu1 }
 0x1eb   : > { %v4606_v0 = vadd.f32 %v4579_v27, %v4377_v11  ;;  %v4380_v31 = vadd.f32 %v8075_v42, %v4151_v17  ;;  %v4582_v57 = vpop.f32.mrf.mxu0 }
 0x1ec   : > { %v4353_v48 = vpop.f32.mrf.mxu1 }
 0x1ed   : > { %v4609_v47 = vadd.f32 %v8093_v16, %v4380_v31  ;;  %v4378_v37 = vadd.f32 %v4353_v48, %v4149_v1  ;;  %v8116_v28 = vpop.f32.mrf.mxu0 }
 0x1ee   : > { %v8098_v53 = vpop.f32.mrf.mxu1 }
 0x1ef   : > { %v4607_v44 = vadd.f32 %v4582_v57, %v4378_v37  ;;  %v4897_v32 = vadd.f32 %v8098_v53, %v4596_v36  ;;  %v5133_v50 = vpop.f32.mrf.mxu0 }
 0x1f0   : > { %v4832_v21 = vpop.f32.mrf.mxu1 }
 0x1f1   : > { %v9856_v46 = vadd.f32 %v8116_v28, %v4897_v32  ;;  %v4895_v40 = vadd.f32 %v4832_v21, %v4594_v43  ;;  %v8117_v24 = vpop.f32.mrf.mxu0 }
 0x1f2   : > { %v8099_v30 = vpop.f32.mrf.mxu1 }
 0x1f3   : > { %v9858_v61 = vadd.f32 %v5133_v50, %v4895_v40  ;;  %v4898_v54 = vadd.f32 %v8099_v30, %v4597_v22  ;;  %v5136_v26 = vpop.f32.mrf.mxu0 }
 0x1f4   : > { %v4835_v17 = vpop.f32.mrf.mxu1 }
 0x1f5   : > { %v9860_v3 = vadd.f32 %v8117_v24, %v4898_v54  ;;  %v4896_v33 = vadd.f32 %v4835_v17, %v4595_v63  ;;  %v8120_v1 = vpop.f32.mrf.mxu0 }
 0x1f6   : > { %v8102_v7 = vpop.f32.mrf.mxu1 }
 0x1f7   : > { %v9862_v9 = vadd.f32 %v5136_v26, %v4896_v33  ;;  %v4901_v36 = vadd.f32 %v8102_v7, %v4600_v19  ;;  %v5149_v59 = vpop.f32.mrf.mxu0 }
 0x1f8   : > { %v4848_v51 = vpop.f32.mrf.mxu1 }
 0x1f9   : > { %v9864_v20 = vadd.f32 %v8120_v1, %v4901_v36  ;;  %v4899_v43 = vadd.f32 %v4848_v51, %v4598_v41  ;;  %v8121_v55 = vpop.f32.mrf.mxu0 }
 0x1fa   : > { %v8103_v52 = vpop.f32.mrf.mxu1 }
 0x1fb   : > { %v9866_v62 = vadd.f32 %v5149_v59, %v4899_v43  ;;  %v4902_v22 = vadd.f32 %v8103_v52, %v4601_v34  ;;  %v5152_v60 = vpop.f32.mrf.mxu0 }
 0x1fc   : > { %v4851_v4 = vpop.f32.mrf.mxu1 }
 0x1fd   : > { %v9868_v14 = vadd.f32 %v8121_v55, %v4902_v22  ;;  %v4900_v63 = vadd.f32 %v4851_v4, %v4599_v23  ;;  %v8124_v5 = vpop.f32.mrf.mxu0 }
 0x1fe   : > { %v8106_v45 = vpop.f32.mrf.mxu1 }
 0x1ff   : > { %v9870_v35 = vadd.f32 %v5152_v60, %v4900_v63  ;;  %v4905_v19 = vadd.f32 %v8106_v45, %v4604_v12  ;;  %v5165_v29 = vpop.f32.mrf.mxu0 }
 0x200   : > { %v4864_v8 = vpop.f32.mrf.mxu1 }
 0x201   : > { %v9872_v38 = vadd.f32 %v8124_v5, %v4905_v19  ;;  %v4903_v41 = vadd.f32 %v4864_v8, %v4602_v58  ;;  %v8125_v49 = vpop.f32.mrf.mxu0 }
 0x202   : > { %v8107_v25 = vpop.f32.mrf.mxu1 }
 0x203   : > { %v9874_v15 = vadd.f32 %v5165_v29, %v4903_v41  ;;  %v4906_v34 = vadd.f32 %v8107_v25, %v4605_v56  ;;  %v5168_v13 = vpop.f32.mrf.mxu0 }
 0x204   : > { %v4867_v10 = vpop.f32.mrf.mxu1 }
 0x205   : > { %v9876_v18 = vadd.f32 %v8125_v49, %v4906_v34  ;;  %v4904_v23 = vadd.f32 %v4867_v10, %v4603_v6  ;;  %v8128_v27 = vpop.f32.mrf.mxu0 }
 0x206   : > { %v8110_v39 = vpop.f32.mrf.mxu1 }
 0x207   : > { %v9878_v11 = vadd.f32 %v5168_v13, %v4904_v23  ;;  %v4909_v12 = vadd.f32 %v8110_v39, %v4608_v2  ;;  %v5181_v16 = vpop.f32.mrf.mxu0 }
 0x208   : > { %v4880_v42 = vpop.f32.mrf.mxu1 }
 0x209   : > { %v9880_v31 = vadd.f32 %v8128_v27, %v4909_v12  ;;  %v4907_v58 = vadd.f32 %v4880_v42, %v4606_v0  ;;  %v8129_v57 = vpop.f32.mrf.mxu0 }
 0x20a   : > { %v8111_v48 = vpop.f32.mrf.mxu1 }
 0x20b   : > { %v9882_v37 = vadd.f32 %v5181_v16, %v4907_v58  ;;  %v4910_v56 = vadd.f32 %v8111_v48, %v4609_v47  ;;  %v5184_v28 = vpop.f32.mrf.mxu0 }
 0x20c   : > { %v4883_v53 = vpop.f32.mrf.mxu1 }
 0x20d   : > { %v9884_v32 = vadd.f32 %v8129_v57, %v4910_v56  ;;  %v4908_v6 = vadd.f32 %v4883_v53, %v4607_v44  ;;  %v8152_v50 = vpop.f32.mrf.mxu0 }
 0x20e   : > { %v8134_v21 = vpop.f32.mrf.mxu1 }
 0x20f   : > { %10141 = vst [vmem:[#allocation6_spill] sm:$0xff] %v9884_v32  ;;  %v9886_v40 = vadd.f32 %v5184_v28, %v4908_v6  ;;  %v9888_v2 = vpop.f32.mrf.mxu0 }
 0x210   : > { %v5383_v24 = vpop.f32.mrf.mxu1 }
 0x211   : > { %10142 = vst [vmem:[#allocation7_spill] sm:$0xff] %v9886_v40  ;;  %v9890_v30 = vpop.f32.mrf.mxu0 }
 0x212   : > { %v8135_v0 = vpop.f32.mrf.mxu1 }
 0x213   : > { %v9892_v54 = vpop.f32.mrf.mxu0 }
 0x214   : > { %v5386_v26 = vpop.f32.mrf.mxu1 }
 0x215   : > { %v9894_v17 = vpop.f32.mrf.mxu0 }
 0x216   : > { %v8138_v47 = vpop.f32.mrf.mxu1 }
 0x217   : > { %v9896_v33 = vpop.f32.mrf.mxu0 }
 0x218   : > { %v5399_v1 = vpop.f32.mrf.mxu1 }
 0x219   : > { %v9898_v44 = vpop.f32.mrf.mxu0 }
 0x21a   : > { %v8139_v7 = vpop.f32.mrf.mxu1 }
 0x21b   : > { %v9900_v36 = vpop.f32.mrf.mxu0 }
 0x21c   : > { %v5402_v59 = vpop.f32.mrf.mxu1 }
 0x21d   : > { %v9902_v51 = vpop.f32.mrf.mxu0 }
 0x21e   : > { %v9904_v43 = vpop.f32.mrf.mxu1 }
 0x21f   : > { %v9906_v55 = vpop.f32.mrf.mxu0 }
 0x220   : > { %v9908_v52 = vpop.f32.mrf.mxu1 }
 0x221   : > { %v9910_v22 = vpop.f32.mrf.mxu0 }
 0x222   : > { %v9912_v60 = vpop.f32.mrf.mxu1 }
 0x223   : > { %v9914_v4 = vpop.f32.mrf.mxu0 }
 0x224   : > { %v9916_v63 = vpop.f32.mrf.mxu1 }
 0x225   : > { %v9918_v5 = vpop.f32.mrf.mxu0 }
 0x226   : > { %10143 = vst [vmem:[#allocation8_spill] sm:$0xff] %v9918_v5  ;;  %v9920_v45 = vpop.f32.mrf.mxu1 }
 0x227   : > { %v9922_v19 = vpop.f32.mrf.mxu0 }
 0x228   : > { %10144 = vst [vmem:[#allocation9_spill] sm:$0xff] %v9922_v19  ;;  %v9924_v29 = vpop.f32.mrf.mxu1 }
 0x229   : > { %v9926_v8 = vpop.f32.mrf.mxu0 }
 0x22a   : > { %10145 = vst [vmem:[#allocation10_spill] sm:$0xff] %v9926_v8  ;;  %v9928_v41 = vpop.f32.mrf.mxu1 }
 0x22b   : > { %10146 = vst [vmem:[#allocation11_spill] sm:$0xff] %v9928_v41  ;;  %v9930_v49 = vpop.f32.mrf.mxu0 }
 0x22c   : > { %10147 = vst [vmem:[#allocation12_spill] sm:$0xff] %v9930_v49  ;;  %v9932_v25 = vpop.f32.mrf.mxu1 }
 0x22d   : > { %10148 = vst [vmem:[#allocation13_spill] sm:$0xff] %v9932_v25  ;;  %v8188_v34 = vpop.f32.mrf.mxu0 }
 0x22e   : > { %v8170_v13 = vpop.f32.mrf.mxu1 }
 0x22f   : > { %v6142_v10 = vpop.f32.mrf.mxu0 }
 0x230   : > { %v5841_v23 = vpop.f32.mrf.mxu1 }
 0x231   : > { %v8189_v27 = vpop.f32.mrf.mxu0 }
 0x232   : > { %v8171_v39 = vpop.f32.mrf.mxu1 }
 0x233   : > { %v9934_v12 = vpop.f32.mrf.mxu0 }
 0x234   : > { %v5844_v16 = vpop.f32.mrf.mxu1 }
 0x235   : > { %v9936_v42 = vpop.f32.mrf.mxu0 }
 0x236   : > { %v8174_v58 = vpop.f32.mrf.mxu1 }
 0x237   : > { %v9938_v57 = vpop.f32.mrf.mxu0 }
 0x238   : > { %10149 = vst [vmem:[#allocation14_spill] sm:$0xff] %v9938_v57  ;;  %v5857_v48 = vpop.f32.mrf.mxu1 }
 0x239   : > { %v9940_v56 = vpop.f32.mrf.mxu0 }
 0x23a   : > { %10150 = vst [vmem:[#allocation15_spill] sm:$0xff] %v9940_v56  ;;  %v9942_v28 = vpop.f32.mrf.mxu1  ;;  %v5448_v56 = vadd.f32 %v8134_v21, %v9856_v46 }
 0x23b   : > { %v9944_v53 = vpop.f32.mrf.mxu0 }
 0x23c   : > { %10151 = vst [vmem:[#allocation16_spill] sm:$0xff] %v9944_v53  ;;  %v9946_v6 = vpop.f32.mrf.mxu1  ;;  %v5446_v53 = vadd.f32 %v5383_v24, %v9858_v61  ;;  %v5452_v24 = vadd.f32 %v8138_v47, %v9864_v20 }
 0x23d   : > { %v9948_v49 = vpop.f32.mrf.mxu0 }
 0x23e   : > { %10152 = vst [vmem:[#allocation17_spill] sm:$0xff] %v9948_v49  ;;  %v9950_v8 = vpop.f32.mrf.mxu1  ;;  %v5675_v46 = vadd.f32 %v9888_v2, %v5446_v53  ;;  %v5451_v2 = vadd.f32 %v5402_v59, %v9870_v35  ;;  %v5681_v20 = vadd.f32 %v9894_v17, %v5452_v24  ;;  %v5454_v35 = vadd.f32 %v9908_v52, %v9874_v15  ;;  %v10003_v17 = vld [vmem:[%s10137_s2] ss:$0 sm:$0xff]  ;;  %v10161_v24 = vld [vmem:[#allocation8_spill] sm:$0xff] }
 0x23f   : > { %10153 = vst [vmem:[#allocation18_spill] sm:$0xff] %v9950_v8  ;;  %v9952_v25 = vpop.f32.mrf.mxu0  ;;  %v5677_v8 = vadd.f32 %v8152_v50, %v5448_v56  ;;  %v5450_v50 = vadd.f32 %v5399_v1, %v9866_v62  ;;  %v5460_v15 = vadd.f32 %v9920_v45, %v9880_v31  ;;  %v5458_v31 = vadd.f32 %v9924_v29, %v9882_v37  ;;  %v10162_v29 = vld [vmem:[#allocation14_spill] sm:$0xff] }
 0x240   : > { %10154 = vst [vmem:[#allocation19_spill] sm:$0xff] %v9952_v25  ;;  %v9954_v40 = vpop.f32.mrf.mxu1  ;;  %v5449_v25 = vadd.f32 %v8135_v0, %v9860_v3  ;;  %v5904_v3 = vadd.f32 %v5841_v23, %v5675_v46  ;;  %v5680_v59 = vadd.f32 %v9900_v36, %v5451_v2  ;;  %v5683_v46 = vadd.f32 %v9906_v55, %v5454_v35 }
 0x241   : > { %10155 = vst [vmem:[#allocation20_spill] sm:$0xff] %v9954_v40  ;;  %v9956_v41 = vpop.f32.mrf.mxu0  ;;  %v5906_v21 = vadd.f32 %v8170_v13, %v5677_v8  ;;  %v5679_v62 = vadd.f32 %v9896_v33, %v5450_v50  ;;  %v5689_v37 = vadd.f32 %v10161_v24, %v5460_v15 }
 0x242   : > { %10156 = vst [vmem:[#allocation21_spill] sm:$0xff] %v9956_v41  ;;  %v9958_v32 = vpop.f32.mrf.mxu1  ;;  %v5447_v41 = vadd.f32 %v5386_v26, %v9862_v9  ;;  %v5678_v61 = vadd.f32 %v9890_v30, %v5449_v25  ;;  %v5453_v26 = vadd.f32 %v8139_v7, %v9868_v14  ;;  %v6205_v47 = vadd.f32 %v6142_v10, %v5904_v3 }
 0x243   : > { %10157 = vst [vmem:[#allocation22_spill] sm:$0xff] %v9958_v32  ;;  %v9961_v19 = vpop.f32.mrf.mxu0  ;;  %v6207_v8 = vadd.f32 %v8188_v34, %v5906_v21  ;;  %v5456_v14 = vadd.f32 %v9904_v43, %v9872_v38  ;;  %v5457_v7 = vadd.f32 %v9912_v60, %v9876_v18  ;;  %v5455_v38 = vadd.f32 %v9916_v63, %v9878_v11 }
 0x244   : > { %10158 = vst [vmem:[#allocation23_spill] sm:$0xff] %v9961_v19  ;;  %v9963_v57 = vpop.f32.mrf.mxu1  ;;  %v5676_v9 = vadd.f32 %v9892_v54, %v5447_v41  ;;  %v5907_v13 = vadd.f32 %v8171_v39, %v5678_v61  ;;  %v5682_v54 = vadd.f32 %v9898_v44, %v5453_v26  ;;  %v5910_v43 = vadd.f32 %v8174_v58, %v5681_v20  ;;  %v10163_v26 = vld [vmem:[#allocation9_spill] sm:$0xff] }
 0x245   : > { %10159 = vst [vmem:[#allocation24_spill] sm:$0xff] %v9963_v57  ;;  %v9966_v5 = vpop.f32.mrf.mxu0  ;;  %v5908_v60 = vadd.f32 %v5857_v48, %v5679_v62  ;;  %v5686_v11 = vadd.f32 %v9910_v22, %v5457_v7  ;;  %v5684_v21 = vadd.f32 %v9914_v4, %v5455_v38  ;;  %v5687_v2 = vadd.f32 %v10163_v26, %v5458_v31  ;;  %v10168_v15 = vld [vmem:[#allocation17_spill] sm:$0xff] }
 0x246   : > { %v9968_v49 = vpop.f32.mrf.mxu1  ;;  %v6208_v41 = vadd.f32 %v8189_v27, %v5907_v13  ;;  %v5685_v27 = vadd.f32 %v9902_v51, %v5456_v14  ;;  %v5911_v45 = vadd.f32 %v9942_v28, %v5682_v54  ;;  %v6211_v61 = vadd.f32 %v9936_v42, %v5910_v43 }
 0x247   : > { %v9971_v40 = vpop.f32.mrf.mxu0  ;;  %v5909_v51 = vadd.f32 %v9946_v6, %v5680_v59  ;;  %v6209_v50 = vadd.f32 %v10162_v29, %v5908_v60 }
 0x248   : > { %v9974_v32 = vpop.f32.mrf.mxu1  ;;  %v10167_v14 = vld [vmem:[#allocation20_spill] sm:$0xff] }
 0x249   : > { %v9977_v19 = vpop.f32.mrf.mxu0  ;;  %v5912_v35 = vadd.f32 %v10167_v14, %v5683_v46 }
 0x24a   : > { %10160 = vst [vmem:[#allocation25_spill] sm:$0xff] %v9977_v19  ;;  %v9979_v57 = vpop.f32.mrf.mxu1  ;;  %v5905_v19 = vadd.f32 %v5844_v16, %v5676_v9  ;;  %v10169_v43 = vld [vmem:[#allocation22_spill] sm:$0xff] }
 0x24b   : > { %v9984_v0 = vpop.f32.mrf.mxu0 }
 0x24c   : > { %v9988_v56 = vpop.f32.mrf.mxu1  ;;  %v6206_v18 = vadd.f32 %v9934_v12, %v5905_v19  ;;  %v10176_v26 = vld [vmem:[#allocation24_spill] sm:$0xff] }
 0x24d   : > { %v8224_v53 = vpop.f32.mrf.mxu0 }
 0x24e   : > { %v8206_v30 = vpop.f32.mrf.mxu1 }
 0x24f   : > { %v6508_v1 = vadd.f32 %v8206_v30, %v6207_v8  ;;  %v6693_v25 = vpop.f32.mrf.mxu0  ;;  %v10164_v8 = vld [vmem:[#allocation18_spill] sm:$0xff]  ;;  %v10165_v30 = vld [vmem:[#allocation15_spill] sm:$0xff] }
 0x250   : > { %v6443_v33 = vpop.f32.mrf.mxu1  ;;  %v5914_v4 = vadd.f32 %v10164_v8, %v5685_v27  ;;  %v6212_v6 = vadd.f32 %v10165_v30, %v5911_v45  ;;  %v10171_v45 = vld [vmem:[#allocation11_spill] sm:$0xff]  ;;  %v5913_v8 = vadd.f32 %v10176_v26, %v5684_v21 }
 0x251   : > { %v6758_v34 = vadd.f32 %v8224_v53, %v6508_v1  ;;  %v6506_v44 = vadd.f32 %v6443_v33, %v6205_v47  ;;  %v8225_v10 = vpop.f32.mrf.mxu0 }
 0x252   : > { %v8207_v52 = vpop.f32.mrf.mxu1 }
 0x253   : > { %v6813_v23 = vadd.f32 %v10003_v17, %v6758_v34  ;;  %v6756_v39 = vadd.f32 %v6693_v25, %v6506_v44  ;;  %v6509_v16 = vadd.f32 %v8207_v52, %v6208_v41  ;;  %v6696_v36 = vpop.f32.mrf.mxu0  ;;  %v10166_v25 = vld [vmem:[#allocation16_spill] sm:$0xff]  ;;  %v5915_v52 = vadd.f32 %v10169_v43, %v5686_v11  ;;  %v10174_v11 = vld [vmem:[#allocation19_spill] sm:$0xff] }
 0x254   : > { %v6446_v63 = vpop.f32.mrf.mxu1  ;;  %v6210_v54 = vadd.f32 %v10166_v25, %v5909_v51  ;;  %v5916_v25 = vadd.f32 %v9974_v32, %v5687_v2 }
 0x255   : > { %v6811_v19 = vadd.f32 %v10003_v17, %v6756_v39  ;;  %v6759_v12 = vadd.f32 %v8225_v10, %v6509_v16  ;;  %v6507_v58 = vadd.f32 %v6446_v63, %v6206_v18  ;;  %v8228_v48 = vpop.f32.mrf.mxu0  ;;  %v6829_v55 = vmul.f32 0.2, %v6813_v23  ;;  %v10170_v63 = vld [vmem:[#allocation6_spill] sm:$0xff] }
 0x256   : > { %v8210_v22 = vpop.f32.mrf.mxu1  ;;  %v6215_v18 = vadd.f32 %v10168_v15, %v5914_v4  ;;  %v5918_v4 = vadd.f32 %v9968_v49, %v5689_v37 }
 0x257   : > { %v6814_v28 = vadd.f32 %v10003_v17, %v6759_v12  ;;  %v6757_v3 = vadd.f32 %v6696_v36, %v6507_v58  ;;  %v6709_v9 = vpop.f32.mrf.mxu0  ;;  %v6827_v13 = vmul.f32 0.2, %v6811_v19  ;;  %v6512_v42 = vadd.f32 %v8210_v22, %v6211_v61  ;;  %v10172_v58 = vld [vmem:[#allocation7_spill] sm:$0xff] }
 0x258   : > { %v6459_v53 = vpop.f32.mrf.mxu1  ;;  %v6845_v7 = vmax.f32 %v6813_v23, %v6829_v55  ;;  %v5461_v12 = vadd.f32 %v10171_v45, %v10170_v63 }
 0x259   : > { %v6830_v20 = vmul.f32 0.2, %v6814_v28  ;;  %v6812_v62 = vadd.f32 %v10003_v17, %v6757_v3  ;;  %v6510_v47 = vadd.f32 %v6459_v53, %v6209_v50  ;;  %v8229_v1 = vpop.f32.mrf.mxu0  ;;  %v6762_v33 = vadd.f32 %v8228_v48, %v6512_v42  ;;  %v10173_v48 = vld [vmem:[#allocation13_spill] sm:$0xff] }
 0x25a   : > { %v8211_v59 = vpop.f32.mrf.mxu1  ;;  %v6843_v60 = vmax.f32 %v6811_v19, %v6827_v13  ;;  %v5459_v61 = vadd.f32 %v10173_v48, %v10172_v58  ;;  %v6213_v19 = vadd.f32 %v10174_v11, %v5912_v35  ;;  %v10175_v3 = vld [vmem:[#allocation21_spill] sm:$0xff] }
 0x25b   : > { %v6846_v41 = vmax.f32 %v6814_v28, %v6830_v20  ;;  %v6828_v34 = vmul.f32 0.2, %v6812_v62  ;;  %v6760_v44 = vadd.f32 %v6709_v9, %v6510_v47  ;;  %v6513_v10 = vadd.f32 %v8211_v59, %v6212_v6  ;;  %v6712_v38 = vpop.f32.mrf.mxu0  ;;  %v10177_v47 = vld [vmem:[#allocation10_spill] sm:$0xff]  ;;  %v10178_v59 = vld [vmem:[#allocation12_spill] sm:$0xff]  ;;  %v10180_v58 = vld [vmem:[#allocation25_spill] sm:$0xff] }
 0x25c   : > { %v6817_v39 = vadd.f32 %v10003_v17, %v6762_v33  ;;  %v6462_v16 = vpop.f32.mrf.mxu1  ;;  %v6216_v9 = vadd.f32 %v10175_v3, %v5915_v52 }
 0x25d   : > { %v7524_v36 = vpack.c.bf16 %v6846_v41, %v6845_v7  ;;  %v6844_v27 = vmax.f32 %v6812_v62, %v6828_v34  ;;  %v6815_v23 = vadd.f32 %v10003_v17, %v6760_v44  ;;  %v6763_v46 = vadd.f32 %v8229_v1, %v6513_v10  ;;  %v8232_v31 = vpop.f32.mrf.mxu0  ;;  %v10179_v34 = vld [vmem:[#allocation23_spill] sm:$0xff] }
 0x25e   : > { %v6833_v51 = vmul.f32 0.2, %v6817_v39  ;;  %v6511_v55 = vadd.f32 %v6462_v16, %v6210_v54  ;;  %v8214_v22 = vpop.f32.mrf.mxu1  ;;  %v5690_v1 = vadd.f32 %v10177_v47, %v5461_v12  ;;  %v5688_v41 = vadd.f32 %v10178_v59, %v5459_v61 }
 0x25f   : > { %7556 = vst [vmem:[%s10046_s8 + $0x8] sm:$0xff] %v7524_v36   ;;  %v7519_v24 = vpack.c.bf16 %v6844_v27, %v6843_v60  ;;  %v6818_v29 = vadd.f32 %v10003_v17, %v6763_v46  ;;  %v6516_v50 = vadd.f32 %v8214_v22, %v6215_v18  ;;  %v6725_v28 = vpop.f32.mrf.mxu0  ;;  %v6831_v53 = vmul.f32 0.2, %v6815_v23 }
 0x260   : > { %v6761_v13 = vadd.f32 %v6712_v38, %v6511_v55  ;;  %v6475_v42 = vpop.f32.mrf.mxu1  ;;  %v6849_v54 = vmax.f32 %v6817_v39, %v6833_v51  ;;  %v6214_v44 = vadd.f32 %v10179_v34, %v5913_v8  ;;  %v6219_v10 = vadd.f32 %v9966_v5, %v5918_v4 }
 0x261   : > { %7520 = vst [vmem:[%s10046_s8] sm:$0xff] %v7519_v24   ;;  %v6834_v30 = vmul.f32 0.2, %v6818_v29  ;;  %v6766_v6 = vadd.f32 %v8232_v31, %v6516_v50  ;;  %v6514_v20 = vadd.f32 %v6475_v42, %v6213_v19  ;;  %v8233_v62 = vpop.f32.mrf.mxu0  ;;  %v5919_v32 = vadd.f32 %v9979_v57, %v5690_v1 }
 0x262   : > { %v6816_v14 = vadd.f32 %v10003_v17, %v6761_v13  ;;  %v8215_v35 = vpop.f32.mrf.mxu1  ;;  %v6847_v2 = vmax.f32 %v6815_v23, %v6831_v53  ;;  %v6217_v46 = vadd.f32 %v9971_v40, %v5916_v25  ;;  %v5917_v57 = vadd.f32 %v9988_v56, %v5688_v41 }
 0x263   : > { %v6850_v7 = vmax.f32 %v6818_v29, %v6834_v30  ;;  %v6821_v21 = vadd.f32 %v10003_v17, %v6766_v6  ;;  %v6764_v49 = vadd.f32 %v6725_v28, %v6514_v20  ;;  %v6517_v37 = vadd.f32 %v8215_v35, %v6216_v9  ;;  %v6728_v33 = vpop.f32.mrf.mxu0 }
 0x264   : > { %v6832_v38 = vmul.f32 0.2, %v6816_v14  ;;  %v6478_v15 = vpop.f32.mrf.mxu1  ;;  %v6220_v48 = vadd.f32 %v10180_v58, %v5919_v32  ;;  %v6218_v3 = vadd.f32 %v9984_v0, %v5917_v57 }
 0x265   : > { %v7534_v18 = vpack.c.bf16 %v6850_v7, %v6849_v54  ;;  %v6767_v43 = vadd.f32 %v8233_v62, %v6517_v37  ;;  %v8236_v52 = vpop.f32.mrf.mxu0  ;;  %v6837_v39 = vmul.f32 0.2, %v6821_v21  ;;  %v6819_v16 = vadd.f32 %v10003_v17, %v6764_v49 }
 0x266   : > { %v6848_v60 = vmax.f32 %v6816_v14, %v6832_v38  ;;  %v6515_v36 = vadd.f32 %v6478_v15, %v6214_v44  ;;  %v8218_v27 = vpop.f32.mrf.mxu1 }
 0x267   : > { %7558 = vst [vmem:[%s10046_s8 + $0x18] sm:$0xff] %v7534_v18   ;;  %v6822_v5 = vadd.f32 %v10003_v17, %v6767_v43  ;;  %v6520_v31 = vadd.f32 %v8218_v27, %v6219_v10  ;;  %v6741_v63 = vpop.f32.mrf.mxu0  ;;  %v6853_v22 = vmax.f32 %v6821_v21, %v6837_v39  ;;  %v6835_v11 = vmul.f32 0.2, %v6819_v16 }
 0x268   : > { %v7529_v23 = vpack.c.bf16 %v6848_v60, %v6847_v2  ;;  %v6765_v45 = vadd.f32 %v6728_v33, %v6515_v36  ;;  %v6491_v12 = vpop.f32.mrf.mxu1 }
 0x269   : > { %v6838_v61 = vmul.f32 0.2, %v6822_v5  ;;  %v6770_v51 = vadd.f32 %v8236_v52, %v6520_v31  ;;  %v6518_v55 = vadd.f32 %v6491_v12, %v6217_v46  ;;  %v8237_v28 = vpop.f32.mrf.mxu0  ;;  %v6851_v13 = vmax.f32 %v6819_v16, %v6835_v11 }
 0x26a   : > { %7557 = vst [vmem:[%s10046_s8 + $0x10] sm:$0xff] %v7529_v23   ;;  %v6820_v40 = vadd.f32 %v10003_v17, %v6765_v45  ;;  %v8219_v19 = vpop.f32.mrf.mxu1 }
 0x26b   : > { %v6854_v24 = vmax.f32 %v6822_v5, %v6838_v61  ;;  %v6825_v29 = vadd.f32 %v10003_v17, %v6770_v51  ;;  %v6768_v50 = vadd.f32 %v6741_v63, %v6518_v55  ;;  %v6521_v56 = vadd.f32 %v8219_v19, %v6220_v48  ;;  %v6744_v62 = vpop.f32.mrf.mxu0 }
 0x26c   : > { %v6836_v9 = vmul.f32 0.2, %v6820_v40  ;;  %v6494_v26 = vpop.f32.mrf.mxu1 }
 0x26d   : > { %v7544_v8 = vpack.c.bf16 %v6854_v24, %v6853_v22  ;;  %v6771_v4 = vadd.f32 %v8237_v28, %v6521_v56  ;;  %v6823_v53 = vadd.f32 %v10003_v17, %v6768_v50  ;;  %v6519_v30 = vadd.f32 %v6494_v26, %v6218_v3 }
 0x26e   : > { %v6852_v42 = vmax.f32 %v6820_v40, %v6836_v9  ;;  %v6841_v6 = vmul.f32 0.2, %v6825_v29 }
 0x26f   : > { %7560 = vst [vmem:[%s10046_s8 + $0x28] sm:$0xff] %v7544_v8   ;;  %v6826_v20 = vadd.f32 %v10003_v17, %v6771_v4  ;;  %v6769_v0 = vadd.f32 %v6744_v62, %v6519_v30  ;;  %v6839_v25 = vmul.f32 0.2, %v6823_v53 }
 0x270   : > { %v7539_v47 = vpack.c.bf16 %v6852_v42, %v6851_v13  ;;  %v6857_v14 = vmax.f32 %v6825_v29, %v6841_v6 }
 0x271   : > { %v6842_v1 = vmul.f32 0.2, %v6826_v20  ;;  %v6824_v54 = vadd.f32 %v10003_v17, %v6769_v0  ;;  %v6855_v49 = vmax.f32 %v6823_v53, %v6839_v25 }
 0x272   : > { %7559 = vst [vmem:[%s10046_s8 + $0x20] sm:$0xff] %v7539_v47  }
 0x273   : > { %v6858_v35 = vmax.f32 %v6826_v20, %v6842_v1  ;;  %v6840_v7 = vmul.f32 0.2, %v6824_v54 }
 0x275   : > { %v7554_v21 = vpack.c.bf16 %v6858_v35, %v6857_v14  ;;  %v6856_v37 = vmax.f32 %v6824_v54, %v6840_v7 }
 0x277   : > { %7562 = vst [vmem:[%s10046_s8 + $0x38] sm:$0xff] %v7554_v21   ;;  %v7549_v17 = vpack.c.bf16 %v6856_v37, %v6855_v49 }
 0x279   : > { %7561 = vst [vmem:[%s10046_s8 + $0x30] sm:$0xff] %v7549_v17  }
 0x27a   : > { %8551 = shalt.err (!%p8548_p5)
}
 0x27b   : > { %s8552_s29 = scalar_lea.hbm %s10083_s21, 1024  ;;  %s8556_s9 = scalar_lea.hbm %s10138_s3, 2048 }
 0x27c   : > { %p8553_p6 = scmp.ne.s32.totalorder %s10083_s21, %s8552_s29  ;;  %p8557_p10 = scmp.lt.s32.totalorder %s10083_s21, %s10138_s3 }
 0x27d   : > { %p8558_p11 = scmp.lt.s32.totalorder %s8556_s9, %s8552_s29 }
 0x27e   : > { %p8554_p7 = pnand %p8553_p6, %p8679_p4 }
 0x27f   : > { %p8559_p12 = por %p8558_p11, %p8557_p10 }
 0x280   : > { %p8555_p9 = pneg %p8554_p7 }
 0x282   : > { %p8560_p13 = pnand %p8559_p12, %p8555_p9 }
 0x284   : > { %8563 = shalt.err (!%p8560_p13)
}
 0x285   : > { %s8617_s7 = smov 64   ;;  %s8618_s8 = smov 4  }
 0x286   : > { %8266 = dma.vmem_to_hbm [thread:$0]  (%p8679_p4), %s10085_s11, 1024, %s10083_s21, %s10090_s23, %s8617_s7, %s8617_s7, %s8618_s8  }
 0x287 PF: > { %p8272_p0 = scmp.ge.s32.totalorder %s8614_s17, 2  ;;  %s6969_s10 = sand.u32 1, %s8594_s12  }
 0x288   : > { %s6970_s18 = scalar_lea.sflag [#allocation4], %s6969_s10 }
 0x289   : > { %p8269_p1 = pnand %p8272_p0, %p8686_p8 }
 0x28b   : > { %p8270_p2 = pneg %p8269_p1 }
 0x28d   : > { %8589 = dma.done.wait (%p8270_p2), %s6970_s18, 1024  }
 0x28e   : > { %8591 = vsyncadd (%p8270_p2), %s6970_s18, 4294966272  ;;  %s16_s17 = sadd.s32 1, %s8614_s17   ;;  %s10181_s12 = smov %s8598_s13 }
 0x28f   : > { %p13_p3 = scmp.ge.s32.totalorder %s16_s17, 4   ;;  %s10182_s13 = smov %s8602_s14 }
 0x290   : > { %s10183_s14 = smov %s8692_s25  ;;  %s10184_s15 = smov %s8610_s16 }
 0x291   : > { %s10185_s16 = smov %s10187_s20  ;;  %15 = sbr.rel (!%p13_p3) target bundleno = 4 (0x4), region = 73 }
 0x296   :  { %6975 = vsyncpa [#allocation4], 1 }
 0x297   :  { %6977 = vsyncpa [#allocation4 + $0x1], 1 }

</bundles_post_ra>
